<compile_context>
chip_gen: v7x
topology: tpu7x:2x2x1
jax: 0.10.0
libtpu: 0.0.40
codegen_flags: <defaults>
</compile_context>

<pallas_src>
import math

import jax
import jax.numpy as jnp
from jax.experimental import pallas as pl
from jax.experimental.pallas import tpu as pltpu


BN_EPS = 0.8          # BatchNorm1d(out_feat, 0.8) -> second positional arg is eps
LEAKY_SLOPE = 0.2
LANE = 128            # TPU lane width: keep output tiles multiples of this
MAX_OUT_TILE = 2048   # max width of one streamed W5 / output tile (multiple of 128)


def _cdiv(a, b):
    return (a + b - 1) // b


def _tile_plan(out_dim):
    """Lane-dense tiling of the final layer's output features.

    Returns (tile_n, padded_out, num_tiles, num_cores) with
    padded_out = tile_n * num_tiles, tile_n a multiple of 128, and num_tiles
    even whenever > 1 so the streamed tiles can split across 2 TensorCores.
    """
    lanes = _cdiv(out_dim, LANE)
    num_tiles = _cdiv(lanes, MAX_OUT_TILE // LANE)
    if num_tiles > 1 and num_tiles % 2:
        num_tiles += 1
    tile_n = _cdiv(lanes, num_tiles) * LANE
    padded_out = tile_n * num_tiles
    num_cores = 2 if (num_tiles >= 2 and num_tiles % 2 == 0) else 1
    return tile_n, padded_out, num_tiles, num_cores


def _leaky_relu(x):
    return jnp.where(x > 0, x, LEAKY_SLOPE * x)


def _linear_bf16(x, w_ref, b_ref):
    # x: (B, in) f32/bf16, w: (in, out) bf16, b: (1, out) f32.
    # bf16 MXU matmul with f32 accumulation; bias added in f32.
    return (
        jnp.dot(x.astype(jnp.bfloat16), w_ref[...],
                preferred_element_type=jnp.float32)
        + b_ref[...]
    )


def _batchnorm_train(y, g_ref, be_ref):
    # Training-mode BatchNorm1d: biased batch statistics, exact over the whole
    # (VMEM-resident) batch.  Affine folded into one fused scale/shift.
    mean = jnp.mean(y, axis=0, keepdims=True)
    var = jnp.mean(jnp.square(y - mean), axis=0, keepdims=True)
    scale = g_ref[...] * jax.lax.rsqrt(var + BN_EPS)
    shift = be_ref[...] - mean * scale
    return y * scale + shift


def generator_kernel(
    z_ref,
    w1_ref, b1_ref,
    w2_ref, b2_ref, g2_ref, be2_ref,
    w3_ref, b3_ref, g3_ref, be3_ref,
    w4_ref, b4_ref, g4_ref, be4_ref,
    w5_ref, b5_ref,
    out_ref,
    h4_ref,
):
    # Hidden trunk (layers 1-4) computed once per core, at its first streamed
    # tile; persists in bf16 VMEM scratch across the sequential tile axis.
    @pl.when(pl.program_id(1) == 0)
    def _():
        z = z_ref[...].astype(jnp.float32)
        h = _leaky_relu(_linear_bf16(z, w1_ref, b1_ref))
        h = _leaky_relu(_batchnorm_train(_linear_bf16(h, w2_ref, b2_ref), g2_ref, be2_ref))
        h = _leaky_relu(_batchnorm_train(_linear_bf16(h, w3_ref, b3_ref), g3_ref, be3_ref))
        h = _leaky_relu(_batchnorm_train(_linear_bf16(h, w4_ref, b4_ref), g4_ref, be4_ref))
        h4_ref[...] = h.astype(jnp.bfloat16)

    # Streamed final layer: one lane-dense (B, TN) tile of the image per step.
    y = _linear_bf16(h4_ref[...], w5_ref, b5_ref)
    out_ref[...] = jnp.tanh(y).astype(out_ref.dtype)


def init_params(key, latent_dim, img_shape):
    """Deterministic PyTorch-like (Kaiming-uniform) init.  Weights in bf16.

    W5/b5 are stored already padded to the streaming tile plan (padded columns
    are zero -> tanh(0)=0, sliced off in the wrapper).
    """
    out_dim = int(math.prod(img_shape))
    _, padded_out, _, _ = _tile_plan(out_dim)

    dims = [latent_dim, 128, 256, 512, 1024, out_dim]
    params = {}
    keys = jax.random.split(key, 2 * (len(dims) - 1))
    for i in range(len(dims) - 1):
        fan_in, fan_out = dims[i], dims[i + 1]
        bound = 1.0 / math.sqrt(fan_in)
        w = jax.random.uniform(keys[2 * i], (fan_in, fan_out), jnp.float32, -bound, bound)
        b = jax.random.uniform(keys[2 * i + 1], (1, fan_out), jnp.float32, -bound, bound)
        if i == len(dims) - 2:        # final layer: pad once at init
            pad = padded_out - out_dim
            if pad:
                w = jnp.pad(w, ((0, 0), (0, pad)))
                b = jnp.pad(b, ((0, 0), (0, pad)))
        params[f"w{i + 1}"] = w.astype(jnp.bfloat16)   # MXU-native, half the DMA
        params[f"b{i + 1}"] = b                        # bias stays f32
    # BatchNorm affine params for layers 2..4 (gamma=1, beta=0, PyTorch default)
    for i, feat in zip((2, 3, 4), (256, 512, 1024)):
        params[f"g{i}"] = jnp.ones((1, feat), jnp.float32)
        params[f"be{i}"] = jnp.zeros((1, feat), jnp.float32)
    return params


def base_generator_forward(z, params, img_shape):
    B, latent_dim = z.shape
    out_dim = int(math.prod(img_shape))
    tn, padded_out, num_tiles, num_cores = _tile_plan(out_dim)
    tiles_per_core = num_tiles // num_cores

    w5 = params["w5"]
    b5 = params["b5"]
    assert w5.shape == (1024, padded_out) and b5.shape == (1, padded_out), (
        "params['w5']/['b5'] must be pre-padded by init_params for this img_shape")

    trunk_args = (
        z,
        params["w1"], params["b1"],
        params["w2"], params["b2"], params["g2"], params["be2"],
        params["w3"], params["b3"], params["g3"], params["be3"],
        params["w4"], params["b4"], params["g4"], params["be4"],
    )
    args = trunk_args + (w5, b5)

    # Constant trunk inputs: one resident VMEM copy each, no pipelining buffers.
    vmem_resident = pl.BlockSpec(memory_space=pltpu.MemorySpace.VMEM)

    def _tile_idx(c, j):
        return (0, c * tiles_per_core + j)

    in_specs = [vmem_resident] * len(trunk_args) + [
        pl.BlockSpec((1024, tn), _tile_idx),   # W5 slice (streamed, double-buffered)
        pl.BlockSpec((1, tn), _tile_idx),      # b5 slice
    ]
    out_spec = pl.BlockSpec((B, tn), _tile_idx)

    def _nbytes(x):
        return int(x.size) * x.dtype.itemsize

    # VMEM budget: single-buffered resident trunk + bf16 h4 scratch + live f32
    # trunk intermediates (under the pl.when at j==0) + double-buffered
    # streamed tiles, with margin; capped well below v7x's 64 MiB.
    resident = (
        sum(_nbytes(a) for a in trunk_args)                    # trunk (1x, VMEM-resident)
        + B * 1024 * 2                                         # h4 scratch (bf16)
        + 2 * (1024 * tn * 2)                                  # double-buffered W5 tile (bf16)
        + 2 * (tn * 4)                                         # double-buffered b5 tile (f32)
        + 2 * (B * tn * 4)                                     # double-buffered output tile (f32)
        + 6 * B * (latent_dim + 128 + 256 + 512 + 1024)        # live trunk intermediates (f32+bf16)
    )
    vmem_limit = max(16 << 20, min(int(1.5 * resident) + (4 << 20), 48 << 20))

    flops = 2 * B * (
        latent_dim * 128 + 128 * 256 + 256 * 512 + 512 * 1024 + 1024 * padded_out
    )
    bytes_accessed = sum(_nbytes(a) for a in args) + B * padded_out * 4
    cost = pl.CostEstimate(
        flops=flops,
        transcendentals=B * padded_out + 1792,   # tanh + BN rsqrt
        bytes_accessed=bytes_accessed,
    )

    flat_img = pl.pallas_call(
        generator_kernel,
        out_shape=jax.ShapeDtypeStruct((B, padded_out), jnp.float32),
        grid_spec=pltpu.PrefetchScalarGridSpec(
            num_scalar_prefetch=0,
            grid=(num_cores, tiles_per_core),
            in_specs=in_specs,
            out_specs=out_spec,
            scratch_shapes=[pltpu.VMEM((B, 1024), jnp.bfloat16)],   # h4 trunk output
        ),
        compiler_params=pltpu.CompilerParams(
            # Outer axis splits the streamed tiles across v7x's two TensorCores
            # (each recomputes the tiny trunk); inner axis reuses the scratch.
            dimension_semantics=("parallel", "arbitrary"),
            vmem_limit_bytes=int(vmem_limit),
        ),
        cost_estimate=cost,
    )(*args)

    # Same as img.view(B, *img_shape) — drop padding, row-major reshape.
    return flat_img[:, :out_dim].reshape((B,) + tuple(img_shape))


def _reference_forward(z, params, img_shape):
    """Pure-JAX reference mirroring the kernel's bf16-matmul / f32-BN math."""
    out_dim = int(math.prod(img_shape))

    def lin(x, w, b):
        return jnp.dot(x.astype(jnp.bfloat16), w,
                       preferred_element_type=jnp.float32) + b

    def bn(y, g, be):
        mean = jnp.mean(y, axis=0, keepdims=True)
        var = jnp.mean(jnp.square(y - mean), axis=0, keepdims=True)
        return (y - mean) * (g * jax.lax.rsqrt(var + BN_EPS)) + be

    def lrelu(x):
        return jnp.where(x > 0, x, LEAKY_SLOPE * x)

    h = lrelu(lin(z.astype(jnp.float32), params["w1"], params["b1"]))
    h = lrelu(bn(lin(h, params["w2"], params["b2"]), params["g2"], params["be2"]))
    h = lrelu(bn(lin(h, params["w3"], params["b3"]), params["g3"], params["be3"]))
    h = lrelu(bn(lin(h, params["w4"], params["b4"]), params["g4"], params["be4"]))
    y = jnp.tanh(lin(h, params["w5"], params["b5"]))
    return y[:, :out_dim].reshape((z.shape[0],) + tuple(img_shape))


if __name__ == "__main__":
    # Small shapes consistent with the module: batch=8, latent_dim=32, img=(1,16,16)
    latent_dim = 32
    img_shape = (1, 16, 16)
    batch = 8

    key = jax.random.PRNGKey(0)
    k_params, k_z = jax.random.split(key)

    params = init_params(k_params, latent_dim, img_shape)
    z = jax.random.normal(k_z, (batch, latent_dim), jnp.float32)

    img = base_generator_forward(z, params, img_shape)
    img = jax.block_until_ready(img)

    assert img.shape == (batch,) + img_shape, img.shape
    assert bool(jnp.all(jnp.isfinite(img)))
    assert bool(jnp.all(jnp.abs(img) <= 1.0))  # tanh output range

    ref = jax.block_until_ready(_reference_forward(z, params, img_shape))
    assert bool(jnp.allclose(img, ref, atol=5e-2, rtol=0.0))

    print("KERNEL_OK")
</pallas_src>

<mosaic_0001>
module attributes {stable_mosaic.version = 11 : i64} {
  func.func @generator_kernel(%arg0: i32, %arg1: i32, %arg2: memref<8x32xf32, #tpu.memory_space<vmem>>, %arg3: memref<32x128xbf16, #tpu.memory_space<vmem>>, %arg4: memref<1x128xf32, #tpu.memory_space<vmem>>, %arg5: memref<128x256xbf16, #tpu.memory_space<vmem>>, %arg6: memref<1x256xf32, #tpu.memory_space<vmem>>, %arg7: memref<1x256xf32, #tpu.memory_space<vmem>>, %arg8: memref<1x256xf32, #tpu.memory_space<vmem>>, %arg9: memref<256x512xbf16, #tpu.memory_space<vmem>>, %arg10: memref<1x512xf32, #tpu.memory_space<vmem>>, %arg11: memref<1x512xf32, #tpu.memory_space<vmem>>, %arg12: memref<1x512xf32, #tpu.memory_space<vmem>>, %arg13: memref<512x1024xbf16, #tpu.memory_space<vmem>>, %arg14: memref<1x1024xf32, #tpu.memory_space<vmem>>, %arg15: memref<1x1024xf32, #tpu.memory_space<vmem>>, %arg16: memref<1x1024xf32, #tpu.memory_space<vmem>>, %arg17: memref<1024x256xbf16, #tpu.memory_space<vmem>>, %arg18: memref<1x256xf32, #tpu.memory_space<vmem>>, %arg19: memref<8x256xf32, #tpu.memory_space<vmem>>, %arg20: memref<8x1024xbf16, #tpu.memory_space<vmem>>) attributes {dimension_semantics = [#tpu.dimension_semantics<parallel>, #tpu.dimension_semantics<arbitrary>], iteration_bounds = array<i64: 1, 1>, scalar_prefetch = 0 : i64, scratch_operands = 1 : i64, tpu.core_type = #tpu.core_type<tc>, window_params = [{pipeline_mode = #tpu.pipeline_mode<synchronous>, transform_indices = @transform_0, window_bounds = array<i64: 8, 32>}, {pipeline_mode = #tpu.pipeline_mode<synchronous>, transform_indices = @transform_1, window_bounds = array<i64: 32, 128>}, {pipeline_mode = #tpu.pipeline_mode<synchronous>, transform_indices = @transform_2, window_bounds = array<i64: 1, 128>}, {pipeline_mode = #tpu.pipeline_mode<synchronous>, transform_indices = @transform_3, window_bounds = array<i64: 128, 256>}, {pipeline_mode = #tpu.pipeline_mode<synchronous>, transform_indices = @transform_4, window_bounds = array<i64: 1, 256>}, {pipeline_mode = #tpu.pipeline_mode<synchronous>, transform_indices = @transform_5, window_bounds = array<i64: 1, 256>}, {pipeline_mode = #tpu.pipeline_mode<synchronous>, transform_indices = @transform_6, window_bounds = array<i64: 1, 256>}, {pipeline_mode = #tpu.pipeline_mode<synchronous>, transform_indices = @transform_7, window_bounds = array<i64: 256, 512>}, {pipeline_mode = #tpu.pipeline_mode<synchronous>, transform_indices = @transform_8, window_bounds = array<i64: 1, 512>}, {pipeline_mode = #tpu.pipeline_mode<synchronous>, transform_indices = @transform_9, window_bounds = array<i64: 1, 512>}, {pipeline_mode = #tpu.pipeline_mode<synchronous>, transform_indices = @transform_10, window_bounds = array<i64: 1, 512>}, {pipeline_mode = #tpu.pipeline_mode<synchronous>, transform_indices = @transform_11, window_bounds = array<i64: 512, 1024>}, {pipeline_mode = #tpu.pipeline_mode<synchronous>, transform_indices = @transform_12, window_bounds = array<i64: 1, 1024>}, {pipeline_mode = #tpu.pipeline_mode<synchronous>, transform_indices = @transform_13, window_bounds = array<i64: 1, 1024>}, {pipeline_mode = #tpu.pipeline_mode<synchronous>, transform_indices = @transform_14, window_bounds = array<i64: 1, 1024>}, {transform_indices = @transform_15, window_bounds = array<i64: 1024, 256>}, {transform_indices = @transform_16, window_bounds = array<i64: 1, 256>}, {transform_indices = @transform_17, window_bounds = array<i64: 8, 256>}]} {
    %c0_i32 = arith.constant 0 : i32
    %0 = arith.cmpi eq, %arg1, %c0_i32 : i32
    %1 = arith.extui %0 : i1 to i32
    %c0_i32_0 = arith.constant 0 : i32
    %2 = arith.cmpi ne, %1, %c0_i32_0 : i32
    scf.if %2 {
      %c0_8 = arith.constant 0 : index
      %c0_9 = arith.constant 0 : index
      %11 = vector.load %arg2[%c0_8, %c0_9] : memref<8x32xf32, #tpu.memory_space<vmem>>, vector<8x32xf32>
      %12 = arith.truncf %11 : vector<8x32xf32> to vector<8x32xbf16>
      %c0_10 = arith.constant 0 : index
      %c0_11 = arith.constant 0 : index
      %13 = vector.load %arg3[%c0_10, %c0_11] : memref<32x128xbf16, #tpu.memory_space<vmem>>, vector<32x128xbf16>
      %cst_12 = arith.constant dense<0.000000e+00> : vector<8x128xf32>
      %14 = tpu.matmul %12, %13, %cst_12 {dimension_numbers = #tpu.dot_dimension_numbers<[1], [0], [0], [1], [0, 0, 1, 1], [], []>} : vector<8x32xbf16>, vector<32x128xbf16>, vector<8x128xf32> -> vector<8x128xf32>
      %c0_13 = arith.constant 0 : index
      %c0_14 = arith.constant 0 : index
      %15 = vector.load %arg4[%c0_13, %c0_14] : memref<1x128xf32, #tpu.memory_space<vmem>>, vector<1x128xf32>
      %16 = vector.broadcast %15 : vector<1x128xf32> to vector<8x128xf32>
      %17 = arith.addf %14, %16 : vector<8x128xf32>
      %cst_15 = arith.constant 0.000000e+00 : f32
      %18 = vector.broadcast %cst_15 : f32 to vector<8x128xf32>
      %19 = arith.cmpf ogt, %17, %18 : vector<8x128xf32>
      %cst_16 = arith.constant 2.000000e-01 : f32
      %20 = vector.broadcast %cst_16 : f32 to vector<8x128xf32>
      %21 = arith.mulf %20, %17 : vector<8x128xf32>
      %22 = arith.select %19, %17, %21 : vector<8x128xi1>, vector<8x128xf32>
      %23 = arith.truncf %22 : vector<8x128xf32> to vector<8x128xbf16>
      %c0_17 = arith.constant 0 : index
      %c0_18 = arith.constant 0 : index
      %24 = vector.load %arg5[%c0_17, %c0_18] : memref<128x256xbf16, #tpu.memory_space<vmem>>, vector<128x256xbf16>
      %cst_19 = arith.constant dense<0.000000e+00> : vector<8x256xf32>
      %25 = tpu.matmul %23, %24, %cst_19 {dimension_numbers = #tpu.dot_dimension_numbers<[1], [0], [0], [1], [0, 0, 1, 1], [], []>} : vector<8x128xbf16>, vector<128x256xbf16>, vector<8x256xf32> -> vector<8x256xf32>
      %c0_20 = arith.constant 0 : index
      %c0_21 = arith.constant 0 : index
      %26 = vector.load %arg6[%c0_20, %c0_21] : memref<1x256xf32, #tpu.memory_space<vmem>>, vector<1x256xf32>
      %27 = vector.broadcast %26 : vector<1x256xf32> to vector<8x256xf32>
      %28 = arith.addf %25, %27 : vector<8x256xf32>
      %cst_22 = arith.constant dense<0.000000e+00> : vector<256xf32>
      %29 = vector.multi_reduction <add>, %28, %cst_22 [0] : vector<8x256xf32> to vector<256xf32>
      %30 = vector.shape_cast %29 : vector<256xf32> to vector<1x256xf32>
      %cst_23 = arith.constant 8.000000e+00 : f32
      %31 = vector.broadcast %cst_23 : f32 to vector<1x256xf32>
      %32 = arith.divf %30, %31 : vector<1x256xf32>
      %33 = vector.broadcast %32 : vector<1x256xf32> to vector<8x256xf32>
      %34 = arith.subf %28, %33 : vector<8x256xf32>
      %35 = arith.mulf %34, %34 : vector<8x256xf32>
      %cst_24 = arith.constant dense<0.000000e+00> : vector<256xf32>
      %36 = vector.multi_reduction <add>, %35, %cst_24 [0] : vector<8x256xf32> to vector<256xf32>
      %37 = vector.shape_cast %36 : vector<256xf32> to vector<1x256xf32>
      %cst_25 = arith.constant 8.000000e+00 : f32
      %38 = vector.broadcast %cst_25 : f32 to vector<1x256xf32>
      %39 = arith.divf %37, %38 : vector<1x256xf32>
      %c0_26 = arith.constant 0 : index
      %c0_27 = arith.constant 0 : index
      %40 = vector.load %arg7[%c0_26, %c0_27] : memref<1x256xf32, #tpu.memory_space<vmem>>, vector<1x256xf32>
      %cst_28 = arith.constant 8.000000e-01 : f32
      %41 = vector.broadcast %cst_28 : f32 to vector<1x256xf32>
      %42 = arith.addf %39, %41 : vector<1x256xf32>
      %43 = math.rsqrt %42 : vector<1x256xf32>
      %44 = arith.mulf %40, %43 : vector<1x256xf32>
      %c0_29 = arith.constant 0 : index
      %c0_30 = arith.constant 0 : index
      %45 = vector.load %arg8[%c0_29, %c0_30] : memref<1x256xf32, #tpu.memory_space<vmem>>, vector<1x256xf32>
      %46 = arith.mulf %32, %44 : vector<1x256xf32>
      %47 = arith.subf %45, %46 : vector<1x256xf32>
      %48 = vector.broadcast %44 : vector<1x256xf32> to vector<8x256xf32>
      %49 = arith.mulf %28, %48 : vector<8x256xf32>
      %50 = vector.broadcast %47 : vector<1x256xf32> to vector<8x256xf32>
      %51 = arith.addf %49, %50 : vector<8x256xf32>
      %cst_31 = arith.constant 0.000000e+00 : f32
      %52 = vector.broadcast %cst_31 : f32 to vector<8x256xf32>
      %53 = arith.cmpf ogt, %51, %52 : vector<8x256xf32>
      %cst_32 = arith.constant 2.000000e-01 : f32
      %54 = vector.broadcast %cst_32 : f32 to vector<8x256xf32>
      %55 = arith.mulf %54, %51 : vector<8x256xf32>
      %56 = arith.select %53, %51, %55 : vector<8x256xi1>, vector<8x256xf32>
      %57 = arith.truncf %56 : vector<8x256xf32> to vector<8x256xbf16>
      %c0_33 = arith.constant 0 : index
      %c0_34 = arith.constant 0 : index
      %58 = vector.load %arg9[%c0_33, %c0_34] : memref<256x512xbf16, #tpu.memory_space<vmem>>, vector<256x512xbf16>
      %cst_35 = arith.constant dense<0.000000e+00> : vector<8x512xf32>
      %59 = tpu.matmul %57, %58, %cst_35 {dimension_numbers = #tpu.dot_dimension_numbers<[1], [0], [0], [1], [0, 0, 1, 1], [], []>} : vector<8x256xbf16>, vector<256x512xbf16>, vector<8x512xf32> -> vector<8x512xf32>
      %c0_36 = arith.constant 0 : index
      %c0_37 = arith.constant 0 : index
      %60 = vector.load %arg10[%c0_36, %c0_37] : memref<1x512xf32, #tpu.memory_space<vmem>>, vector<1x512xf32>
      %61 = vector.broadcast %60 : vector<1x512xf32> to vector<8x512xf32>
      %62 = arith.addf %59, %61 : vector<8x512xf32>
      %cst_38 = arith.constant dense<0.000000e+00> : vector<512xf32>
      %63 = vector.multi_reduction <add>, %62, %cst_38 [0] : vector<8x512xf32> to vector<512xf32>
      %64 = vector.shape_cast %63 : vector<512xf32> to vector<1x512xf32>
      %cst_39 = arith.constant 8.000000e+00 : f32
      %65 = vector.broadcast %cst_39 : f32 to vector<1x512xf32>
      %66 = arith.divf %64, %65 : vector<1x512xf32>
      %67 = vector.broadcast %66 : vector<1x512xf32> to vector<8x512xf32>
      %68 = arith.subf %62, %67 : vector<8x512xf32>
      %69 = arith.mulf %68, %68 : vector<8x512xf32>
      %cst_40 = arith.constant dense<0.000000e+00> : vector<512xf32>
      %70 = vector.multi_reduction <add>, %69, %cst_40 [0] : vector<8x512xf32> to vector<512xf32>
      %71 = vector.shape_cast %70 : vector<512xf32> to vector<1x512xf32>
      %cst_41 = arith.constant 8.000000e+00 : f32
      %72 = vector.broadcast %cst_41 : f32 to vector<1x512xf32>
      %73 = arith.divf %71, %72 : vector<1x512xf32>
      %c0_42 = arith.constant 0 : index
      %c0_43 = arith.constant 0 : index
      %74 = vector.load %arg11[%c0_42, %c0_43] : memref<1x512xf32, #tpu.memory_space<vmem>>, vector<1x512xf32>
      %cst_44 = arith.constant 8.000000e-01 : f32
      %75 = vector.broadcast %cst_44 : f32 to vector<1x512xf32>
      %76 = arith.addf %73, %75 : vector<1x512xf32>
      %77 = math.rsqrt %76 : vector<1x512xf32>
      %78 = arith.mulf %74, %77 : vector<1x512xf32>
      %c0_45 = arith.constant 0 : index
      %c0_46 = arith.constant 0 : index
      %79 = vector.load %arg12[%c0_45, %c0_46] : memref<1x512xf32, #tpu.memory_space<vmem>>, vector<1x512xf32>
      %80 = arith.mulf %66, %78 : vector<1x512xf32>
      %81 = arith.subf %79, %80 : vector<1x512xf32>
      %82 = vector.broadcast %78 : vector<1x512xf32> to vector<8x512xf32>
      %83 = arith.mulf %62, %82 : vector<8x512xf32>
      %84 = vector.broadcast %81 : vector<1x512xf32> to vector<8x512xf32>
      %85 = arith.addf %83, %84 : vector<8x512xf32>
      %cst_47 = arith.constant 0.000000e+00 : f32
      %86 = vector.broadcast %cst_47 : f32 to vector<8x512xf32>
      %87 = arith.cmpf ogt, %85, %86 : vector<8x512xf32>
      %cst_48 = arith.constant 2.000000e-01 : f32
      %88 = vector.broadcast %cst_48 : f32 to vector<8x512xf32>
      %89 = arith.mulf %88, %85 : vector<8x512xf32>
      %90 = arith.select %87, %85, %89 : vector<8x512xi1>, vector<8x512xf32>
      %91 = arith.truncf %90 : vector<8x512xf32> to vector<8x512xbf16>
      %c0_49 = arith.constant 0 : index
      %c0_50 = arith.constant 0 : index
      %92 = vector.load %arg13[%c0_49, %c0_50] : memref<512x1024xbf16, #tpu.memory_space<vmem>>, vector<512x1024xbf16>
      %cst_51 = arith.constant dense<0.000000e+00> : vector<8x1024xf32>
      %93 = tpu.matmul %91, %92, %cst_51 {dimension_numbers = #tpu.dot_dimension_numbers<[1], [0], [0], [1], [0, 0, 1, 1], [], []>} : vector<8x512xbf16>, vector<512x1024xbf16>, vector<8x1024xf32> -> vector<8x1024xf32>
      %c0_52 = arith.constant 0 : index
      %c0_53 = arith.constant 0 : index
      %94 = vector.load %arg14[%c0_52, %c0_53] : memref<1x1024xf32, #tpu.memory_space<vmem>>, vector<1x1024xf32>
      %95 = vector.broadcast %94 : vector<1x1024xf32> to vector<8x1024xf32>
      %96 = arith.addf %93, %95 : vector<8x1024xf32>
      %cst_54 = arith.constant dense<0.000000e+00> : vector<1024xf32>
      %97 = vector.multi_reduction <add>, %96, %cst_54 [0] : vector<8x1024xf32> to vector<1024xf32>
      %98 = vector.shape_cast %97 : vector<1024xf32> to vector<1x1024xf32>
      %cst_55 = arith.constant 8.000000e+00 : f32
      %99 = vector.broadcast %cst_55 : f32 to vector<1x1024xf32>
      %100 = arith.divf %98, %99 : vector<1x1024xf32>
      %101 = vector.broadcast %100 : vector<1x1024xf32> to vector<8x1024xf32>
      %102 = arith.subf %96, %101 : vector<8x1024xf32>
      %103 = arith.mulf %102, %102 : vector<8x1024xf32>
      %cst_56 = arith.constant dense<0.000000e+00> : vector<1024xf32>
      %104 = vector.multi_reduction <add>, %103, %cst_56 [0] : vector<8x1024xf32> to vector<1024xf32>
      %105 = vector.shape_cast %104 : vector<1024xf32> to vector<1x1024xf32>
      %cst_57 = arith.constant 8.000000e+00 : f32
      %106 = vector.broadcast %cst_57 : f32 to vector<1x1024xf32>
      %107 = arith.divf %105, %106 : vector<1x1024xf32>
      %c0_58 = arith.constant 0 : index
      %c0_59 = arith.constant 0 : index
      %108 = vector.load %arg15[%c0_58, %c0_59] : memref<1x1024xf32, #tpu.memory_space<vmem>>, vector<1x1024xf32>
      %cst_60 = arith.constant 8.000000e-01 : f32
      %109 = vector.broadcast %cst_60 : f32 to vector<1x1024xf32>
      %110 = arith.addf %107, %109 : vector<1x1024xf32>
      %111 = math.rsqrt %110 : vector<1x1024xf32>
      %112 = arith.mulf %108, %111 : vector<1x1024xf32>
      %c0_61 = arith.constant 0 : index
      %c0_62 = arith.constant 0 : index
      %113 = vector.load %arg16[%c0_61, %c0_62] : memref<1x1024xf32, #tpu.memory_space<vmem>>, vector<1x1024xf32>
      %114 = arith.mulf %100, %112 : vector<1x1024xf32>
      %115 = arith.subf %113, %114 : vector<1x1024xf32>
      %116 = vector.broadcast %112 : vector<1x1024xf32> to vector<8x1024xf32>
      %117 = arith.mulf %96, %116 : vector<8x1024xf32>
      %118 = vector.broadcast %115 : vector<1x1024xf32> to vector<8x1024xf32>
      %119 = arith.addf %117, %118 : vector<8x1024xf32>
      %cst_63 = arith.constant 0.000000e+00 : f32
      %120 = vector.broadcast %cst_63 : f32 to vector<8x1024xf32>
      %121 = arith.cmpf ogt, %119, %120 : vector<8x1024xf32>
      %cst_64 = arith.constant 2.000000e-01 : f32
      %122 = vector.broadcast %cst_64 : f32 to vector<8x1024xf32>
      %123 = arith.mulf %122, %119 : vector<8x1024xf32>
      %124 = arith.select %121, %119, %123 : vector<8x1024xi1>, vector<8x1024xf32>
      %125 = arith.truncf %124 : vector<8x1024xf32> to vector<8x1024xbf16>
      %c0_65 = arith.constant 0 : index
      %c0_66 = arith.constant 0 : index
      %126 = vector.load %arg20[%c0_65, %c0_66] : memref<8x1024xbf16, #tpu.memory_space<vmem>>, vector<8x1024xbf16>
      tpu.vector_store %arg20[%c0_65, %c0_66], %125 {strides = array<i32>} : memref<8x1024xbf16, #tpu.memory_space<vmem>>, vector<8x1024xbf16>,
    } else {
    }
    %c0 = arith.constant 0 : index
    %c0_1 = arith.constant 0 : index
    %3 = vector.load %arg20[%c0, %c0_1] : memref<8x1024xbf16, #tpu.memory_space<vmem>>, vector<8x1024xbf16>
    %c0_2 = arith.constant 0 : index
    %c0_3 = arith.constant 0 : index
    %4 = vector.load %arg17[%c0_2, %c0_3] : memref<1024x256xbf16, #tpu.memory_space<vmem>>, vector<1024x256xbf16>
    %cst = arith.constant dense<0.000000e+00> : vector<8x256xf32>
    %5 = tpu.matmul %3, %4, %cst {dimension_numbers = #tpu.dot_dimension_numbers<[1], [0], [0], [1], [0, 0, 1, 1], [], []>} : vector<8x1024xbf16>, vector<1024x256xbf16>, vector<8x256xf32> -> vector<8x256xf32>
    %c0_4 = arith.constant 0 : index
    %c0_5 = arith.constant 0 : index
    %6 = vector.load %arg18[%c0_4, %c0_5] : memref<1x256xf32, #tpu.memory_space<vmem>>, vector<1x256xf32>
    %7 = vector.broadcast %6 : vector<1x256xf32> to vector<8x256xf32>
    %8 = arith.addf %5, %7 : vector<8x256xf32>
    %9 = math.tanh %8 : vector<8x256xf32>
    %c0_6 = arith.constant 0 : index
    %c0_7 = arith.constant 0 : index
    %10 = vector.load %arg19[%c0_6, %c0_7] : memref<8x256xf32, #tpu.memory_space<vmem>>, vector<8x256xf32>
    tpu.vector_store %arg19[%c0_6, %c0_7], %9 {strides = array<i32>} : memref<8x256xf32, #tpu.memory_space<vmem>>, vector<8x256xf32>,
    return
  }
  func.func @transform_0(%arg0: i32, %arg1: i32) -> (i32, i32) {
    %c0_i32 = arith.constant 0 : i32
    %c0_i32_0 = arith.constant 0 : i32
    %c0_i32_1 = arith.constant 0 : i32
    return %c0_i32, %c0_i32_0 : i32, i32
  }
  func.func @transform_1(%arg0: i32, %arg1: i32) -> (i32, i32) {
    %c0_i32 = arith.constant 0 : i32
    %c0_i32_0 = arith.constant 0 : i32
    %c0_i32_1 = arith.constant 0 : i32
    return %c0_i32, %c0_i32_0 : i32, i32
  }
  func.func @transform_2(%arg0: i32, %arg1: i32) -> (i32, i32) {
    %c0_i32 = arith.constant 0 : i32
    %c0_i32_0 = arith.constant 0 : i32
    %c0_i32_1 = arith.constant 0 : i32
    return %c0_i32, %c0_i32_0 : i32, i32
  }
  func.func @transform_3(%arg0: i32, %arg1: i32) -> (i32, i32) {
    %c0_i32 = arith.constant 0 : i32
    %c0_i32_0 = arith.constant 0 : i32
    %c0_i32_1 = arith.constant 0 : i32
    return %c0_i32, %c0_i32_0 : i32, i32
  }
  func.func @transform_4(%arg0: i32, %arg1: i32) -> (i32, i32) {
    %c0_i32 = arith.constant 0 : i32
    %c0_i32_0 = arith.constant 0 : i32
    %c0_i32_1 = arith.constant 0 : i32
    return %c0_i32, %c0_i32_0 : i32, i32
  }
  func.func @transform_5(%arg0: i32, %arg1: i32) -> (i32, i32) {
    %c0_i32 = arith.constant 0 : i32
    %c0_i32_0 = arith.constant 0 : i32
    %c0_i32_1 = arith.constant 0 : i32
    return %c0_i32, %c0_i32_0 : i32, i32
  }
  func.func @transform_6(%arg0: i32, %arg1: i32) -> (i32, i32) {
    %c0_i32 = arith.constant 0 : i32
    %c0_i32_0 = arith.constant 0 : i32
    %c0_i32_1 = arith.constant 0 : i32
    return %c0_i32, %c0_i32_0 : i32, i32
  }
  func.func @transform_7(%arg0: i32, %arg1: i32) -> (i32, i32) {
    %c0_i32 = arith.constant 0 : i32
    %c0_i32_0 = arith.constant 0 : i32
    %c0_i32_1 = arith.constant 0 : i32
    return %c0_i32, %c0_i32_0 : i32, i32
  }
  func.func @transform_8(%arg0: i32, %arg1: i32) -> (i32, i32) {
    %c0_i32 = arith.constant 0 : i32
    %c0_i32_0 = arith.constant 0 : i32
    %c0_i32_1 = arith.constant 0 : i32
    return %c0_i32, %c0_i32_0 : i32, i32
  }
  func.func @transform_9(%arg0: i32, %arg1: i32) -> (i32, i32) {
    %c0_i32 = arith.constant 0 : i32
    %c0_i32_0 = arith.constant 0 : i32
    %c0_i32_1 = arith.constant 0 : i32
    return %c0_i32, %c0_i32_0 : i32, i32
  }
  func.func @transform_10(%arg0: i32, %arg1: i32) -> (i32, i32) {
    %c0_i32 = arith.constant 0 : i32
    %c0_i32_0 = arith.constant 0 : i32
    %c0_i32_1 = arith.constant 0 : i32
    return %c0_i32, %c0_i32_0 : i32, i32
  }
  func.func @transform_11(%arg0: i32, %arg1: i32) -> (i32, i32) {
    %c0_i32 = arith.constant 0 : i32
    %c0_i32_0 = arith.constant 0 : i32
    %c0_i32_1 = arith.constant 0 : i32
    return %c0_i32, %c0_i32_0 : i32, i32
  }
  func.func @transform_12(%arg0: i32, %arg1: i32) -> (i32, i32) {
    %c0_i32 = arith.constant 0 : i32
    %c0_i32_0 = arith.constant 0 : i32
    %c0_i32_1 = arith.constant 0 : i32
    return %c0_i32, %c0_i32_0 : i32, i32
  }
  func.func @transform_13(%arg0: i32, %arg1: i32) -> (i32, i32) {
    %c0_i32 = arith.constant 0 : i32
    %c0_i32_0 = arith.constant 0 : i32
    %c0_i32_1 = arith.constant 0 : i32
    return %c0_i32, %c0_i32_0 : i32, i32
  }
  func.func @transform_14(%arg0: i32, %arg1: i32) -> (i32, i32) {
    %c0_i32 = arith.constant 0 : i32
    %c0_i32_0 = arith.constant 0 : i32
    %c0_i32_1 = arith.constant 0 : i32
    return %c0_i32, %c0_i32_0 : i32, i32
  }
  func.func @transform_15(%arg0: i32, %arg1: i32) -> (i32, i32) {
    %c1_i32 = arith.constant 1 : i32
    %0 = arith.muli %arg0, %c1_i32 : i32
    %1 = arith.addi %0, %arg1 : i32
    %c0_i32 = arith.constant 0 : i32
    %c0_i32_0 = arith.constant 0 : i32
    return %c0_i32, %1 : i32, i32
  }
  func.func @transform_16(%arg0: i32, %arg1: i32) -> (i32, i32) {
    %c1_i32 = arith.constant 1 : i32
    %0 = arith.muli %arg0, %c1_i32 : i32
    %1 = arith.addi %0, %arg1 : i32
    %c0_i32 = arith.constant 0 : i32
    %c0_i32_0 = arith.constant 0 : i32
    return %c0_i32, %1 : i32, i32
  }
  func.func @transform_17(%arg0: i32, %arg1: i32) -> (i32, i32) {
    %c1_i32 = arith.constant 1 : i32
    %0 = arith.muli %arg0, %c1_i32 : i32
    %1 = arith.addi %0, %arg1 : i32
    %c0_i32 = arith.constant 0 : i32
    %c0_i32_0 = arith.constant 0 : i32
    return %c0_i32, %1 : i32, i32
  }
}

</mosaic_0001>

<bundles_post_ra>
// kernel: tpu_custom_call.1
= control target key start
LH: loop header
LB: loop body
LE: loop exit
PB: predicated region body
PF: predicated region fallthrough
CT: control target
= control target key end

     0   :  { %s6297_s0 = inlined_call_operand.hbm [shape: f32[8,32], index: 0, kind: input, shape index: {}]   ;;  %s6298_s1 = inlined_call_operand.hbm [shape: bf16[32,128], index: 1, kind: input, shape index: {}]   ;;  %s6299_s2 = inlined_call_operand.vmem [shape: f32[1,128], index: 2, kind: input, shape index: {}]   ;;  %s6300_s3 = inlined_call_operand.hbm [shape: bf16[128,256], index: 3, kind: input, shape index: {}]   ;;  %s6301_s4 = inlined_call_operand.hbm [shape: f32[1,256], index: 4, kind: input, shape index: {}]   ;;  %s6302_s5 = inlined_call_operand.hbm [shape: f32[1,256], index: 5, kind: input, shape index: {}]   ;;  %s6303_s6 = inlined_call_operand.hbm [shape: f32[1,256], index: 6, kind: input, shape index: {}]   ;;  %s6304_s7 = inlined_call_operand.hbm [shape: bf16[256,512], index: 7, kind: input, shape index: {}]   ;;  %s6305_s8 = inlined_call_operand.vmem [shape: f32[1,512], index: 8, kind: input, shape index: {}]   ;;  %s6306_s9 = inlined_call_operand.vmem [shape: f32[1,512], index: 9, kind: input, shape index: {}]   ;;  %s6307_s10 = inlined_call_operand.vmem [shape: f32[1,512], index: 10, kind: input, shape index: {}]   ;;  %s6308_s11 = inlined_call_operand.hbm [shape: bf16[512,1024], index: 11, kind: input, shape index: {}]   ;;  %s6309_s12 = inlined_call_operand.vmem [shape: f32[1,1024], index: 12, kind: input, shape index: {}]   ;;  %s6310_s13 = inlined_call_operand.vmem [shape: f32[1,1024], index: 13, kind: input, shape index: {}]   ;;  %s6311_s14 = inlined_call_operand.vmem [shape: f32[1,1024], index: 14, kind: input, shape index: {}]   ;;  %s6312_s15 = inlined_call_operand.hbm [shape: bf16[1024,256], index: 15, kind: input, shape index: {}]   ;;  %s6313_s16 = inlined_call_operand.vmem [shape: f32[1,256], index: 16, kind: input, shape index: {}]   ;;  %s6314_s17 = inlined_call_operand.hbm [shape: f32[8,256], index: 17, kind: output, shape index: {}]  }
   0x1   :  { %6318 = sst [smem:[#allocation25_spill]] %s6297_s0 }
   0x2   :  { %6319 = sst [smem:[#allocation26_spill]] %s6298_s1 }
   0x3   :  { %6320 = sst [smem:[#allocation27_spill]] %s6313_s16 }
   0x4   :  { %6321 = sst [smem:[#allocation28_spill]] %s6314_s17 }
   0x5   :  { %22 = vsyncpa [#allocation4], 0 }
   0x6   :  { %23 = vsyncpa [#allocation7], 0 }
   0x7   :  { %24 = vsyncpa [#allocation10], 0 }
   0x8   :  { %25 = vsyncpa [#allocation13], 0 }
   0x9   :  { %26 = vsyncpa [#allocation16], 0 }
   0xa   :  { %27 = vsyncpa [#allocation5], 0  ;;  %s5711_s24 = smov [#allocation6]   ;;  %s6322_s28 = sld [smem:[#allocation26_spill]] }
   0xb   :  { %s43_s25 = sshll.u32 %s5711_s24, 4  ;;  %s44_s25 = int_to_ptr.vmem [resolvable:$true] %s43_s25 }
  0x10   :  { %s5479_s29 = scalar_lea.hbm %s6322_s28, 256 }
  0x11   :  { %p5480_p0 = scmp.ne.s32.totalorder %s6322_s28, %s5479_s29  ;;  %p5483_p1 = scmp.lt.u32.totalorder %s5479_s29, %s6322_s28 }
  0x13   :  { %p5485_p2 = pnand %p5483_p1, %p5480_p0 }
  0x15   :  { %5488 = shalt.err (!%p5485_p2)
}
  0x16   :  { %s5489_s1 = scalar_lea.vmem %s44_s25, 256  ;;  %p5494_p4 = scmp.lt.s32.totalorder %s44_s25, %s44_s25 }
  0x17   :  { %p5490_p3 = scmp.ne.s32.totalorder %s44_s25, %s5489_s1  ;;  %p5495_p5 = scmp.lt.s32.totalorder %s5489_s1, %s5489_s1 }
  0x19   :  { %p5496_p6 = por %p5495_p5, %p5494_p4 }
  0x1b   :  { %p5497_p7 = pnand %p5496_p6, %p5490_p3 }
  0x1d   :  { %5500 = shalt.err (!%p5497_p7)
}
  0x1e   :  { %s5712_s20 = smov 64   ;;  %s5713_s21 = smov 4  }
  0x1f   :  { %49 = dma.hbm_to_vmem [thread:$0]  %s6322_s28, 256, %s44_s25, [#allocation7], %s5712_s20, %s5712_s20, %s5713_s21  }
  0x20   :  { %s5714_s24 = smov [#allocation9]   ;;  %s5715_s27 = smov [#allocation12]  }
  0x21   :  { %s70_s26 = sshll.u32 %s5714_s24, 4  ;;  %s90_s29 = sshll.u32 %s5715_s27, 4  ;;  %s71_s26 = int_to_ptr.vmem [resolvable:$true] %s70_s26  ;;  %s91_s29 = int_to_ptr.vmem [resolvable:$true] %s90_s29 }
  0x22   :  { %s5501_s18 = scalar_lea.hbm %s6301_s4, 32 }
  0x23   :  { %p5502_p8 = scmp.ne.s32.totalorder %s6301_s4, %s5501_s18  ;;  %p5505_p9 = scmp.lt.u32.totalorder %s5501_s18, %s6301_s4 }
  0x25   :  { %p5507_p10 = pnand %p5505_p9, %p5502_p8 }
  0x27   :  { %5510 = shalt.err (!%p5507_p10)
}
  0x28   :  { %s5511_s25 = scalar_lea.vmem %s71_s26, 32  ;;  %p5516_p12 = scmp.lt.s32.totalorder %s71_s26, %s71_s26 }
  0x29   :  { %p5512_p11 = scmp.ne.s32.totalorder %s71_s26, %s5511_s25  ;;  %p5517_p13 = scmp.lt.s32.totalorder %s5511_s25, %s5511_s25 }
  0x2b   :  { %p5518_p0 = por %p5517_p13, %p5516_p12 }
  0x2d   :  { %p5519_p1 = pnand %p5518_p0, %p5512_p11 }
  0x2f   :  { %5522 = shalt.err (!%p5519_p1)
}
  0x30   :  { %73 = dma.hbm_to_vmem [thread:$0]  %s6301_s4, 32, %s71_s26, [#allocation10]  }
  0x31   :  { %s5523_s23 = scalar_lea.hbm %s6303_s6, 32 }
  0x32   :  { %p5524_p2 = scmp.ne.s32.totalorder %s6303_s6, %s5523_s23  ;;  %p5527_p3 = scmp.lt.u32.totalorder %s5523_s23, %s6303_s6 }
  0x34   :  { %p5529_p4 = pnand %p5527_p3, %p5524_p2 }
  0x36   :  { %5532 = shalt.err (!%p5529_p4)
}
  0x37   :  { %s5533_s0 = scalar_lea.vmem %s91_s29, 32  ;;  %p5538_p6 = scmp.lt.s32.totalorder %s91_s29, %s91_s29 }
  0x38   :  { %p5534_p5 = scmp.ne.s32.totalorder %s91_s29, %s5533_s0  ;;  %p5539_p7 = scmp.lt.s32.totalorder %s5533_s0, %s5533_s0 }
  0x3a   :  { %p5540_p8 = por %p5539_p7, %p5538_p6 }
  0x3c   :  { %p5541_p9 = pnand %p5540_p8, %p5534_p5 }
  0x3e   :  { %5544 = shalt.err (!%p5541_p9)
}
  0x3f   :  { %93 = dma.hbm_to_vmem [thread:$0]  %s6303_s6, 32, %s91_s29, [#allocation13]  }
  0x40   :  { %s5716_s30 = smov [#allocation15]   ;;  %s5545_s25 = scalar_lea.hbm %s6308_s11, 32768 }
  0x41   :  { %s117_s18 = sshll.u32 %s5716_s30, 4  ;;  %p5546_p10 = scmp.ne.s32.totalorder %s6308_s11, %s5545_s25  ;;  %s118_s18 = int_to_ptr.vmem [resolvable:$true] %s117_s18 }
  0x42   :  { %p5549_p11 = scmp.lt.u32.totalorder %s5545_s25, %s6308_s11 }
  0x44   :  { %p5551_p12 = pnand %p5549_p11, %p5546_p10 }
  0x46   :  { %5554 = shalt.err (!%p5551_p12)
}
  0x47   :  { %s5555_s23 = scalar_lea.vmem %s118_s18, 32768  ;;  %p5560_p0 = scmp.lt.s32.totalorder %s118_s18, %s118_s18 }
  0x48   :  { %p5556_p13 = scmp.ne.s32.totalorder %s118_s18, %s5555_s23  ;;  %p5561_p1 = scmp.lt.s32.totalorder %s5555_s23, %s5555_s23 }
  0x4a   :  { %p5562_p2 = por %p5561_p1, %p5560_p0 }
  0x4c   :  { %p5563_p3 = pnand %p5562_p2, %p5556_p13 }
  0x4e   :  { %5566 = shalt.err (!%p5563_p3)
}
  0x4f   :  { %s5717_s6 = smov 512   ;;  %s5718_s29 = smov 32  }
  0x50   :  { %123 = dma.hbm_to_vmem [thread:$0]  %s6308_s11, 32768, %s118_s18, [#allocation16], %s5717_s6, %s5717_s6, %s5718_s29  }
  0x51   :  { %s5719_s24 = smov [#allocation3]   ;;  %s5720_s0 = smov [#allocation8]  }
  0x52   :  { %s34_s27 = sshll.u32 %s5719_s24, 4  ;;  %s57_s4 = sshll.u32 %s5720_s0, 4  ;;  %s35_s27 = int_to_ptr.vmem [resolvable:$true] %s34_s27  ;;  %s5871_s4 = int_to_ptr.vmem [resolvable:$true] %s57_s4 }
  0x53   :  { %s6323_s19 = sld [smem:[#allocation25_spill]] }
  0x59   :  { %s5567_s1 = scalar_lea.hbm %s6323_s19, 128 }
  0x5a   :  { %p5568_p4 = scmp.ne.s32.totalorder %s6323_s19, %s5567_s1  ;;  %p5571_p5 = scmp.lt.u32.totalorder %s5567_s1, %s6323_s19 }
  0x5c   :  { %p5573_p6 = pnand %p5571_p5, %p5568_p4 }
  0x5e   :  { %5576 = shalt.err (!%p5573_p6)
}
  0x5f   :  { %s5577_s11 = scalar_lea.vmem %s35_s27, 128  ;;  %p5582_p8 = scmp.lt.s32.totalorder %s35_s27, %s35_s27 }
  0x60   :  { %p5578_p7 = scmp.ne.s32.totalorder %s35_s27, %s5577_s11  ;;  %p5583_p9 = scmp.lt.s32.totalorder %s5577_s11, %s5577_s11 }
  0x62   :  { %p5584_p10 = por %p5583_p9, %p5582_p8 }
  0x64   :  { %p5585_p11 = pnand %p5584_p10, %p5578_p7 }
  0x66   :  { %5588 = shalt.err (!%p5585_p11)
}
  0x67   :  { %37 = dma.hbm_to_vmem [thread:$0]  %s6323_s19, 128, %s35_s27, [#allocation4]  }
  0x68   :  { %s5589_s29 = scalar_lea.hbm %s6300_s3, 2048 }
  0x69   :  { %p5590_p12 = scmp.ne.s32.totalorder %s6300_s3, %s5589_s29  ;;  %p5593_p13 = scmp.lt.u32.totalorder %s5589_s29, %s6300_s3 }
  0x6b   :  { %p5595_p0 = pnand %p5593_p13, %p5590_p12 }
  0x6d   :  { %5598 = shalt.err (!%p5595_p0)
}
  0x6e   :  { %s5599_s26 = scalar_lea.vmem %s5871_s4, 2048  ;;  %p5604_p2 = scmp.lt.s32.totalorder %s5871_s4, %s5871_s4 }
  0x6f   :  { %p5600_p1 = scmp.ne.s32.totalorder %s5871_s4, %s5599_s26  ;;  %p5605_p3 = scmp.lt.s32.totalorder %s5599_s26, %s5599_s26 }
  0x71   :  { %p5606_p4 = por %p5605_p3, %p5604_p2 }
  0x73   :  { %p5607_p5 = pnand %p5606_p4, %p5600_p1 }
  0x75   :  { %5610 = shalt.err (!%p5607_p5)
}
  0x76   :  { %s5721_s27 = smov 128   ;;  %s5722_s30 = smov 8  }
  0x77   :  { %63 = dma.hbm_to_vmem [thread:$0]  %s6300_s3, 2048, %s5871_s4, [#allocation7], %s5721_s27, %s5721_s27, %s5722_s30  }
  0x78   :  { %s5723_s25 = smov [#allocation11]   ;;  %s5724_s20 = smov [#allocation14]  }
  0x79   :  { %s80_s28 = sshll.u32 %s5723_s25, 4  ;;  %s99_s21 = sshll.u32 %s5724_s20, 4  ;;  %s81_s28 = int_to_ptr.vmem [resolvable:$true] %s80_s28  ;;  %s5905_s21 = int_to_ptr.vmem [resolvable:$true] %s99_s21 }
  0x7a   :  { %s5611_s22 = scalar_lea.hbm %s6302_s5, 32 }
  0x7b   :  { %p5612_p6 = scmp.ne.s32.totalorder %s6302_s5, %s5611_s22  ;;  %p5615_p7 = scmp.lt.u32.totalorder %s5611_s22, %s6302_s5 }
  0x7d   :  { %p5617_p8 = pnand %p5615_p7, %p5612_p6 }
  0x7f   :  { %5620 = shalt.err (!%p5617_p8)
}
  0x80   :  { %s5621_s3 = scalar_lea.vmem %s81_s28, 32  ;;  %p5626_p10 = scmp.lt.s32.totalorder %s81_s28, %s81_s28 }
  0x81   :  { %p5622_p9 = scmp.ne.s32.totalorder %s81_s28, %s5621_s3  ;;  %p5627_p11 = scmp.lt.s32.totalorder %s5621_s3, %s5621_s3 }
  0x83   :  { %p5628_p12 = por %p5627_p11, %p5626_p10 }
  0x85   :  { %p5629_p13 = pnand %p5628_p12, %p5622_p9 }
  0x87   :  { %5632 = shalt.err (!%p5629_p13)
}
  0x88   :  { %83 = dma.hbm_to_vmem [thread:$0]  %s6302_s5, 32, %s81_s28, [#allocation10]  }
  0x89   :  { %s5633_s26 = scalar_lea.hbm %s6304_s7, 8192 }
  0x8a   :  { %p5634_p0 = scmp.ne.s32.totalorder %s6304_s7, %s5633_s26  ;;  %p5637_p1 = scmp.lt.u32.totalorder %s5633_s26, %s6304_s7 }
  0x8c   :  { %p5639_p2 = pnand %p5637_p1, %p5634_p0 }
  0x8e   :  { %5642 = shalt.err (!%p5639_p2)
}
  0x8f   :  { %s5643_s11 = scalar_lea.vmem %s5905_s21, 8192  ;;  %p5648_p4 = scmp.lt.s32.totalorder %s5905_s21, %s5905_s21 }
  0x90   :  { %p5644_p3 = scmp.ne.s32.totalorder %s5905_s21, %s5643_s11  ;;  %p5649_p5 = scmp.lt.s32.totalorder %s5643_s11, %s5643_s11 }
  0x92   :  { %p5650_p6 = por %p5649_p5, %p5648_p4 }
  0x94   :  { %p5651_p7 = pnand %p5650_p6, %p5644_p3 }
  0x96   :  { %5654 = shalt.err (!%p5651_p7)
}
  0x97   :  { %s5725_s5 = smov 256   ;;  %s5726_s28 = smov 16  }
  0x98   :  { %105 = dma.hbm_to_vmem [thread:$0]  %s6304_s7, 8192, %s5905_s21, [#allocation13], %s5725_s5, %s5725_s5, %s5726_s28  }
  0x99   :  { %s5727_s23 = smov [#allocation17]   ;;  %s5655_s3 = scalar_lea.hbm %s6312_s15, 16384 }
  0x9a   :  { %s139_s6 = sshll.u32 %s5727_s23, 4  ;;  %p5656_p8 = scmp.ne.s32.totalorder %s6312_s15, %s5655_s3  ;;  %s140_s6 = int_to_ptr.vmem [resolvable:$true] %s139_s6 }
  0x9b   :  { %p5659_p9 = scmp.lt.u32.totalorder %s5655_s3, %s6312_s15 }
  0x9d   :  { %p5661_p10 = pnand %p5659_p9, %p5656_p8 }
  0x9f   :  { %5664 = shalt.err (!%p5661_p10)
}
  0xa0   :  { %s5665_s26 = scalar_lea.vmem %s140_s6, 16384  ;;  %p5670_p12 = scmp.lt.s32.totalorder %s140_s6, %s140_s6 }
  0xa1   :  { %p5666_p11 = scmp.ne.s32.totalorder %s140_s6, %s5665_s26  ;;  %p5671_p13 = scmp.lt.s32.totalorder %s5665_s26, %s5665_s26 }
  0xa3   :  { %p5672_p0 = por %p5671_p13, %p5670_p12 }
  0xa5   :  { %p5673_p1 = pnand %p5672_p0, %p5666_p11 }
  0xa7   :  { %5676 = shalt.err (!%p5673_p1)
}
  0xa8   :  { %145 = dma.hbm_to_vmem [thread:$0]  %s6312_s15, 16384, %s140_s6, [#allocation16], %s5721_s27, %s5721_s27, %s5722_s30  }
  0xa9   :  { %5699 = dma.done.wait [#allocation4], 128  }
  0xaa   :  { %5700 = vsyncadd [#allocation4], 4294967168 }
  0xab   :  { %5701 = dma.done.wait [#allocation7], 2304  }
  0xac   :  { %5702 = vsyncadd [#allocation7], 4294964992 }
  0xad   :  { %5703 = dma.done.wait [#allocation10], 64  }
  0xae   :  { %5704 = vsyncadd [#allocation10], 4294967232 }
  0xaf   :  { %5705 = dma.done.wait [#allocation13], 8224  }
  0xb0   :  { %5706 = vsyncadd [#allocation13], 4294959072 }
  0xb1   :  { %5707 = dma.done.wait [#allocation16], 49152  }
  0xb2   :  { %5708 = vsyncadd [#allocation16], 4294918144  ;;  %v5728_v0 = vmov 0.0   ;;  %vm5729_vm0 = vmmov 0   ;;  %v5133_v1 = vld [vmem:[#allocation6] sm:$0xff]   ;;  %v5134_v2 = vld [vmem:[#allocation6 + $0x8] sm:$0xff]  }
  0xb3   :  { %5067 = vmatprep.subr.bf16.mxu0 %v5728_v0  ;;  %5071 = vmatprep.mubr.msk.bf16.mxu0 %vm5729_vm0, %v5728_v0  ;;  %v203_v3 = vld [vmem:[#allocation3] sm:$0xff]  ;;  %v5138_v6 = vld [vmem:[#allocation8 + $0x14] ss:$8 sps:$4 sm:$0xff]   ;;  %vm228_vm1 = vcmask 261120   ;;  %v5140_v8 = vld [vmem:[#allocation8 + $0x10] ss:$8 sps:$4 sm:$0xff]  }
  0xb4   :  { %5068 = vmatpush3.bf16.msra.mxu0 %v5133_v1  ;;  %v5135_v4 = vld [vmem:[#allocation8 + $0x4] ss:$8 sps:$4 sm:$0xff]   ;;  %v5137_v5 = vld [vmem:[#allocation8] ss:$8 sps:$4 sm:$0xff]   ;;  %v204_v7 = vpack.c.bf16 %v203_v3, %v203_v3  ;;  %v5144_v11 = vld [vmem:[#allocation8 + $0x34] ss:$8 sps:$4 sm:$0xff]  }
  0xb5   :  { %5069 = vmatprep.subr.bf16.mxu0 %v5728_v0  ;;  %384 = vmatprep.subr.bf16.mxu1 %v5135_v4  ;;  %v5141_v9 = vld [vmem:[#allocation8 + $0x24] ss:$8 sps:$4 sm:$0xff]   ;;  %v5143_v10 = vld [vmem:[#allocation8 + $0x20] ss:$8 sps:$4 sm:$0xff]   ;;  %v5146_v12 = vld [vmem:[#allocation8 + $0x30] ss:$8 sps:$4 sm:$0xff]   ;;  %v294_v0 = vlaneseq }
  0xb6   :  { %385 = vmatpush1.bf16.msra.mxu1 %v5137_v5  ;;  %v5147_v13 = vld [vmem:[#allocation8 + $0x44] ss:$8 sps:$4 sm:$0xff]   ;;  %v5149_v14 = vld [vmem:[#allocation8 + $0x40] ss:$8 sps:$4 sm:$0xff]   ;;  %v5150_v15 = vld [vmem:[#allocation8 + $0x54] ss:$8 sps:$4 sm:$0xff]  }
  0xb7   :  { %386 = vmatprep.subr.bf16.mxu1 %v5138_v6  ;;  %v5152_v16 = vld [vmem:[#allocation8 + $0x50] ss:$8 sps:$4 sm:$0xff]   ;;  %v5153_v17 = vld [vmem:[#allocation8 + $0x64] ss:$8 sps:$4 sm:$0xff]   ;;  %v5155_v18 = vld [vmem:[#allocation8 + $0x60] ss:$8 sps:$4 sm:$0xff]  }
  0xb8   :  { %5070 = vmatpush3.bf16.msra.mxu0 %v5134_v2  ;;  %v5156_v19 = vld [vmem:[#allocation8 + $0x74] ss:$8 sps:$4 sm:$0xff]   ;;  %v5158_v20 = vld [vmem:[#allocation8 + $0x70] ss:$8 sps:$4 sm:$0xff]   ;;  %v5730_v21 = vmov 0   ;;  %v5954_v1 = vshrl.u32 %v294_v0, 7 }
  0xb9   :  { %416 = vmatprep.mubr.bf16.mxu1 %v5730_v21  ;;  %v4572_v22 = vld [vmem:[%s6299_s2] ss:$0 sm:$0xff]  ;;  %v5161_v31 = vld [vmem:[#allocation14 + $0x4] ss:$16 sps:$4 sm:$0xff]   ;;  %v5209_v63 = vld [vmem:[#allocation14 + $0xc] ss:$16 sps:$4 sm:$0xff]  }
  0xba   :  { %387 = vmatpush1.bf16.msra.mxu1 %v5140_v8  ;;  %v5159_v32 = vld [vmem:[#allocation14] ss:$16 sps:$4 sm:$0xff]   ;;  %v5164_v33 = vld [vmem:[#allocation14 + $0x24] ss:$16 sps:$4 sm:$0xff]   ;;  %v5957_v2 = vsub.s32 0, %v5954_v1  ;;  %v5960_v4 = vsub.s32 1, %v5954_v1 }
  0xbb   :  { %5072 = vmatmul.mubr.msk.bf16.vlgmr.msra.gmra.mrb[0].mxu0 %vm228_vm1, %v204_v7  ;;  %388 = vmatprep.subr.bf16.mxu1 %v5141_v9  ;;  %v5162_v34 = vld [vmem:[#allocation14 + $0x20] ss:$16 sps:$4 sm:$0xff]   ;;  %v5167_v35 = vld [vmem:[#allocation14 + $0x44] ss:$16 sps:$4 sm:$0xff]   ;;  %v292_v3 = vld [vmem:[#allocation9] sm:$0x3] }
  0xbc   :  { %v5165_v36 = vld [vmem:[#allocation14 + $0x40] ss:$16 sps:$4 sm:$0xff]   ;;  %v5170_v37 = vld [vmem:[#allocation14 + $0x64] ss:$16 sps:$4 sm:$0xff]   ;;  %v297_v5 = vrot.slane %v292_v3, %v5957_v2  ;;  %v301_v6 = vrot.slane %v292_v3, %v5960_v4  ;;  %s6324_s28 = sld [smem:[#allocation27_spill]]  ;;  %s5732_s18 = smov [#allocation18]  }
  0xbd   :  { %v5168_v38 = vld [vmem:[#allocation14 + $0x60] ss:$16 sps:$4 sm:$0xff]   ;;  %v5173_v39 = vld [vmem:[#allocation14 + $0x84] ss:$16 sps:$4 sm:$0xff]   ;;  %s4556_s22 = sshll.u32 %s5732_s18, 4  ;;  %s4557_s22 = int_to_ptr.vmem [resolvable:$true] %s4556_s22 }
  0xbe   :  { %389 = vmatpush1.bf16.msra.mxu1 %v5143_v10  ;;  %v5171_v40 = vld [vmem:[#allocation14 + $0x80] ss:$16 sps:$4 sm:$0xff]   ;;  %v5176_v41 = vld [vmem:[#allocation14 + $0xa4] ss:$16 sps:$4 sm:$0xff]   ;;  %s5677_s23 = scalar_lea.vmem %s4557_s22, 256  ;;  %p5682_p3 = scmp.lt.s32.totalorder %s4557_s22, %s4557_s22 }
  0xbf   :  { %390 = vmatprep.subr.bf16.mxu1 %v5144_v11  ;;  %v5174_v42 = vld [vmem:[#allocation14 + $0xa0] ss:$16 sps:$4 sm:$0xff]   ;;  %v5179_v43 = vld [vmem:[#allocation14 + $0xc4] ss:$16 sps:$4 sm:$0xff]   ;;  %p5678_p2 = scmp.ne.s32.totalorder %s4557_s22, %s5677_s23  ;;  %p5683_p4 = scmp.lt.s32.totalorder %s5677_s23, %s5677_s23 }
  0xc0   :  { %v5177_v44 = vld [vmem:[#allocation14 + $0xc0] ss:$16 sps:$4 sm:$0xff]   ;;  %v5182_v45 = vld [vmem:[#allocation14 + $0xe4] ss:$16 sps:$4 sm:$0xff]  }
  0xc1   :  { %v5180_v46 = vld [vmem:[#allocation14 + $0xe0] ss:$16 sps:$4 sm:$0xff]   ;;  %v5185_v47 = vld [vmem:[#allocation14 + $0x104] ss:$16 sps:$4 sm:$0xff]   ;;  %p5684_p5 = por %p5683_p4, %p5682_p3 }
  0xc2   :  { %391 = vmatpush1.bf16.msra.mxu1 %v5146_v12  ;;  %v5183_v48 = vld [vmem:[#allocation14 + $0x100] ss:$16 sps:$4 sm:$0xff]   ;;  %v5188_v49 = vld [vmem:[#allocation14 + $0x124] ss:$16 sps:$4 sm:$0xff]  }
  0xc3   :  { %392 = vmatprep.subr.bf16.mxu1 %v5147_v13  ;;  %v5186_v50 = vld [vmem:[#allocation14 + $0x120] ss:$16 sps:$4 sm:$0xff]   ;;  %v5191_v51 = vld [vmem:[#allocation14 + $0x144] ss:$16 sps:$4 sm:$0xff]   ;;  %p5685_p6 = pnand %p5684_p5, %p5678_p2 }
  0xc4   :  { %v5189_v52 = vld [vmem:[#allocation14 + $0x140] ss:$16 sps:$4 sm:$0xff]   ;;  %v5194_v53 = vld [vmem:[#allocation14 + $0x164] ss:$16 sps:$4 sm:$0xff]  }
  0xc5   :  { %v5192_v54 = vld [vmem:[#allocation14 + $0x160] ss:$16 sps:$4 sm:$0xff]   ;;  %v5197_v55 = vld [vmem:[#allocation14 + $0x184] ss:$16 sps:$4 sm:$0xff]  }
  0xc6   :  { %393 = vmatpush1.bf16.msra.mxu1 %v5149_v14  ;;  %v5195_v56 = vld [vmem:[#allocation14 + $0x180] ss:$16 sps:$4 sm:$0xff]   ;;  %v5200_v58 = vld [vmem:[#allocation14 + $0x1a4] ss:$16 sps:$4 sm:$0xff]  }
  0xc7   :  { %394 = vmatprep.subr.bf16.mxu1 %v5150_v15  ;;  %v5198_v57 = vld [vmem:[#allocation14 + $0x1a0] ss:$16 sps:$4 sm:$0xff]   ;;  %v5203_v59 = vld [vmem:[#allocation14 + $0x1c4] ss:$16 sps:$4 sm:$0xff]  }
  0xc8   :  { %v5201_v60 = vld [vmem:[#allocation14 + $0x1c0] ss:$16 sps:$4 sm:$0xff]   ;;  %v5206_v61 = vld [vmem:[#allocation14 + $0x1e4] ss:$16 sps:$4 sm:$0xff]  }
  0xc9   :  { %v5204_v62 = vld [vmem:[#allocation14 + $0x1e0] ss:$16 sps:$4 sm:$0xff]  }
  0xca   :  { %395 = vmatpush1.bf16.msra.mxu1 %v5152_v16 }
  0xcb   :  { %396 = vmatprep.subr.bf16.mxu1 %v5153_v17 }
  0xce   :  { %397 = vmatpush1.bf16.msra.mxu1 %v5155_v18 }
  0xcf   :  { %398 = vmatprep.subr.bf16.mxu1 %v5156_v19 }
  0xd2   :  { %399 = vmatpush1.bf16.msra.mxu1 %v5158_v20 }
  0xd3   :  { %944 = vmatprep.subr.bf16.mxu1 %v5161_v31 }
 0x18e   :  { %v266_v23 = vpop.f32.mrb[0].mxu0 }
 0x18f   :  { %v267_v24 = vadd.f32 %v4572_v22, %v266_v23  ;;  %v5073_v25 = vpop.f32.mrb[1].mxu0 }
 0x190   :  { %v269_v26 = vpop.f32.mrb[2].mxu0 }
 0x191   :  { %vm272_vm2 = vcmp.gt.f32.partialorder %v267_v24, 0.0  ;;  %v273_v27 = vmul.f32 0.2, %v267_v24  ;;  %v5074_v28 = vpop.f32.mrb[3].mxu0 }
 0x193   :  { %v274_v29 = vsel %vm272_vm2, %v267_v24, %v273_v27 }
 0x194   :  { %v275_v30 = vpack.c.bf16 %v274_v29, %v274_v29 }
 0x196   :  { %417 = vmatmul.mubr.bf16.vlgmr.msra.gmra.mrb[0].mxu1 %v275_v30 }
 0x197   :  { %945 = vmatpush1.bf16.msra.mxu1 %v5159_v32 }
 0x198   :  { %946 = vmatprep.subr.bf16.mxu1 %v5164_v33 }
 0x19b   :  { %947 = vmatpush1.bf16.msra.mxu1 %v5162_v34 }
 0x19c   :  { %948 = vmatprep.subr.bf16.mxu1 %v5167_v35 }
 0x19f   :  { %949 = vmatpush1.bf16.msra.mxu1 %v5165_v36 }
 0x1a0   :  { %950 = vmatprep.subr.bf16.mxu1 %v5170_v37 }
 0x1a3   :  { %951 = vmatpush1.bf16.msra.mxu1 %v5168_v38 }
 0x1a4   :  { %952 = vmatprep.subr.bf16.mxu1 %v5173_v39 }
 0x1a7   :  { %953 = vmatpush1.bf16.msra.mxu1 %v5171_v40 }
 0x1a8   :  { %954 = vmatprep.subr.bf16.mxu1 %v5176_v41 }
 0x1ab   :  { %955 = vmatpush1.bf16.msra.mxu1 %v5174_v42 }
 0x1ac   :  { %956 = vmatprep.subr.bf16.mxu1 %v5179_v43 }
 0x1af   :  { %957 = vmatpush1.bf16.msra.mxu1 %v5177_v44 }
 0x1b0   :  { %958 = vmatprep.subr.bf16.mxu1 %v5182_v45 }
 0x1b3   :  { %959 = vmatpush1.bf16.msra.mxu1 %v5180_v46 }
 0x1b4   :  { %960 = vmatprep.subr.bf16.mxu1 %v5185_v47  ;;  %v5731_v47 = vmov 1966171168  }
 0x1b7   :  { %961 = vmatpush1.bf16.msra.mxu1 %v5183_v48  ;;  %v467_v48 = vunpack.c.l.s4 %v5731_v47  ;;  %v5254_v47 = vld [vmem:[#allocation14 + $0x1ec] ss:$16 sps:$4 sm:$0xff]  }
 0x1b8   :  { %962 = vmatprep.subr.bf16.mxu1 %v5188_v49 }
 0x1b9   :  { %v468_v49 = vunpack.c.0.s8 %v467_v48  ;;  %v5252_v48 = vld [vmem:[#allocation14 + $0x1e8] ss:$16 sps:$4 sm:$0xff]  }
 0x1bb   :  { %963 = vmatpush1.bf16.msra.mxu1 %v5186_v50 }
 0x1bc   :  { %964 = vmatprep.subr.bf16.mxu1 %v5191_v51  ;;  %v5965_v51 = vsub.s32 %v468_v49, %v5954_v1  ;;  %v1230_v49 = vld [vmem:[#allocation15] sm:$0xff] }
 0x1bf   :  { %965 = vmatpush1.bf16.msra.mxu1 %v5189_v52 }
 0x1c0   :  { %966 = vmatprep.subr.bf16.mxu1 %v5194_v53 }
 0x1c3   :  { %967 = vmatpush1.bf16.msra.mxu1 %v5192_v54 }
 0x1c4   :  { %968 = vmatprep.subr.bf16.mxu1 %v5197_v55  ;;  %v458_v55 = vld [vmem:[#allocation11] sm:$0x3] }
 0x1c7   :  { %969 = vmatpush1.bf16.msra.mxu1 %v5195_v56 }
 0x1c8   :  { %970 = vmatprep.subr.bf16.mxu1 %v5200_v58 }
 0x1cb   :  { %971 = vmatpush1.bf16.msra.mxu1 %v5198_v57 }
 0x1cc   :  { %972 = vmatprep.subr.bf16.mxu1 %v5203_v59 }
 0x1cf   :  { %973 = vmatpush1.bf16.msra.mxu1 %v5201_v60 }
 0x1d0   :  { %974 = vmatprep.subr.bf16.mxu1 %v5206_v61 }
 0x1d3   :  { %975 = vmatpush1.bf16.msra.mxu1 %v5204_v62 }
 0x1d4   :  { %985 = vmatprep.subr.bf16.mxu1 %v5209_v63 }
 0x269   :  { %v418_v7 = vpop.f32.mrb[0].mxu1 }
 0x26a   :  { %v419_v8 = vadd.f32 %v418_v7, %v297_v5  ;;  %v420_v9 = vpop.f32.mrb[1].mxu1  ;;  %v482_v5 = vld [vmem:[#allocation12] sm:$0x3] }
 0x26b   :  { %v421_v10 = vadd.f32 %v420_v9, %v301_v6  ;;  %v422_v11 = vpop.f32.mrb[2].mxu1 }
 0x26c   :  { %v425_v12 = vrot.slane %v419_v8, 4  ;;  %v423_v13 = vpop.f32.mrb[3].mxu1 }
 0x26d   :  { %v431_v14 = vrot.slane %v421_v10, 4 }
 0x26e   :  { %v426_v15 = vadd.f32 %v425_v12, %v419_v8 }
 0x26f   :  { %v432_v16 = vadd.f32 %v431_v14, %v421_v10 }
 0x270   :  { %v427_v17 = vrot.slane %v426_v15, 2 }
 0x271   :  { %v433_v18 = vrot.slane %v432_v16, 2 }
 0x272   :  { %v428_v19 = vadd.f32 %v427_v17, %v426_v15  ;;  %v5207_v17 = vld [vmem:[#allocation14 + $0x8] ss:$16 sps:$4 sm:$0xff]  }
 0x273   :  { %v434_v20 = vadd.f32 %v433_v18, %v432_v16 }
 0x274   :  { %v429_v21 = vrot.slane %v428_v19, 1 }
 0x275   :  { %v435_v22 = vrot.slane %v434_v20, 1 }
 0x276   :  { %v430_v23 = vadd.f32 %v429_v21, %v428_v19  ;;  %v5212_v19 = vld [vmem:[#allocation14 + $0x2c] ss:$16 sps:$4 sm:$0xff]  }
 0x277   :  { %v436_v24 = vadd.f32 %v435_v22, %v434_v20  ;;  %v5210_v20 = vld [vmem:[#allocation14 + $0x28] ss:$16 sps:$4 sm:$0xff]   ;;  %v5215_v21 = vld [vmem:[#allocation14 + $0x4c] ss:$16 sps:$4 sm:$0xff]  }
 0x278   :  { %v438_v25 = vmul.f32 0.125, %v430_v23  ;;  %v5213_v22 = vld [vmem:[#allocation14 + $0x48] ss:$16 sps:$4 sm:$0xff]   ;;  %v5218_v23 = vld [vmem:[#allocation14 + $0x6c] ss:$16 sps:$4 sm:$0xff]  }
 0x279   :  { %v439_v26 = vmul.f32 0.125, %v436_v24  ;;  %v5216_v24 = vld [vmem:[#allocation14 + $0x68] ss:$16 sps:$4 sm:$0xff]  }
 0x27a   :  { %v440_v27 = vsub.f32 %v419_v8, %v438_v25 }
 0x27b   :  { %v441_v28 = vsub.f32 %v421_v10, %v439_v26 }
 0x27c   :  { %v442_v29 = vmul.f32 %v440_v27, %v440_v27  ;;  %v5224_v27 = vld [vmem:[#allocation14 + $0xac] ss:$16 sps:$4 sm:$0xff]  }
 0x27d   :  { %v443_v30 = vmul.f32 %v441_v28, %v441_v28  ;;  %v5222_v28 = vld [vmem:[#allocation14 + $0xa8] ss:$16 sps:$4 sm:$0xff]  }
 0x27e   :  { %v444_v31 = vrot.slane %v442_v29, 4 }
 0x27f   :  { %v450_v32 = vrot.slane %v443_v30, 4 }
 0x280   :  { %v445_v33 = vadd.f32 %v444_v31, %v442_v29  ;;  %v5227_v29 = vld [vmem:[#allocation14 + $0xcc] ss:$16 sps:$4 sm:$0xff]  }
 0x281   :  { %v451_v34 = vadd.f32 %v450_v32, %v443_v30  ;;  %v5225_v30 = vld [vmem:[#allocation14 + $0xc8] ss:$16 sps:$4 sm:$0xff]   ;;  %v5230_v31 = vld [vmem:[#allocation14 + $0xec] ss:$16 sps:$4 sm:$0xff]  }
 0x282   :  { %v446_v35 = vrot.slane %v445_v33, 2  ;;  %v5228_v32 = vld [vmem:[#allocation14 + $0xe8] ss:$16 sps:$4 sm:$0xff]  }
 0x283   :  { %v452_v36 = vrot.slane %v451_v34, 2 }
 0x284   :  { %v447_v37 = vadd.f32 %v446_v35, %v445_v33  ;;  %v5233_v33 = vld [vmem:[#allocation14 + $0x10c] ss:$16 sps:$4 sm:$0xff]  }
 0x285   :  { %v453_v38 = vadd.f32 %v452_v36, %v451_v34  ;;  %v5231_v34 = vld [vmem:[#allocation14 + $0x108] ss:$16 sps:$4 sm:$0xff]   ;;  %v5236_v35 = vld [vmem:[#allocation14 + $0x12c] ss:$16 sps:$4 sm:$0xff]  }
 0x286   :  { %v448_v39 = vrot.slane %v447_v37, 1  ;;  %v5234_v36 = vld [vmem:[#allocation14 + $0x128] ss:$16 sps:$4 sm:$0xff]  }
 0x287   :  { %v454_v40 = vrot.slane %v453_v38, 1 }
 0x288   :  { %v449_v41 = vadd.f32 %v448_v39, %v447_v37  ;;  %v5239_v37 = vld [vmem:[#allocation14 + $0x14c] ss:$16 sps:$4 sm:$0xff]  }
 0x289   :  { %v455_v42 = vadd.f32 %v454_v40, %v453_v38  ;;  %v5237_v38 = vld [vmem:[#allocation14 + $0x148] ss:$16 sps:$4 sm:$0xff]   ;;  %v5242_v39 = vld [vmem:[#allocation14 + $0x16c] ss:$16 sps:$4 sm:$0xff]  }
 0x28a   :  { %v456_v43 = vmul.f32 0.125, %v449_v41  ;;  %v5240_v40 = vld [vmem:[#allocation14 + $0x168] ss:$16 sps:$4 sm:$0xff]   ;;  %v5245_v41 = vld [vmem:[#allocation14 + $0x18c] ss:$16 sps:$4 sm:$0xff]  }
 0x28b   :  { %v457_v44 = vmul.f32 0.125, %v455_v42  ;;  %v5243_v42 = vld [vmem:[#allocation14 + $0x188] ss:$16 sps:$4 sm:$0xff]  }
 0x28c   :  { %v459_v45 = vadd.f32 0.8, %v456_v43  ;;  %v5248_v43 = vld [vmem:[#allocation14 + $0x1ac] ss:$16 sps:$4 sm:$0xff]  }
 0x28d   :  { %v460_v46 = vadd.f32 0.8, %v457_v44  ;;  %v5246_v44 = vld [vmem:[#allocation14 + $0x1a8] ss:$16 sps:$4 sm:$0xff]  }
 0x28e   :  { %5447 = vrsqrt.f32 %v459_v45  ;;  %v5251_v45 = vld [vmem:[#allocation14 + $0x1cc] ss:$16 sps:$4 sm:$0xff]  }
 0x28f   :  { %5449 = vrsqrt.f32 %v460_v46  ;;  %v5249_v46 = vld [vmem:[#allocation14 + $0x1c8] ss:$16 sps:$4 sm:$0xff]  }
 0x298   :  { %v5448_v50 = vpop.eup %5447 }
 0x299   :  { %v5450_v52 = vpop.eup %5449 }
 0x29a   :  { %v465_v53 = vcombine.low %v5448_v50, %v5450_v52  ;;  %v1234_v50 = vld [vmem:[#allocation15 + $0x20] sm:$0xff] }
 0x29b   :  { %v1358_v52 = vld [vmem:[#allocation15 + $0x400] sm:$0xff] }
 0x29c   :  { %v472_v54 = vrot.slane %v465_v53, %v5965_v51  ;;  %v4657_v53 = vcombine.high %v1230_v49, %v1234_v50 }
 0x29e   :  { %v479_v56 = vrot.slane %v472_v54, %v5965_v51  ;;  %v1362_v54 = vld [vmem:[#allocation15 + $0x420] sm:$0xff] }
 0x2a0   :  { %v481_v57 = vmul.f32 %v479_v56, %v458_v55  ;;  %v4656_v55 = vcombine.low %v1230_v49, %v1234_v50  ;;  %v4784_v56 = vcombine.low %v1358_v52, %v1362_v54  ;;  %v1418_v49 = vld [vmem:[#allocation15 + $0x5e0] sm:$0xff] }
 0x2a2   :  { %v487_v58 = vrot.slane %v481_v57, %v5957_v2  ;;  %v491_v59 = vrot.slane %v481_v57, %v5960_v4  ;;  %v4785_v57 = vcombine.high %v1358_v52, %v1362_v54  ;;  %v1294_v54 = vld [vmem:[#allocation15 + $0x200] sm:$0xff] }
 0x2a4   :  { %v494_v60 = vmul.f32 %v487_v58, %v438_v25  ;;  %v495_v61 = vmul.f32 %v491_v59, %v439_v26  ;;  %v516_v62 = vmul.f32 %v491_v59, %v421_v10  ;;  %v515_v63 = vmul.f32 %v487_v58, %v419_v8  ;;  %v5221_v25 = vld [vmem:[#allocation14 + $0x8c] ss:$16 sps:$4 sm:$0xff]   ;;  %v5219_v26 = vld [vmem:[#allocation14 + $0x88] ss:$16 sps:$4 sm:$0xff]   ;;  %2849 = vmatprep.subr.bf16.mxu0 %v4785_v57  ;;  %v1238_v58 = vld [vmem:[#allocation15 + $0x40] sm:$0xff] }
 0x2a5   :  { %v1242_v59 = vld [vmem:[#allocation15 + $0x60] sm:$0xff]  ;;  %2850 = vmatpush1.bf16.msra.mxu0 %v4784_v56 }
 0x2a6   :  { %v498_v0 = vcombine.low %v494_v60, %v495_v61  ;;  %v1366_v60 = vld [vmem:[#allocation15 + $0x440] sm:$0xff]  ;;  %v4665_v61 = vcombine.high %v1238_v58, %v1242_v59 }
 0x2a7   :  { %v1422_v56 = vld [vmem:[#allocation15 + $0x600] sm:$0xff] }
 0x2a8   :  { %v505_v3 = vrot.slane %v498_v0, %v5965_v51 }
 0x2aa   :  { %v512_v6 = vrot.slane %v505_v3, %v5965_v51 }
 0x2ac   :  { %v514_v7 = vsub.f32 %v482_v5, %v512_v6  ;;  %v1246_v5 = vld [vmem:[#allocation15 + $0x80] sm:$0xff] }
 0x2ad   :  { %v1250_v6 = vld [vmem:[#allocation15 + $0xa0] sm:$0xff] }
 0x2ae   :  { %v525_v9 = vrot.slane %v514_v7, %v5960_v4  ;;  %v521_v11 = vrot.slane %v514_v7, %v5957_v2  ;;  %v1374_v7 = vld [vmem:[#allocation15 + $0x480] sm:$0xff] }
 0x2b0   :  { %v529_v12 = vadd.f32 %v525_v9, %v516_v62  ;;  %v528_v13 = vadd.f32 %v521_v11, %v515_v63  ;;  %v1370_v62 = vld [vmem:[#allocation15 + $0x460] sm:$0xff]  ;;  %v4664_v63 = vcombine.low %v1238_v58, %v1242_v59  ;;  %v4673_v9 = vcombine.high %v1246_v5, %v1250_v6 }
 0x2b1   :  { %v4792_v0 = vcombine.low %v1366_v60, %v1370_v62  ;;  %v4793_v3 = vcombine.high %v1366_v60, %v1370_v62  ;;  %v1378_v11 = vld [vmem:[#allocation15 + $0x4a0] sm:$0xff] }
 0x2b2   :  { %vm531_vm3 = vcmp.gt.f32.partialorder %v529_v12, 0.0  ;;  %v533_v14 = vmul.f32 0.2, %v529_v12  ;;  %vm530_vm4 = vcmp.gt.f32.partialorder %v528_v13, 0.0  ;;  %v532_v15 = vmul.f32 0.2, %v528_v13 }
 0x2b3   :  { %2851 = vmatprep.subr.bf16.mxu0 %v4793_v3  ;;  %v1426_v58 = vld [vmem:[#allocation15 + $0x620] sm:$0xff] }
 0x2b4   :  { %v535_v16 = vsel %vm531_vm3, %v529_v12, %v533_v14  ;;  %v534_v10 = vsel %vm530_vm4, %v528_v13, %v532_v15  ;;  %2852 = vmatpush1.bf16.msra.mxu0 %v4792_v0  ;;  %v4672_v12 = vcombine.low %v1246_v5, %v1250_v6  ;;  %v4800_v13 = vcombine.low %v1374_v7, %v1378_v11  ;;  %v1254_v15 = vld [vmem:[#allocation15 + $0xc0] sm:$0xff] }
 0x2b5   :  { %v537_v8 = vpack.c.bf16 %v535_v16, %v535_v16  ;;  %v5975_v18 = vpack.c.bf16 %v534_v10, %v534_v10  ;;  %v4801_v14 = vcombine.high %v1374_v7, %v1378_v11  ;;  %v1258_v16 = vld [vmem:[#allocation15 + $0xe0] sm:$0xff]  ;;  %v4848_v60 = vcombine.low %v1422_v56, %v1426_v58 }
 0x2b6   :  { %v1382_v10 = vld [vmem:[#allocation15 + $0x4c0] sm:$0xff] }
 0x2b7   :  { %976 = vmatprep.mubr.bf16.mxu1 %v537_v8  ;;  %2853 = vmatprep.subr.bf16.mxu0 %v4801_v14  ;;  %v1302_v62 = vld [vmem:[#allocation15 + $0x240] sm:$0xff] }
 0x2b8   :  { %977 = vmatmul.mubr.bf16.vlgmr.msra.gmra.mrb[4].mxu1 %v5975_v18  ;;  %2854 = vmatpush1.bf16.msra.mxu0 %v4800_v13  ;;  %v1430_v0 = vld [vmem:[#allocation15 + $0x640] sm:$0xff] }
 0x2b9   :  { %986 = vmatpush1.bf16.msra.mxu1 %v5207_v17  ;;  %1017 = vmatprep.mubr.bf16.mxu1 %v537_v8  ;;  %v4681_v8 = vcombine.high %v1254_v15, %v1258_v16  ;;  %v1386_v17 = vld [vmem:[#allocation15 + $0x4e0] sm:$0xff] }
 0x2ba   :  { %987 = vmatprep.subr.bf16.mxu1 %v5212_v19  ;;  %v4808_v19 = vcombine.low %v1382_v10, %v1386_v17  ;;  %v1434_v5 = vld [vmem:[#allocation15 + $0x660] sm:$0xff] }
 0x2bb   :  { %v4856_v7 = vcombine.low %v1430_v0, %v1434_v5  ;;  %v1310_v11 = vld [vmem:[#allocation15 + $0x280] sm:$0xff] }
 0x2bc   :  { %v1438_v13 = vld [vmem:[#allocation15 + $0x680] sm:$0xff] }
 0x2bd   :  { %988 = vmatpush1.bf16.msra.mxu1 %v5210_v20  ;;  %v4809_v20 = vcombine.high %v1382_v10, %v1386_v17  ;;  %v1318_v17 = vld [vmem:[#allocation15 + $0x2c0] sm:$0xff] }
 0x2be   :  { %989 = vmatprep.subr.bf16.mxu1 %v5215_v21  ;;  %v1262_v21 = vld [vmem:[#allocation15 + $0x100] sm:$0xff] }
 0x2bf   :  { %2855 = vmatprep.subr.bf16.mxu0 %v4809_v20 }
 0x2c0   :  { %2856 = vmatpush1.bf16.msra.mxu0 %v4808_v19  ;;  %v1446_v19 = vld [vmem:[#allocation15 + $0x6c0] sm:$0xff] }
 0x2c1   :  { %990 = vmatpush1.bf16.msra.mxu1 %v5213_v22  ;;  %v1266_v22 = vld [vmem:[#allocation15 + $0x120] sm:$0xff] }
 0x2c2   :  { %991 = vmatprep.subr.bf16.mxu1 %v5218_v23  ;;  %v1390_v23 = vld [vmem:[#allocation15 + $0x500] sm:$0xff] }
 0x2c5   :  { %992 = vmatpush1.bf16.msra.mxu1 %v5216_v24  ;;  %v4689_v24 = vcombine.high %v1262_v21, %v1266_v22 }
 0x2c6   :  { %993 = vmatprep.subr.bf16.mxu1 %v5221_v25  ;;  %v1394_v25 = vld [vmem:[#allocation15 + $0x520] sm:$0xff] }
 0x2c9   :  { %994 = vmatpush1.bf16.msra.mxu1 %v5219_v26  ;;  %v4688_v26 = vcombine.low %v1262_v21, %v1266_v22  ;;  %v1450_v21 = vld [vmem:[#allocation15 + $0x6e0] sm:$0xff] }
 0x2ca   :  { %995 = vmatprep.subr.bf16.mxu1 %v5224_v27  ;;  %v4816_v27 = vcombine.low %v1390_v23, %v1394_v25 }
 0x2cd   :  { %996 = vmatpush1.bf16.msra.mxu1 %v5222_v28  ;;  %v4817_v28 = vcombine.high %v1390_v23, %v1394_v25  ;;  %v4872_v23 = vcombine.low %v1446_v19, %v1450_v21 }
 0x2ce   :  { %997 = vmatprep.subr.bf16.mxu1 %v5227_v29  ;;  %v1270_v29 = vld [vmem:[#allocation15 + $0x140] sm:$0xff] }
 0x2cf   :  { %2857 = vmatprep.subr.bf16.mxu0 %v4817_v28  ;;  %v1454_v28 = vld [vmem:[#allocation15 + $0x700] sm:$0xff] }
 0x2d0   :  { %2858 = vmatpush1.bf16.msra.mxu0 %v4816_v27  ;;  %v1330_v27 = vld [vmem:[#allocation15 + $0x320] sm:$0xff] }
 0x2d1   :  { %998 = vmatpush1.bf16.msra.mxu1 %v5225_v30  ;;  %v1274_v30 = vld [vmem:[#allocation15 + $0x160] sm:$0xff] }
 0x2d2   :  { %999 = vmatprep.subr.bf16.mxu1 %v5230_v31  ;;  %v1398_v31 = vld [vmem:[#allocation15 + $0x540] sm:$0xff] }
 0x2d5   :  { %1000 = vmatpush1.bf16.msra.mxu1 %v5228_v32  ;;  %v4697_v32 = vcombine.high %v1270_v29, %v1274_v30 }
 0x2d6   :  { %1001 = vmatprep.subr.bf16.mxu1 %v5233_v33  ;;  %v1402_v33 = vld [vmem:[#allocation15 + $0x560] sm:$0xff] }
 0x2d9   :  { %1002 = vmatpush1.bf16.msra.mxu1 %v5231_v34  ;;  %v4696_v34 = vcombine.low %v1270_v29, %v1274_v30 }
 0x2da   :  { %1003 = vmatprep.subr.bf16.mxu1 %v5236_v35  ;;  %v4824_v35 = vcombine.low %v1398_v31, %v1402_v33 }
 0x2dd   :  { %1004 = vmatpush1.bf16.msra.mxu1 %v5234_v36  ;;  %v4825_v36 = vcombine.high %v1398_v31, %v1402_v33  ;;  %v1458_v31 = vld [vmem:[#allocation15 + $0x720] sm:$0xff] }
 0x2de   :  { %1005 = vmatprep.subr.bf16.mxu1 %v5239_v37  ;;  %v1278_v37 = vld [vmem:[#allocation15 + $0x180] sm:$0xff] }
 0x2df   :  { %2859 = vmatprep.subr.bf16.mxu0 %v4825_v36 }
 0x2e0   :  { %2860 = vmatpush1.bf16.msra.mxu0 %v4824_v35  ;;  %v4881_v35 = vcombine.high %v1454_v28, %v1458_v31 }
 0x2e1   :  { %1006 = vmatpush1.bf16.msra.mxu1 %v5237_v38  ;;  %v1282_v38 = vld [vmem:[#allocation15 + $0x1a0] sm:$0xff] }
 0x2e2   :  { %1007 = vmatprep.subr.bf16.mxu1 %v5242_v39  ;;  %v1406_v39 = vld [vmem:[#allocation15 + $0x580] sm:$0xff] }
 0x2e5   :  { %1008 = vmatpush1.bf16.msra.mxu1 %v5240_v40  ;;  %v4705_v40 = vcombine.high %v1278_v37, %v1282_v38 }
 0x2e6   :  { %1009 = vmatprep.subr.bf16.mxu1 %v5245_v41  ;;  %v1410_v41 = vld [vmem:[#allocation15 + $0x5a0] sm:$0xff] }
 0x2e9   :  { %1010 = vmatpush1.bf16.msra.mxu1 %v5243_v42  ;;  %v4704_v42 = vcombine.low %v1278_v37, %v1282_v38  ;;  %v1334_v37 = vld [vmem:[#allocation15 + $0x340] sm:$0xff] }
 0x2ea   :  { %1011 = vmatprep.subr.bf16.mxu1 %v5248_v43  ;;  %v4832_v43 = vcombine.low %v1406_v39, %v1410_v41  ;;  %v1338_v38 = vld [vmem:[#allocation15 + $0x360] sm:$0xff] }
 0x2ed   :  { %1012 = vmatpush1.bf16.msra.mxu1 %v5246_v44  ;;  %v4833_v44 = vcombine.high %v1406_v39, %v1410_v41  ;;  %v1462_v39 = vld [vmem:[#allocation15 + $0x740] sm:$0xff] }
 0x2ee   :  { %1013 = vmatprep.subr.bf16.mxu1 %v5251_v45  ;;  %v1286_v45 = vld [vmem:[#allocation15 + $0x1c0] sm:$0xff] }
 0x2ef   :  { %2861 = vmatprep.subr.bf16.mxu0 %v4833_v44  ;;  %v1466_v41 = vld [vmem:[#allocation15 + $0x760] sm:$0xff] }
 0x2f0   :  { %2862 = vmatpush1.bf16.msra.mxu0 %v4832_v43  ;;  %v4888_v43 = vcombine.low %v1462_v39, %v1466_v41  ;;  %v4889_v44 = vcombine.high %v1462_v39, %v1466_v41 }
 0x2f1   :  { %1014 = vmatpush1.bf16.msra.mxu1 %v5249_v46  ;;  %v1290_v46 = vld [vmem:[#allocation15 + $0x1e0] sm:$0xff] }
 0x2f2   :  { %1015 = vmatprep.subr.bf16.mxu1 %v5254_v47  ;;  %v1414_v47 = vld [vmem:[#allocation15 + $0x5c0] sm:$0xff]  ;;  %v4712_v50 = vcombine.low %v1286_v45, %v1290_v46 }
 0x2f3   :  { %v4840_v52 = vcombine.low %v1414_v47, %v1418_v49 }
 0x2f5   :  { %1016 = vmatpush1.bf16.msra.mxu1 %v5252_v48  ;;  %v4713_v48 = vcombine.high %v1286_v45, %v1290_v46  ;;  %v1342_v45 = vld [vmem:[#allocation15 + $0x380] sm:$0xff] }
 0x2f6   :  { %2808 = vmatprep.subr.bf16.mxu1 %v4657_v53  ;;  %v4841_v53 = vcombine.high %v1414_v47, %v1418_v49  ;;  %v1346_v46 = vld [vmem:[#allocation15 + $0x3a0] sm:$0xff] }
 0x2f7   :  { %v1470_v47 = vld [vmem:[#allocation15 + $0x780] sm:$0xff] }
 0x2f8   :  { %1018 = vmatmul.mubr.bf16.vlgmr.msra.gmra.mrb[8].mxu1 %v5975_v18  ;;  %v4680_v18 = vcombine.low %v1254_v15, %v1258_v16  ;;  %2863 = vmatprep.subr.bf16.mxu0 %v4841_v53  ;;  %v1442_v15 = vld [vmem:[#allocation15 + $0x6a0] sm:$0xff] }
 0x2f9   :  { %2809 = vmatpush1.bf16.msra.mxu1 %v4656_v55  ;;  %v1298_v55 = vld [vmem:[#allocation15 + $0x220] sm:$0xff]  ;;  %2864 = vmatpush1.bf16.msra.mxu0 %v4840_v52  ;;  %v4864_v10 = vcombine.low %v1438_v13, %v1442_v15 }
 0x2fa   :  { %2810 = vmatprep.subr.bf16.mxu1 %v4665_v61  ;;  %v4721_v57 = vcombine.high %v1294_v54, %v1298_v55  ;;  %v4720_v59 = vcombine.low %v1294_v54, %v1298_v55  ;;  %v4849_v61 = vcombine.high %v1422_v56, %v1426_v58  ;;  %v1474_v49 = vld [vmem:[#allocation15 + $0x7a0] sm:$0xff] }
 0x2fb   :  { %v4896_v52 = vcombine.low %v1470_v47, %v1474_v49  ;;  %v4897_v53 = vcombine.high %v1470_v47, %v1474_v49  ;;  %v1350_v54 = vld [vmem:[#allocation15 + $0x3c0] sm:$0xff] }
 0x2fc   :  { %2865 = vmatprep.subr.bf16.mxu0 %v4849_v61  ;;  %v1354_v55 = vld [vmem:[#allocation15 + $0x3e0] sm:$0xff] }
 0x2fd   :  { %2811 = vmatpush1.bf16.msra.mxu1 %v4664_v63  ;;  %v1306_v63 = vld [vmem:[#allocation15 + $0x260] sm:$0xff]  ;;  %2866 = vmatpush1.bf16.msra.mxu0 %v4848_v60  ;;  %v4777_v58 = vcombine.high %v1350_v54, %v1354_v55 }
 0x2fe   :  { %2812 = vmatprep.subr.bf16.mxu1 %v4673_v9  ;;  %v4729_v3 = vcombine.high %v1302_v62, %v1306_v63  ;;  %v4728_v6 = vcombine.low %v1302_v62, %v1306_v63  ;;  %v4857_v9 = vcombine.high %v1430_v0, %v1434_v5  ;;  %v1478_v56 = vld [vmem:[#allocation15 + $0x7c0] sm:$0xff]  ;;  %v5983_v62 = vld [vmem:[#allocation15 + $0x8] sm:$0xff]  ;;  %v5987_v0 = vld [vmem:[#allocation15 + $0x10] sm:$0xff] }
 0x2ff   :  { %v5985_v63 = vld [vmem:[#allocation15 + $0x28] sm:$0xff]  ;;  %v5991_v5 = vld [vmem:[#allocation15 + $0x30] sm:$0xff] }
 0x300   :  { %2867 = vmatprep.subr.bf16.mxu0 %v4857_v9  ;;  %v4660_v9 = vcombine.low %v5987_v0, %v5991_v5 }
 0x301   :  { %2813 = vmatpush1.bf16.msra.mxu1 %v4672_v12  ;;  %v1314_v12 = vld [vmem:[#allocation15 + $0x2a0] sm:$0xff]  ;;  %2868 = vmatpush1.bf16.msra.mxu0 %v4856_v7  ;;  %v4658_v7 = vcombine.low %v5983_v62, %v5985_v63 }
 0x302   :  { %2814 = vmatprep.subr.bf16.mxu1 %v4681_v8  ;;  %v4737_v14 = vcombine.high %v1310_v11, %v1314_v12  ;;  %v4736_v16 = vcombine.low %v1310_v11, %v1314_v12  ;;  %v4865_v8 = vcombine.high %v1438_v13, %v1442_v15  ;;  %v4661_v11 = vcombine.high %v5987_v0, %v5991_v5 }
 0x304   :  { %2869 = vmatprep.subr.bf16.mxu0 %v4865_v8 }
 0x305   :  { %2815 = vmatpush1.bf16.msra.mxu1 %v4680_v18  ;;  %v1322_v18 = vld [vmem:[#allocation15 + $0x2e0] sm:$0xff]  ;;  %2870 = vmatpush1.bf16.msra.mxu0 %v4864_v10 }
 0x306   :  { %2816 = vmatprep.subr.bf16.mxu1 %v4689_v24  ;;  %v4745_v20 = vcombine.high %v1318_v17, %v1322_v18  ;;  %v4744_v22 = vcombine.low %v1318_v17, %v1322_v18  ;;  %v4873_v24 = vcombine.high %v1446_v19, %v1450_v21 }
 0x308   :  { %2871 = vmatprep.subr.bf16.mxu0 %v4873_v24 }
 0x309   :  { %2817 = vmatpush1.bf16.msra.mxu1 %v4688_v26  ;;  %v1326_v26 = vld [vmem:[#allocation15 + $0x300] sm:$0xff]  ;;  %2872 = vmatpush1.bf16.msra.mxu0 %v4872_v23 }
 0x30a   :  { %2818 = vmatprep.subr.bf16.mxu1 %v4697_v32  ;;  %v4753_v30 = vcombine.high %v1326_v26, %v1330_v27  ;;  %v4752_v33 = vcombine.low %v1326_v26, %v1330_v27  ;;  %2873 = vmatprep.subr.bf16.mxu0 %v4881_v35 }
 0x30d   :  { %2819 = vmatpush1.bf16.msra.mxu1 %v4696_v34  ;;  %v4880_v34 = vcombine.low %v1454_v28, %v1458_v31  ;;  %v6026_v31 = vsub.s32 3, %v5954_v1 }
 0x30e   :  { %2820 = vmatprep.subr.bf16.mxu1 %v4705_v40  ;;  %v4761_v40 = vcombine.high %v1334_v37, %v1338_v38 }
 0x30f   :  { %2874 = vmatpush1.bf16.msra.mxu0 %v4880_v34 }
 0x310   :  { %2875 = vmatprep.subr.bf16.mxu0 %v4889_v44 }
 0x311   :  { %2821 = vmatpush1.bf16.msra.mxu1 %v4704_v42  ;;  %v4760_v42 = vcombine.low %v1334_v37, %v1338_v38 }
 0x312   :  { %2822 = vmatprep.subr.bf16.mxu1 %v4713_v48  ;;  %v4769_v48 = vcombine.high %v1342_v45, %v1346_v46 }
 0x313   :  { %2876 = vmatpush1.bf16.msra.mxu0 %v4888_v43 }
 0x314   :  { %2877 = vmatprep.subr.bf16.mxu0 %v4897_v53 }
 0x315   :  { %2823 = vmatpush1.bf16.msra.mxu1 %v4712_v50  ;;  %v4768_v50 = vcombine.low %v1342_v45, %v1346_v46 }
 0x316   :  { %2824 = vmatprep.subr.bf16.mxu1 %v4721_v57  ;;  %v4776_v57 = vcombine.low %v1350_v54, %v1354_v55 }
 0x317   :  { %2878 = vmatpush1.bf16.msra.mxu0 %v4896_v52 }
 0x319   :  { %2825 = vmatpush1.bf16.msra.mxu1 %v4720_v59  ;;  %v1482_v59 = vld [vmem:[#allocation15 + $0x7e0] sm:$0xff] }
 0x31a   :  { %2826 = vmatprep.subr.bf16.mxu1 %v4729_v3  ;;  %v4904_v60 = vcombine.low %v1478_v56, %v1482_v59  ;;  %v4905_v61 = vcombine.high %v1478_v56, %v1482_v59  ;;  %v4659_v3 = vcombine.high %v5983_v62, %v5985_v63 }
 0x31c   :  { %2879 = vmatprep.subr.bf16.mxu0 %v4905_v61 }
 0x31d   :  { %2827 = vmatpush1.bf16.msra.mxu1 %v4728_v6  ;;  %2880 = vmatpush1.bf16.msra.mxu0 %v4904_v60  ;;  %v602_v6 = vld [vmem:[%s6305_s8] sm:$0xf] }
 0x31e   :  { %2828 = vmatprep.subr.bf16.mxu1 %v4737_v14  ;;  %2972 = vmatprep.subr.bf16.mxu0 %v4661_v11  ;;  %v607_v12 = vrot.slane %v602_v6, %v5957_v2  ;;  %v611_v13 = vrot.slane %v602_v6, %v5960_v4  ;;  %v619_v35 = vrot.slane %v602_v6, %v6026_v31 }
 0x321   :  { %2829 = vmatpush1.bf16.msra.mxu1 %v4736_v16 }
 0x322   :  { %2830 = vmatprep.subr.bf16.mxu1 %v4745_v20 }
 0x325   :  { %2831 = vmatpush1.bf16.msra.mxu1 %v4744_v22 }
 0x326   :  { %2832 = vmatprep.subr.bf16.mxu1 %v4753_v30 }
 0x329   :  { %2833 = vmatpush1.bf16.msra.mxu1 %v4752_v33 }
 0x32a   :  { %2834 = vmatprep.subr.bf16.mxu1 %v4761_v40 }
 0x32d   :  { %2835 = vmatpush1.bf16.msra.mxu1 %v4760_v42 }
 0x32e   :  { %2836 = vmatprep.subr.bf16.mxu1 %v4769_v48 }
 0x331   :  { %2837 = vmatpush1.bf16.msra.mxu1 %v4768_v50 }
 0x332   :  { %2838 = vmatprep.subr.bf16.mxu1 %v4777_v58 }
 0x335   :  { %2839 = vmatpush1.bf16.msra.mxu1 %v4776_v57 }
 0x336   :  { %2890 = vmatprep.subr.bf16.mxu1 %v4659_v3 }
 0x38b   :  { %v5979_v25 = vpop.f32.mrb[4].mxu1 }
 0x38c   :  { %v5981_v29 = vpop.f32.mrb[5].mxu1  ;;  %v6005_v14 = vadd.f32 %v5979_v25, %v607_v12 }
 0x38d   :  { %v982_v32 = vpop.f32.mrb[6].mxu1  ;;  %v6008_v15 = vadd.f32 %v5981_v29, %v611_v13  ;;  %v6021_v29 = vsub.s32 2, %v5954_v1 }
 0x38e   :  { %v983_v36 = vpop.f32.mrb[7].mxu1  ;;  %v1026_v16 = vrot.slane %v6005_v14, 4 }
 0x38f   :  { %v1032_v10 = vrot.slane %v6008_v15, 4  ;;  %v615_v33 = vrot.slane %v602_v6, %v6021_v29 }
 0x390   :  { %v1027_v8 = vadd.f32 %v1026_v16, %v6005_v14 }
 0x391   :  { %v1033_v17 = vadd.f32 %v1032_v10, %v6008_v15 }
 0x392   :  { %v1028_v18 = vrot.slane %v1027_v8, 2 }
 0x393   :  { %v1034_v19 = vrot.slane %v1033_v17, 2 }
 0x394   :  { %v1029_v20 = vadd.f32 %v1028_v18, %v1027_v8 }
 0x395   :  { %v1035_v21 = vadd.f32 %v1034_v19, %v1033_v17 }
 0x396   :  { %v1030_v22 = vrot.slane %v1029_v20, 1 }
 0x397   :  { %v1036_v23 = vrot.slane %v1035_v21, 1 }
 0x398   :  { %v1031_v24 = vadd.f32 %v1030_v22, %v1029_v20 }
 0x399   :  { %v1037_v25 = vadd.f32 %v1036_v23, %v1035_v21 }
 0x39a   :  { %v6014_v26 = vmul.f32 0.125, %v1031_v24 }
 0x39b   :  { %v6016_v27 = vmul.f32 0.125, %v1037_v25 }
 0x39c   :  { %v1054_v28 = vsub.f32 %v6005_v14, %v6014_v26 }
 0x39d   :  { %v1055_v30 = vsub.f32 %v6008_v15, %v6016_v27 }
 0x39e   :  { %v1058_v32 = vmul.f32 %v1054_v28, %v1054_v28 }
 0x39f   :  { %v1059_v34 = vmul.f32 %v1055_v30, %v1055_v30 }
 0x3a0   :  { %v1062_v37 = vrot.slane %v1058_v32, 4 }
 0x3a1   :  { %v1068_v40 = vrot.slane %v1059_v34, 4 }
 0x3a2   :  { %v1063_v46 = vadd.f32 %v1062_v37, %v1058_v32 }
 0x3a3   :  { %v1069_v48 = vadd.f32 %v1068_v40, %v1059_v34 }
 0x3a4   :  { %v1064_v53 = vrot.slane %v1063_v46, 2 }
 0x3a5   :  { %v1070_v55 = vrot.slane %v1069_v48, 2 }
 0x3a6   :  { %v1065_v59 = vadd.f32 %v1064_v53, %v1063_v46 }
 0x3a7   :  { %v1071_v61 = vadd.f32 %v1070_v55, %v1069_v48 }
 0x3a8   :  { %v1066_v12 = vrot.slane %v1065_v59, 1 }
 0x3a9   :  { %v1072_v16 = vrot.slane %v1071_v61, 1 }
 0x3aa   :  { %v1067_v18 = vadd.f32 %v1066_v12, %v1065_v59 }
 0x3ab   :  { %v1073_v20 = vadd.f32 %v1072_v16, %v1071_v61 }
 0x3ac   :  { %v1086_v24 = vmul.f32 0.125, %v1067_v18 }
 0x3ad   :  { %v1087_v28 = vmul.f32 0.125, %v1073_v20 }
 0x3ae   :  { %v1091_v34 = vadd.f32 0.8, %v1086_v24 }
 0x3b0   :  { %5451 = vrsqrt.f32 %v1091_v34 }
 0x3ba   :  { %v5452_v46 = vpop.eup %5451 }
 0x3cb   :  { %v1019_v36 = vpop.f32.mrb[8].mxu1 }
 0x3cc   :  { %v6030_v38 = vadd.f32 %v1019_v36, %v615_v33  ;;  %v1021_v39 = vpop.f32.mrb[9].mxu1  ;;  %v1092_v36 = vadd.f32 0.8, %v1087_v28 }
 0x3cd   :  { %v6032_v41 = vadd.f32 %v1021_v39, %v619_v35  ;;  %v1023_v42 = vpop.f32.mrb[10].mxu1 }
 0x3ce   :  { %v1038_v43 = vrot.slane %v6030_v38, 4  ;;  %v1024_v44 = vpop.f32.mrb[11].mxu1  ;;  %5453 = vrsqrt.f32 %v1092_v36  ;;  %v1239_v36 = vld [vmem:[#allocation15 + $0x48] sm:$0xff] }
 0x3cf   :  { %v1044_v45 = vrot.slane %v6032_v41, 4 }
 0x3d0   :  { %v1039_v47 = vadd.f32 %v1038_v43, %v6030_v38 }
 0x3d1   :  { %v1045_v49 = vadd.f32 %v1044_v45, %v6032_v41 }
 0x3d2   :  { %v1040_v50 = vrot.slane %v1039_v47, 2 }
 0x3d3   :  { %v1046_v52 = vrot.slane %v1045_v49, 2 }
 0x3d4   :  { %v1041_v54 = vadd.f32 %v1040_v50, %v1039_v47 }
 0x3d5   :  { %v1047_v56 = vadd.f32 %v1046_v52, %v1045_v49 }
 0x3d6   :  { %v1042_v57 = vrot.slane %v1041_v54, 1 }
 0x3d7   :  { %v1048_v58 = vrot.slane %v1047_v56, 1 }
 0x3d8   :  { %v1043_v60 = vadd.f32 %v1042_v57, %v1041_v54  ;;  %v5454_v47 = vpop.eup %5453 }
 0x3d9   :  { %v1049_v3 = vadd.f32 %v1048_v58, %v1047_v56  ;;  %v1103_v49 = vcombine.low %v5452_v46, %v5454_v47  ;;  %v1090_v56 = vld [vmem:[%s6306_s9] sm:$0xf] }
 0x3da   :  { %v1052_v6 = vmul.f32 0.125, %v1043_v60 }
 0x3db   :  { %v1053_v11 = vmul.f32 0.125, %v1049_v3  ;;  %v1111_v53 = vrot.slane %v1103_v49, %v5965_v51 }
 0x3dc   :  { %v1056_v13 = vsub.f32 %v6030_v38, %v1052_v6 }
 0x3dd   :  { %v1057_v10 = vsub.f32 %v6032_v41, %v1053_v11 }
 0x3de   :  { %v1060_v8 = vmul.f32 %v1056_v13, %v1056_v13 }
 0x3df   :  { %v1061_v17 = vmul.f32 %v1057_v10, %v1057_v10 }
 0x3e0   :  { %v1074_v19 = vrot.slane %v1060_v8, 4 }
 0x3e1   :  { %v1080_v21 = vrot.slane %v1061_v17, 4 }
 0x3e2   :  { %v1075_v22 = vadd.f32 %v1074_v19, %v1060_v8 }
 0x3e3   :  { %v1081_v23 = vadd.f32 %v1080_v21, %v1061_v17 }
 0x3e4   :  { %v1076_v25 = vrot.slane %v1075_v22, 2 }
 0x3e5   :  { %v1082_v30 = vrot.slane %v1081_v23, 2 }
 0x3e6   :  { %v1077_v32 = vadd.f32 %v1076_v25, %v1075_v22 }
 0x3e7   :  { %v1083_v33 = vadd.f32 %v1082_v30, %v1081_v23  ;;  %v1129_v23 = vld [vmem:[%s6307_s10] sm:$0xf] }
 0x3e8   :  { %v1078_v35 = vrot.slane %v1077_v32, 1 }
 0x3e9   :  { %v1084_v37 = vrot.slane %v1083_v33, 1 }
 0x3ea   :  { %v1079_v39 = vadd.f32 %v1078_v35, %v1077_v32 }
 0x3eb   :  { %v1085_v40 = vadd.f32 %v1084_v37, %v1083_v33 }
 0x3ec   :  { %v1088_v42 = vmul.f32 0.125, %v1079_v39 }
 0x3ed   :  { %v1089_v43 = vmul.f32 0.125, %v1085_v40  ;;  %v1243_v40 = vld [vmem:[#allocation15 + $0x68] sm:$0xff] }
 0x3ee   :  { %v1093_v44 = vadd.f32 0.8, %v1088_v42  ;;  %v1240_v42 = vld [vmem:[#allocation15 + $0x50] sm:$0xff] }
 0x3ef   :  { %v1094_v45 = vadd.f32 0.8, %v1089_v43  ;;  %v1244_v43 = vld [vmem:[#allocation15 + $0x70] sm:$0xff] }
 0x3f0   :  { %5455 = vrsqrt.f32 %v1093_v44 }
 0x3f1   :  { %5457 = vrsqrt.f32 %v1094_v45 }
 0x3fa   :  { %v5456_v48 = vpop.eup %5455 }
 0x3fb   :  { %v5458_v50 = vpop.eup %5457 }
 0x3fc   :  { %v1104_v52 = vcombine.low %v5456_v48, %v5458_v50  ;;  %v1247_v50 = vld [vmem:[#allocation15 + $0x88] sm:$0xff] }
 0x3fe   :  { %v1118_v54 = vrot.slane %v1104_v52, %v5965_v51  ;;  %v4667_v52 = vcombine.high %v1239_v36, %v1243_v40 }
 0x400   :  { %v1119_v55 = vcombine.low %v1111_v53, %v1118_v54  ;;  %v4669_v53 = vcombine.high %v1240_v42, %v1244_v43  ;;  %v1251_v54 = vld [vmem:[#allocation15 + $0xa8] sm:$0xff] }
 0x401   :  { %v4674_v62 = vcombine.low %v1247_v50, %v1251_v54 }
 0x402   :  { %v1126_v57 = vrot.slane %v1119_v55, %v5965_v51  ;;  %v1248_v55 = vld [vmem:[#allocation15 + $0x90] sm:$0xff] }
 0x404   :  { %v1128_v58 = vmul.f32 %v1126_v57, %v1090_v56  ;;  %v1252_v56 = vld [vmem:[#allocation15 + $0xb0] sm:$0xff]  ;;  %v4666_v57 = vcombine.low %v1239_v36, %v1243_v40 }
 0x405   :  { %v4676_v63 = vcombine.low %v1248_v55, %v1252_v56  ;;  %v1288_v36 = vld [vmem:[#allocation15 + $0x1d0] sm:$0xff] }
 0x406   :  { %v1134_v59 = vrot.slane %v1128_v58, %v5957_v2  ;;  %v1138_v60 = vrot.slane %v1128_v58, %v5960_v4  ;;  %v1142_v61 = vrot.slane %v1128_v58, %v6021_v29  ;;  %v1146_v3 = vrot.slane %v1128_v58, %v6026_v31 }
 0x407   :  { %v4668_v58 = vcombine.low %v1240_v42, %v1244_v43  ;;  %v1295_v42 = vld [vmem:[#allocation15 + $0x208] sm:$0xff] }
 0x408   :  { %v1151_v12 = vmul.f32 %v1134_v59, %v6014_v26  ;;  %v1152_v13 = vmul.f32 %v1138_v60, %v6016_v27  ;;  %v1153_v16 = vmul.f32 %v1142_v61, %v1052_v6  ;;  %v1154_v10 = vmul.f32 %v1146_v3, %v1053_v11  ;;  %v1299_v43 = vld [vmem:[#allocation15 + $0x228] sm:$0xff] }
 0x409   :  { %v1188_v8 = vmul.f32 %v1146_v3, %v6032_v41  ;;  %v1187_v17 = vmul.f32 %v1142_v61, %v6030_v38  ;;  %v1186_v6 = vmul.f32 %v1138_v60, %v6008_v15  ;;  %v1185_v41 = vmul.f32 %v1134_v59, %v6005_v14  ;;  %v1255_v61 = vld [vmem:[#allocation15 + $0xc8] sm:$0xff] }
 0x40a   :  { %v1159_v18 = vcombine.low %v1151_v12, %v1152_v13  ;;  %v1160_v19 = vcombine.low %v1153_v16, %v1154_v10  ;;  %v4675_v59 = vcombine.high %v1247_v50, %v1251_v54  ;;  %v4677_v60 = vcombine.high %v1248_v55, %v1252_v56  ;;  %v1259_v3 = vld [vmem:[#allocation15 + $0xe8] sm:$0xff]  ;;  %v1256_v12 = vld [vmem:[#allocation15 + $0xd0] sm:$0xff] }
 0x40b   :  { %v1260_v13 = vld [vmem:[#allocation15 + $0xf0] sm:$0xff]  ;;  %v4683_v0 = vcombine.high %v1255_v61, %v1259_v3  ;;  %v1303_v55 = vld [vmem:[#allocation15 + $0x248] sm:$0xff] }
 0x40c   :  { %v1167_v20 = vrot.slane %v1159_v18, %v5965_v51  ;;  %v1174_v21 = vrot.slane %v1160_v19, %v5965_v51  ;;  %v4685_v5 = vcombine.high %v1256_v12, %v1260_v13  ;;  %v1264_v16 = vld [vmem:[#allocation15 + $0x110] sm:$0xff]  ;;  %v1307_v56 = vld [vmem:[#allocation15 + $0x268] sm:$0xff] }
 0x40d   :  { %v1268_v10 = vld [vmem:[#allocation15 + $0x130] sm:$0xff] }
 0x40e   :  { %v1175_v22 = vcombine.low %v1167_v20, %v1174_v21  ;;  %v4693_v19 = vcombine.high %v1264_v16, %v1268_v10  ;;  %v1271_v20 = vld [vmem:[#allocation15 + $0x148] sm:$0xff] }
 0x40f   :  { %v1275_v21 = vld [vmem:[#allocation15 + $0x168] sm:$0xff] }
 0x410   :  { %v1182_v26 = vrot.slane %v1175_v22, %v5965_v51  ;;  %v1272_v22 = vld [vmem:[#allocation15 + $0x150] sm:$0xff] }
 0x412   :  { %v1184_v27 = vsub.f32 %v1129_v23, %v1182_v26  ;;  %v1276_v23 = vld [vmem:[#allocation15 + $0x170] sm:$0xff] }
 0x414   :  { %v1205_v38 = vrot.slane %v1184_v27, %v6026_v31  ;;  %v1197_v11 = vrot.slane %v1184_v27, %v5960_v4  ;;  %v1193_v24 = vrot.slane %v1184_v27, %v5957_v2  ;;  %v1201_v25 = vrot.slane %v1184_v27, %v6021_v29 }
 0x415   :  { %v4692_v27 = vcombine.low %v1264_v16, %v1268_v10  ;;  %v1319_v16 = vld [vmem:[#allocation15 + $0x2c8] sm:$0xff] }
 0x416   :  { %v1213_v28 = vadd.f32 %v1205_v38, %v1188_v8  ;;  %v1211_v30 = vadd.f32 %v1197_v11, %v1186_v6  ;;  %v1210_v32 = vadd.f32 %v1193_v24, %v1185_v41  ;;  %v1212_v33 = vadd.f32 %v1201_v25, %v1187_v17  ;;  %v1279_v38 = vld [vmem:[#allocation15 + $0x188] sm:$0xff]  ;;  %v1280_v24 = vld [vmem:[#allocation15 + $0x190] sm:$0xff] }
 0x417   :  { %v4682_v8 = vcombine.low %v1255_v61, %v1259_v3  ;;  %v4684_v17 = vcombine.low %v1256_v12, %v1260_v13  ;;  %v4699_v6 = vcombine.high %v1271_v20, %v1275_v21  ;;  %v4701_v41 = vcombine.high %v1272_v22, %v1276_v23  ;;  %v1283_v11 = vld [vmem:[#allocation15 + $0x1a8] sm:$0xff]  ;;  %v1284_v25 = vld [vmem:[#allocation15 + $0x1b0] sm:$0xff] }
 0x418   :  { %vm1215_vm5 = vcmp.gt.f32.partialorder %v1211_v30, 0.0  ;;  %v1219_v34 = vmul.f32 0.2, %v1211_v30  ;;  %vm1217_vm6 = vcmp.gt.f32.partialorder %v1213_v28, 0.0  ;;  %v1221_v35 = vmul.f32 0.2, %v1213_v28 }
 0x419   :  { %vm1214_vm7 = vcmp.gt.f32.partialorder %v1210_v32, 0.0  ;;  %v1218_v15 = vmul.f32 0.2, %v1210_v32  ;;  %vm1216_vm8 = vcmp.gt.f32.partialorder %v1212_v33, 0.0  ;;  %v1220_v14 = vmul.f32 0.2, %v1212_v33 }
 0x41a   :  { %v1223_v37 = vsel %vm1215_vm5, %v1211_v30, %v1219_v34  ;;  %v1225_v39 = vsel %vm1217_vm6, %v1213_v28, %v1221_v35  ;;  %v4698_v28 = vcombine.low %v1271_v20, %v1275_v21  ;;  %v4700_v30 = vcombine.low %v1272_v22, %v1276_v23  ;;  %v1287_v34 = vld [vmem:[#allocation15 + $0x1c8] sm:$0xff] }
 0x41b   :  { %v6066_v44 = vpack.c.bf16 %v1223_v37, %v1223_v37  ;;  %v6068_v45 = vpack.c.bf16 %v1225_v39, %v1225_v39  ;;  %v1222_v46 = vsel %vm1214_vm7, %v1210_v32, %v1218_v15  ;;  %v1224_v47 = vsel %vm1216_vm8, %v1212_v33, %v1220_v14  ;;  %v1291_v35 = vld [vmem:[#allocation15 + $0x1e8] sm:$0xff]  ;;  %v1292_v15 = vld [vmem:[#allocation15 + $0x1f0] sm:$0xff] }
 0x41c   :  { %v6070_v48 = vpack.c.bf16 %v1222_v46, %v1222_v46  ;;  %v6072_v49 = vpack.c.bf16 %v1224_v47, %v1224_v47  ;;  %v4707_v32 = vcombine.high %v1279_v38, %v1283_v11  ;;  %v4709_v33 = vcombine.high %v1280_v24, %v1284_v25  ;;  %v1296_v46 = vld [vmem:[#allocation15 + $0x210] sm:$0xff]  ;;  %v1311_v12 = vld [vmem:[#allocation15 + $0x288] sm:$0xff] }
 0x41d   :  { %2840 = vmatprep.mubr.bf16.mxu1 %v6066_v44  ;;  %2881 = vmatprep.mubr.bf16.mxu0 %v6068_v45  ;;  %v4706_v14 = vcombine.low %v1279_v38, %v1283_v11  ;;  %v4708_v37 = vcombine.low %v1280_v24, %v1284_v25  ;;  %v4715_v39 = vcombine.high %v1287_v34, %v1291_v35  ;;  %v1300_v47 = vld [vmem:[#allocation15 + $0x230] sm:$0xff]  ;;  %v1315_v13 = vld [vmem:[#allocation15 + $0x2a8] sm:$0xff] }
 0x41e   :  { %2841 = vmatmul.mubr.bf16.vlgmr.msra.gmra.mrb[12].mxu1 %v6070_v48  ;;  %2882 = vmatmul.mubr.bf16.vlgmr.msra.gmra.mrb[4].mxu0 %v6072_v49  ;;  %v4717_v40 = vcombine.high %v1288_v36, %v1292_v15  ;;  %v4714_v50 = vcombine.low %v1287_v34, %v1291_v35  ;;  %v4725_v54 = vcombine.high %v1296_v46, %v1300_v47  ;;  %v1323_v10 = vld [vmem:[#allocation15 + $0x2e8] sm:$0xff] }
 0x41f   :  { %2891 = vmatpush1.bf16.msra.mxu1 %v4658_v7  ;;  %2973 = vmatpush1.bf16.msra.mxu0 %v4660_v9  ;;  %v1263_v7 = vld [vmem:[#allocation15 + $0x108] sm:$0xff]  ;;  %v4731_v61 = vcombine.high %v1303_v55, %v1307_v56  ;;  %v4747_v20 = vcombine.high %v1319_v16, %v1323_v10 }
 0x420   :  { %2922 = vmatprep.mubr.bf16.mxu1 %v6066_v44  ;;  %3004 = vmatprep.mubr.bf16.mxu0 %v6066_v44  ;;  %v1267_v9 = vld [vmem:[#allocation15 + $0x128] sm:$0xff] }
 0x421   :  { %2892 = vmatprep.subr.bf16.mxu1 %v4667_v52  ;;  %2974 = vmatprep.subr.bf16.mxu0 %v4669_v53  ;;  %v4691_v18 = vcombine.high %v1263_v7, %v1267_v9  ;;  %v4690_v26 = vcombine.low %v1263_v7, %v1267_v9  ;;  %v4716_v52 = vcombine.low %v1288_v36, %v1292_v15  ;;  %v1327_v22 = vld [vmem:[#allocation15 + $0x308] sm:$0xff] }
 0x422   :  { %v4723_v53 = vcombine.high %v1295_v42, %v1299_v43  ;;  %v4739_v7 = vcombine.high %v1311_v12, %v1315_v13  ;;  %v1331_v23 = vld [vmem:[#allocation15 + $0x328] sm:$0xff] }
 0x423   :  { %2893 = vmatpush1.bf16.msra.mxu1 %v4666_v57  ;;  %2975 = vmatpush1.bf16.msra.mxu0 %v4668_v58  ;;  %v1304_v57 = vld [vmem:[#allocation15 + $0x250] sm:$0xff]  ;;  %v4755_v38 = vcombine.high %v1327_v22, %v1331_v23  ;;  %v1335_v24 = vld [vmem:[#allocation15 + $0x348] sm:$0xff] }
 0x424   :  { %2894 = vmatprep.subr.bf16.mxu1 %v4675_v59  ;;  %2976 = vmatprep.subr.bf16.mxu0 %v4677_v60  ;;  %v1308_v58 = vld [vmem:[#allocation15 + $0x270] sm:$0xff]  ;;  %v4722_v59 = vcombine.low %v1295_v42, %v1299_v43  ;;  %v4724_v60 = vcombine.low %v1296_v46, %v1300_v47  ;;  %v1339_v25 = vld [vmem:[#allocation15 + $0x368] sm:$0xff] }
 0x425   :  { %v4733_v3 = vcombine.high %v1304_v57, %v1308_v58  ;;  %v4763_v34 = vcombine.high %v1335_v24, %v1339_v25  ;;  %v1343_v36 = vld [vmem:[#allocation15 + $0x388] sm:$0xff] }
 0x426   :  { %v1347_v15 = vld [vmem:[#allocation15 + $0x3a8] sm:$0xff] }
 0x427   :  { %2895 = vmatpush1.bf16.msra.mxu1 %v4674_v62  ;;  %2977 = vmatpush1.bf16.msra.mxu0 %v4676_v63  ;;  %v1312_v62 = vld [vmem:[#allocation15 + $0x290] sm:$0xff]  ;;  %v4771_v42 = vcombine.high %v1343_v36, %v1347_v15  ;;  %v1351_v46 = vld [vmem:[#allocation15 + $0x3c8] sm:$0xff] }
 0x428   :  { %2896 = vmatprep.subr.bf16.mxu1 %v4683_v0  ;;  %2978 = vmatprep.subr.bf16.mxu0 %v4685_v5  ;;  %v1316_v63 = vld [vmem:[#allocation15 + $0x2b0] sm:$0xff]  ;;  %v4730_v0 = vcombine.low %v1303_v55, %v1307_v56  ;;  %v4732_v5 = vcombine.low %v1304_v57, %v1308_v58  ;;  %v1355_v47 = vld [vmem:[#allocation15 + $0x3e8] sm:$0xff] }
 0x429   :  { %v4741_v9 = vcombine.high %v1312_v62, %v1316_v63  ;;  %v4779_v55 = vcombine.high %v1351_v46, %v1355_v47  ;;  %v1359_v57 = vld [vmem:[#allocation15 + $0x408] sm:$0xff] }
 0x42a   :  { %v1363_v58 = vld [vmem:[#allocation15 + $0x428] sm:$0xff] }
 0x42b   :  { %2897 = vmatpush1.bf16.msra.mxu1 %v4682_v8  ;;  %2979 = vmatpush1.bf16.msra.mxu0 %v4684_v17  ;;  %v1320_v8 = vld [vmem:[#allocation15 + $0x2d0] sm:$0xff] }
 0x42c   :  { %2898 = vmatprep.subr.bf16.mxu1 %v4691_v18  ;;  %2980 = vmatprep.subr.bf16.mxu0 %v4693_v19  ;;  %v1324_v17 = vld [vmem:[#allocation15 + $0x2f0] sm:$0xff]  ;;  %v4738_v18 = vcombine.low %v1311_v12, %v1315_v13  ;;  %v4740_v19 = vcombine.low %v1312_v62, %v1316_v63  ;;  %v4787_v12 = vcombine.high %v1359_v57, %v1363_v58  ;;  %v1367_v62 = vld [vmem:[#allocation15 + $0x448] sm:$0xff] }
 0x42d   :  { %v4749_v21 = vcombine.high %v1320_v8, %v1324_v17  ;;  %v1371_v63 = vld [vmem:[#allocation15 + $0x468] sm:$0xff] }
 0x42f   :  { %2899 = vmatpush1.bf16.msra.mxu1 %v4690_v26  ;;  %2981 = vmatpush1.bf16.msra.mxu0 %v4692_v27  ;;  %v1328_v26 = vld [vmem:[#allocation15 + $0x310] sm:$0xff] }
 0x430   :  { %2900 = vmatprep.subr.bf16.mxu1 %v4699_v6  ;;  %2982 = vmatprep.subr.bf16.mxu0 %v4701_v41  ;;  %v1332_v27 = vld [vmem:[#allocation15 + $0x330] sm:$0xff]  ;;  %v4746_v6 = vcombine.low %v1319_v16, %v1323_v10  ;;  %v4748_v41 = vcombine.low %v1320_v8, %v1324_v17  ;;  %v4795_v16 = vcombine.high %v1367_v62, %v1371_v63  ;;  %v1375_v8 = vld [vmem:[#allocation15 + $0x488] sm:$0xff] }
 0x431   :  { %v4757_v11 = vcombine.high %v1328_v26, %v1332_v27  ;;  %v1379_v17 = vld [vmem:[#allocation15 + $0x4a8] sm:$0xff] }
 0x433   :  { %2901 = vmatpush1.bf16.msra.mxu1 %v4698_v28  ;;  %2983 = vmatpush1.bf16.msra.mxu0 %v4700_v30  ;;  %v1336_v28 = vld [vmem:[#allocation15 + $0x350] sm:$0xff] }
 0x434   :  { %2902 = vmatprep.subr.bf16.mxu1 %v4707_v32  ;;  %2984 = vmatprep.subr.bf16.mxu0 %v4709_v33  ;;  %v1340_v30 = vld [vmem:[#allocation15 + $0x370] sm:$0xff]  ;;  %v4754_v32 = vcombine.low %v1327_v22, %v1331_v23  ;;  %v4756_v33 = vcombine.low %v1328_v26, %v1332_v27  ;;  %v4803_v22 = vcombine.high %v1375_v8, %v1379_v17  ;;  %v1383_v26 = vld [vmem:[#allocation15 + $0x4c8] sm:$0xff] }
 0x435   :  { %v4765_v35 = vcombine.high %v1336_v28, %v1340_v30  ;;  %v1387_v27 = vld [vmem:[#allocation15 + $0x4e8] sm:$0xff] }
 0x437   :  { %2903 = vmatpush1.bf16.msra.mxu1 %v4706_v14  ;;  %2985 = vmatpush1.bf16.msra.mxu0 %v4708_v37  ;;  %v1344_v14 = vld [vmem:[#allocation15 + $0x390] sm:$0xff] }
 0x438   :  { %2904 = vmatprep.subr.bf16.mxu1 %v4715_v39  ;;  %2986 = vmatprep.subr.bf16.mxu0 %v4717_v40  ;;  %v1348_v37 = vld [vmem:[#allocation15 + $0x3b0] sm:$0xff]  ;;  %v4762_v39 = vcombine.low %v1335_v24, %v1339_v25  ;;  %v4764_v40 = vcombine.low %v1336_v28, %v1340_v30  ;;  %v4811_v24 = vcombine.high %v1383_v26, %v1387_v27  ;;  %v1391_v28 = vld [vmem:[#allocation15 + $0x508] sm:$0xff] }
 0x439   :  { %v4773_v43 = vcombine.high %v1344_v14, %v1348_v37  ;;  %v1395_v30 = vld [vmem:[#allocation15 + $0x528] sm:$0xff] }
 0x43b   :  { %2905 = vmatpush1.bf16.msra.mxu1 %v4714_v50  ;;  %2987 = vmatpush1.bf16.msra.mxu0 %v4716_v52  ;;  %v1352_v50 = vld [vmem:[#allocation15 + $0x3d0] sm:$0xff] }
 0x43c   :  { %2906 = vmatprep.subr.bf16.mxu1 %v4723_v53  ;;  %2988 = vmatprep.subr.bf16.mxu0 %v4725_v54  ;;  %v1356_v52 = vld [vmem:[#allocation15 + $0x3f0] sm:$0xff]  ;;  %v4770_v53 = vcombine.low %v1343_v36, %v1347_v15  ;;  %v4772_v54 = vcombine.low %v1344_v14, %v1348_v37  ;;  %v4819_v36 = vcombine.high %v1391_v28, %v1395_v30  ;;  %v1399_v14 = vld [vmem:[#allocation15 + $0x548] sm:$0xff] }
 0x43d   :  { %v4781_v56 = vcombine.high %v1352_v50, %v1356_v52  ;;  %v1403_v37 = vld [vmem:[#allocation15 + $0x568] sm:$0xff] }
 0x43f   :  { %2907 = vmatpush1.bf16.msra.mxu1 %v4722_v59  ;;  %2989 = vmatpush1.bf16.msra.mxu0 %v4724_v60  ;;  %v1360_v59 = vld [vmem:[#allocation15 + $0x410] sm:$0xff] }
 0x440   :  { %2908 = vmatprep.subr.bf16.mxu1 %v4731_v61  ;;  %2990 = vmatprep.subr.bf16.mxu0 %v4733_v3  ;;  %v1364_v60 = vld [vmem:[#allocation15 + $0x430] sm:$0xff]  ;;  %v4778_v61 = vcombine.low %v1351_v46, %v1355_v47  ;;  %v4780_v3 = vcombine.low %v1352_v50, %v1356_v52  ;;  %v4827_v46 = vcombine.high %v1399_v14, %v1403_v37  ;;  %v1407_v50 = vld [vmem:[#allocation15 + $0x588] sm:$0xff] }
 0x441   :  { %v4789_v13 = vcombine.high %v1360_v59, %v1364_v60  ;;  %v1411_v52 = vld [vmem:[#allocation15 + $0x5a8] sm:$0xff] }
 0x443   :  { %2909 = vmatpush1.bf16.msra.mxu1 %v4730_v0  ;;  %2991 = vmatpush1.bf16.msra.mxu0 %v4732_v5  ;;  %v1368_v0 = vld [vmem:[#allocation15 + $0x450] sm:$0xff] }
 0x444   :  { %2910 = vmatprep.subr.bf16.mxu1 %v4739_v7  ;;  %2992 = vmatprep.subr.bf16.mxu0 %v4741_v9  ;;  %v1372_v5 = vld [vmem:[#allocation15 + $0x470] sm:$0xff]  ;;  %v4786_v7 = vcombine.low %v1359_v57, %v1363_v58  ;;  %v4788_v9 = vcombine.low %v1360_v59, %v1364_v60  ;;  %v4835_v57 = vcombine.high %v1407_v50, %v1411_v52  ;;  %v1415_v59 = vld [vmem:[#allocation15 + $0x5c8] sm:$0xff] }
 0x445   :  { %v4797_v10 = vcombine.high %v1368_v0, %v1372_v5  ;;  %v1419_v60 = vld [vmem:[#allocation15 + $0x5e8] sm:$0xff] }
 0x447   :  { %2911 = vmatpush1.bf16.msra.mxu1 %v4738_v18  ;;  %2993 = vmatpush1.bf16.msra.mxu0 %v4740_v19  ;;  %v1376_v18 = vld [vmem:[#allocation15 + $0x490] sm:$0xff] }
 0x448   :  { %2912 = vmatprep.subr.bf16.mxu1 %v4747_v20  ;;  %2994 = vmatprep.subr.bf16.mxu0 %v4749_v21  ;;  %v1380_v19 = vld [vmem:[#allocation15 + $0x4b0] sm:$0xff]  ;;  %v4794_v20 = vcombine.low %v1367_v62, %v1371_v63  ;;  %v4796_v21 = vcombine.low %v1368_v0, %v1372_v5  ;;  %v4843_v62 = vcombine.high %v1415_v59, %v1419_v60  ;;  %v1423_v0 = vld [vmem:[#allocation15 + $0x608] sm:$0xff] }
 0x449   :  { %v4805_v23 = vcombine.high %v1376_v18, %v1380_v19  ;;  %v1427_v5 = vld [vmem:[#allocation15 + $0x628] sm:$0xff] }
 0x44b   :  { %2913 = vmatpush1.bf16.msra.mxu1 %v4746_v6  ;;  %2995 = vmatpush1.bf16.msra.mxu0 %v4748_v41  ;;  %v1384_v6 = vld [vmem:[#allocation15 + $0x4d0] sm:$0xff] }
 0x44c   :  { %2914 = vmatprep.subr.bf16.mxu1 %v4755_v38  ;;  %2996 = vmatprep.subr.bf16.mxu0 %v4757_v11  ;;  %v1388_v41 = vld [vmem:[#allocation15 + $0x4f0] sm:$0xff]  ;;  %v4802_v38 = vcombine.low %v1375_v8, %v1379_v17  ;;  %v4804_v11 = vcombine.low %v1376_v18, %v1380_v19  ;;  %v4851_v8 = vcombine.high %v1423_v0, %v1427_v5  ;;  %v1431_v18 = vld [vmem:[#allocation15 + $0x648] sm:$0xff] }
 0x44d   :  { %v4813_v25 = vcombine.high %v1384_v6, %v1388_v41  ;;  %v1435_v19 = vld [vmem:[#allocation15 + $0x668] sm:$0xff] }
 0x44f   :  { %2915 = vmatpush1.bf16.msra.mxu1 %v4754_v32  ;;  %2997 = vmatpush1.bf16.msra.mxu0 %v4756_v33  ;;  %v1392_v32 = vld [vmem:[#allocation15 + $0x510] sm:$0xff] }
 0x450   :  { %2916 = vmatprep.subr.bf16.mxu1 %v4763_v34  ;;  %2998 = vmatprep.subr.bf16.mxu0 %v4765_v35  ;;  %v1396_v33 = vld [vmem:[#allocation15 + $0x530] sm:$0xff]  ;;  %v4810_v34 = vcombine.low %v1383_v26, %v1387_v27  ;;  %v4812_v35 = vcombine.low %v1384_v6, %v1388_v41  ;;  %v4859_v26 = vcombine.high %v1431_v18, %v1435_v19  ;;  %v1439_v6 = vld [vmem:[#allocation15 + $0x688] sm:$0xff] }
 0x451   :  { %v4821_v15 = vcombine.high %v1392_v32, %v1396_v33  ;;  %v1443_v41 = vld [vmem:[#allocation15 + $0x6a8] sm:$0xff] }
 0x453   :  { %2917 = vmatpush1.bf16.msra.mxu1 %v4762_v39  ;;  %2999 = vmatpush1.bf16.msra.mxu0 %v4764_v40  ;;  %v1400_v39 = vld [vmem:[#allocation15 + $0x550] sm:$0xff] }
 0x454   :  { %2918 = vmatprep.subr.bf16.mxu1 %v4771_v42  ;;  %3000 = vmatprep.subr.bf16.mxu0 %v4773_v43  ;;  %v1404_v40 = vld [vmem:[#allocation15 + $0x570] sm:$0xff]  ;;  %v4818_v42 = vcombine.low %v1391_v28, %v1395_v30  ;;  %v4820_v43 = vcombine.low %v1392_v32, %v1396_v33  ;;  %v4867_v28 = vcombine.high %v1439_v6, %v1443_v41  ;;  %v1447_v32 = vld [vmem:[#allocation15 + $0x6c8] sm:$0xff] }
 0x455   :  { %v4829_v47 = vcombine.high %v1400_v39, %v1404_v40  ;;  %v1451_v33 = vld [vmem:[#allocation15 + $0x6e8] sm:$0xff] }
 0x457   :  { %2919 = vmatpush1.bf16.msra.mxu1 %v4770_v53  ;;  %3001 = vmatpush1.bf16.msra.mxu0 %v4772_v54  ;;  %v1408_v53 = vld [vmem:[#allocation15 + $0x590] sm:$0xff] }
 0x458   :  { %2920 = vmatprep.subr.bf16.mxu1 %v4779_v55  ;;  %3002 = vmatprep.subr.bf16.mxu0 %v4781_v56  ;;  %v1412_v54 = vld [vmem:[#allocation15 + $0x5b0] sm:$0xff]  ;;  %v4826_v55 = vcombine.low %v1399_v14, %v1403_v37  ;;  %v4828_v56 = vcombine.low %v1400_v39, %v1404_v40  ;;  %v4875_v14 = vcombine.high %v1447_v32, %v1451_v33  ;;  %v1455_v39 = vld [vmem:[#allocation15 + $0x708] sm:$0xff] }
 0x459   :  { %v4837_v58 = vcombine.high %v1408_v53, %v1412_v54  ;;  %v1459_v40 = vld [vmem:[#allocation15 + $0x728] sm:$0xff] }
 0x45b   :  { %2921 = vmatpush1.bf16.msra.mxu1 %v4778_v61  ;;  %3003 = vmatpush1.bf16.msra.mxu0 %v4780_v3  ;;  %v1416_v61 = vld [vmem:[#allocation15 + $0x5d0] sm:$0xff] }
 0x45c   :  { %2931 = vmatprep.subr.bf16.mxu1 %v4787_v12  ;;  %3013 = vmatprep.subr.bf16.mxu0 %v4789_v13  ;;  %v1420_v3 = vld [vmem:[#allocation15 + $0x5f0] sm:$0xff]  ;;  %v4834_v12 = vcombine.low %v1407_v50, %v1411_v52  ;;  %v4836_v13 = vcombine.low %v1408_v53, %v1412_v54  ;;  %v4883_v50 = vcombine.high %v1455_v39, %v1459_v40  ;;  %v1463_v53 = vld [vmem:[#allocation15 + $0x748] sm:$0xff] }
 0x45d   :  { %v4845_v63 = vcombine.high %v1416_v61, %v1420_v3  ;;  %v1467_v54 = vld [vmem:[#allocation15 + $0x768] sm:$0xff] }
 0x45e   :  { %2923 = vmatmul.mubr.bf16.vlgmr.msra.gmra.mrb[16].mxu1 %v6070_v48  ;;  %3005 = vmatmul.mubr.bf16.vlgmr.msra.gmra.mrb[8].mxu0 %v6070_v48 }
 0x45f   :  { %2932 = vmatpush1.bf16.msra.mxu1 %v4786_v7  ;;  %2963 = vmatprep.mubr.bf16.mxu1 %v6068_v45  ;;  %v1424_v7 = vld [vmem:[#allocation15 + $0x610] sm:$0xff] }
 0x460   :  { %3014 = vmatpush1.bf16.msra.mxu0 %v4788_v9  ;;  %3045 = vmatprep.mubr.bf16.mxu0 %v6068_v45  ;;  %v1428_v9 = vld [vmem:[#allocation15 + $0x630] sm:$0xff] }
 0x461   :  { %2933 = vmatprep.subr.bf16.mxu1 %v4795_v16  ;;  %3015 = vmatprep.subr.bf16.mxu0 %v4797_v10  ;;  %v4842_v16 = vcombine.low %v1415_v59, %v1419_v60  ;;  %v4844_v10 = vcombine.low %v1416_v61, %v1420_v3  ;;  %v4853_v17 = vcombine.high %v1424_v7, %v1428_v9  ;;  %v1471_v61 = vld [vmem:[#allocation15 + $0x788] sm:$0xff] }
 0x462   :  { %v4891_v59 = vcombine.high %v1463_v53, %v1467_v54  ;;  %v1475_v3 = vld [vmem:[#allocation15 + $0x7a8] sm:$0xff] }
 0x463   :  { %2934 = vmatpush1.bf16.msra.mxu1 %v4794_v20  ;;  %v1432_v20 = vld [vmem:[#allocation15 + $0x650] sm:$0xff] }
 0x464   :  { %3016 = vmatpush1.bf16.msra.mxu0 %v4796_v21  ;;  %2935 = vmatprep.subr.bf16.mxu1 %v4803_v22  ;;  %v1436_v21 = vld [vmem:[#allocation15 + $0x670] sm:$0xff]  ;;  %v4850_v22 = vcombine.low %v1423_v0, %v1427_v5  ;;  %v4899_v0 = vcombine.high %v1471_v61, %v1475_v3 }
 0x465   :  { %3017 = vmatprep.subr.bf16.mxu0 %v4805_v23  ;;  %v4852_v23 = vcombine.low %v1424_v7, %v1428_v9  ;;  %v4861_v27 = vcombine.high %v1432_v20, %v1436_v21  ;;  %v1479_v7 = vld [vmem:[#allocation15 + $0x7c8] sm:$0xff] }
 0x466   :  { %v1483_v9 = vld [vmem:[#allocation15 + $0x7e8] sm:$0xff] }
 0x467   :  { %2936 = vmatpush1.bf16.msra.mxu1 %v4802_v38  ;;  %v1440_v38 = vld [vmem:[#allocation15 + $0x690] sm:$0xff] }
 0x468   :  { %3018 = vmatpush1.bf16.msra.mxu0 %v4804_v11  ;;  %2937 = vmatprep.subr.bf16.mxu1 %v4811_v24  ;;  %v1444_v11 = vld [vmem:[#allocation15 + $0x6b0] sm:$0xff]  ;;  %v4858_v24 = vcombine.low %v1431_v18, %v1435_v19  ;;  %v4907_v18 = vcombine.high %v1479_v7, %v1483_v9 }
 0x469   :  { %3019 = vmatprep.subr.bf16.mxu0 %v4813_v25  ;;  %v4860_v25 = vcombine.low %v1432_v20, %v1436_v21  ;;  %v4869_v30 = vcombine.high %v1440_v38, %v1444_v11  ;;  %v1233_v20 = vld [vmem:[#allocation15 + $0x18] sm:$0xff] }
 0x46a   :  { %v1237_v21 = vld [vmem:[#allocation15 + $0x38] sm:$0xff] }
 0x46b   :  { %2938 = vmatpush1.bf16.msra.mxu1 %v4810_v34  ;;  %v1448_v34 = vld [vmem:[#allocation15 + $0x6d0] sm:$0xff] }
 0x46c   :  { %3020 = vmatpush1.bf16.msra.mxu0 %v4812_v35  ;;  %2939 = vmatprep.subr.bf16.mxu1 %v4819_v36  ;;  %v1452_v35 = vld [vmem:[#allocation15 + $0x6f0] sm:$0xff]  ;;  %v4866_v36 = vcombine.low %v1439_v6, %v1443_v41  ;;  %v1245_v6 = vld [vmem:[#allocation15 + $0x78] sm:$0xff]  ;;  %v4662_v41 = vcombine.low %v1233_v20, %v1237_v21 }
 0x46d   :  { %3021 = vmatprep.subr.bf16.mxu0 %v4821_v15  ;;  %v4868_v15 = vcombine.low %v1440_v38, %v1444_v11  ;;  %v4877_v37 = vcombine.high %v1448_v34, %v1452_v35  ;;  %v1249_v11 = vld [vmem:[#allocation15 + $0x98] sm:$0xff] }
 0x46f   :  { %2940 = vmatpush1.bf16.msra.mxu1 %v4818_v42  ;;  %v1456_v42 = vld [vmem:[#allocation15 + $0x710] sm:$0xff] }
 0x470   :  { %3022 = vmatpush1.bf16.msra.mxu0 %v4820_v43  ;;  %2941 = vmatprep.subr.bf16.mxu1 %v4827_v46  ;;  %v1460_v43 = vld [vmem:[#allocation15 + $0x730] sm:$0xff]  ;;  %v4874_v46 = vcombine.low %v1447_v32, %v1451_v33  ;;  %v1261_v32 = vld [vmem:[#allocation15 + $0xf8] sm:$0xff] }
 0x471   :  { %3023 = vmatprep.subr.bf16.mxu0 %v4829_v47  ;;  %v4876_v47 = vcombine.low %v1448_v34, %v1452_v35  ;;  %v4885_v52 = vcombine.high %v1456_v42, %v1460_v43  ;;  %v1265_v35 = vld [vmem:[#allocation15 + $0x118] sm:$0xff] }
 0x473   :  { %2942 = vmatpush1.bf16.msra.mxu1 %v4826_v55  ;;  %v1464_v55 = vld [vmem:[#allocation15 + $0x750] sm:$0xff] }
 0x474   :  { %3024 = vmatpush1.bf16.msra.mxu0 %v4828_v56  ;;  %2943 = vmatprep.subr.bf16.mxu1 %v4835_v57  ;;  %v1468_v56 = vld [vmem:[#allocation15 + $0x770] sm:$0xff]  ;;  %v4882_v57 = vcombine.low %v1455_v39, %v1459_v40  ;;  %v1277_v39 = vld [vmem:[#allocation15 + $0x178] sm:$0xff] }
 0x475   :  { %3025 = vmatprep.subr.bf16.mxu0 %v4837_v58  ;;  %v4884_v58 = vcombine.low %v1456_v42, %v1460_v43  ;;  %v4893_v60 = vcombine.high %v1464_v55, %v1468_v56  ;;  %v1281_v42 = vld [vmem:[#allocation15 + $0x198] sm:$0xff] }
 0x476   :  { %v1285_v43 = vld [vmem:[#allocation15 + $0x1b8] sm:$0xff] }
 0x477   :  { %2944 = vmatpush1.bf16.msra.mxu1 %v4834_v12  ;;  %v1472_v12 = vld [vmem:[#allocation15 + $0x790] sm:$0xff] }
 0x478   :  { %3026 = vmatpush1.bf16.msra.mxu0 %v4836_v13  ;;  %2945 = vmatprep.subr.bf16.mxu1 %v4843_v62  ;;  %v1476_v13 = vld [vmem:[#allocation15 + $0x7b0] sm:$0xff]  ;;  %v4890_v62 = vcombine.low %v1463_v53, %v1467_v54  ;;  %v4710_v53 = vcombine.low %v1281_v42, %v1285_v43 }
 0x479   :  { %3027 = vmatprep.subr.bf16.mxu0 %v4845_v63  ;;  %v4892_v63 = vcombine.low %v1464_v55, %v1468_v56  ;;  %v4901_v5 = vcombine.high %v1472_v12, %v1476_v13  ;;  %v1297_v55 = vld [vmem:[#allocation15 + $0x218] sm:$0xff] }
 0x47a   :  { %v1301_v56 = vld [vmem:[#allocation15 + $0x238] sm:$0xff] }
 0x47b   :  { %2946 = vmatpush1.bf16.msra.mxu1 %v4842_v16  ;;  %v1480_v16 = vld [vmem:[#allocation15 + $0x7d0] sm:$0xff] }
 0x47c   :  { %3028 = vmatpush1.bf16.msra.mxu0 %v4844_v10  ;;  %2947 = vmatprep.subr.bf16.mxu1 %v4851_v8  ;;  %v1484_v10 = vld [vmem:[#allocation15 + $0x7f0] sm:$0xff]  ;;  %v4898_v8 = vcombine.low %v1471_v61, %v1475_v3  ;;  %v4726_v61 = vcombine.low %v1297_v55, %v1301_v56 }
 0x47d   :  { %3029 = vmatprep.subr.bf16.mxu0 %v4853_v17  ;;  %v4900_v17 = vcombine.low %v1472_v12, %v1476_v13  ;;  %v4909_v19 = vcombine.high %v1480_v16, %v1484_v10  ;;  %v1313_v12 = vld [vmem:[#allocation15 + $0x298] sm:$0xff] }
 0x47e   :  { %v1317_v13 = vld [vmem:[#allocation15 + $0x2b8] sm:$0xff] }
 0x47f   :  { %2948 = vmatpush1.bf16.msra.mxu1 %v4850_v22  ;;  %v4906_v22 = vcombine.low %v1479_v7, %v1483_v9  ;;  %v4742_v7 = vcombine.low %v1313_v12, %v1317_v13 }
 0x480   :  { %3030 = vmatpush1.bf16.msra.mxu0 %v4852_v23  ;;  %2949 = vmatprep.subr.bf16.mxu1 %v4859_v26  ;;  %v4908_v23 = vcombine.low %v1480_v16, %v1484_v10  ;;  %v4663_v26 = vcombine.high %v1233_v20, %v1237_v21  ;;  %v1329_v16 = vld [vmem:[#allocation15 + $0x318] sm:$0xff] }
 0x481   :  { %3031 = vmatprep.subr.bf16.mxu0 %v4861_v27  ;;  %v1241_v27 = vld [vmem:[#allocation15 + $0x58] sm:$0xff] }
 0x482   :  { %v4671_v38 = vcombine.high %v1241_v27, %v1245_v6  ;;  %v1333_v10 = vld [vmem:[#allocation15 + $0x338] sm:$0xff] }
 0x483   :  { %2950 = vmatpush1.bf16.msra.mxu1 %v4858_v24  ;;  %v1253_v24 = vld [vmem:[#allocation15 + $0xb8] sm:$0xff]  ;;  %v4758_v20 = vcombine.low %v1329_v16, %v1333_v10 }
 0x484   :  { %3032 = vmatpush1.bf16.msra.mxu0 %v4860_v25  ;;  %2951 = vmatprep.subr.bf16.mxu1 %v4867_v28  ;;  %v4670_v25 = vcombine.low %v1241_v27, %v1245_v6  ;;  %v4679_v28 = vcombine.high %v1249_v11, %v1253_v24  ;;  %v4678_v33 = vcombine.low %v1249_v11, %v1253_v24  ;;  %v1353_v6 = vld [vmem:[#allocation15 + $0x3d8] sm:$0xff] }
 0x485   :  { %3033 = vmatprep.subr.bf16.mxu0 %v4869_v30  ;;  %v1257_v30 = vld [vmem:[#allocation15 + $0xd8] sm:$0xff] }
 0x486   :  { %v4687_v34 = vcombine.high %v1257_v30, %v1261_v32  ;;  %v1361_v24 = vld [vmem:[#allocation15 + $0x418] sm:$0xff] }
 0x487   :  { %2952 = vmatpush1.bf16.msra.mxu1 %v4866_v36  ;;  %v1269_v36 = vld [vmem:[#allocation15 + $0x138] sm:$0xff] }
 0x488   :  { %3034 = vmatpush1.bf16.msra.mxu0 %v4868_v15  ;;  %2953 = vmatprep.subr.bf16.mxu1 %v4875_v14  ;;  %v4686_v15 = vcombine.low %v1257_v30, %v1261_v32  ;;  %v4695_v14 = vcombine.high %v1265_v35, %v1269_v36  ;;  %v4694_v40 = vcombine.low %v1265_v35, %v1269_v36  ;;  %v1369_v32 = vld [vmem:[#allocation15 + $0x458] sm:$0xff] }
 0x489   :  { %3035 = vmatprep.subr.bf16.mxu0 %v4877_v37  ;;  %v1273_v37 = vld [vmem:[#allocation15 + $0x158] sm:$0xff] }
 0x48a   :  { %v1377_v36 = vld [vmem:[#allocation15 + $0x498] sm:$0xff] }
 0x48b   :  { %2954 = vmatpush1.bf16.msra.mxu1 %v4874_v46  ;;  %v4702_v46 = vcombine.low %v1273_v37, %v1277_v39 }
 0x48c   :  { %3036 = vmatpush1.bf16.msra.mxu0 %v4876_v47  ;;  %2955 = vmatprep.subr.bf16.mxu1 %v4883_v50  ;;  %v4711_v47 = vcombine.high %v1281_v42, %v1285_v43  ;;  %v1289_v50 = vld [vmem:[#allocation15 + $0x1d8] sm:$0xff] }
 0x48d   :  { %3037 = vmatprep.subr.bf16.mxu0 %v4885_v52  ;;  %v1293_v52 = vld [vmem:[#allocation15 + $0x1f8] sm:$0xff] }
 0x48e   :  { %v4719_v54 = vcombine.high %v1289_v50, %v1293_v52  ;;  %v1393_v43 = vld [vmem:[#allocation15 + $0x518] sm:$0xff] }
 0x48f   :  { %2956 = vmatpush1.bf16.msra.mxu1 %v4882_v57  ;;  %v4718_v57 = vcombine.low %v1289_v50, %v1293_v52  ;;  %v1401_v52 = vld [vmem:[#allocation15 + $0x558] sm:$0xff] }
 0x490   :  { %3038 = vmatpush1.bf16.msra.mxu0 %v4884_v58  ;;  %2957 = vmatprep.subr.bf16.mxu1 %v4891_v59  ;;  %v4727_v58 = vcombine.high %v1297_v55, %v1301_v56  ;;  %v1305_v59 = vld [vmem:[#allocation15 + $0x258] sm:$0xff] }
 0x491   :  { %3039 = vmatprep.subr.bf16.mxu0 %v4893_v60  ;;  %v1309_v60 = vld [vmem:[#allocation15 + $0x278] sm:$0xff] }
 0x492   :  { %v4735_v3 = vcombine.high %v1305_v59, %v1309_v60  ;;  %v1409_v55 = vld [vmem:[#allocation15 + $0x598] sm:$0xff] }
 0x493   :  { %2958 = vmatpush1.bf16.msra.mxu1 %v4890_v62  ;;  %v4734_v62 = vcombine.low %v1305_v59, %v1309_v60  ;;  %v1413_v56 = vld [vmem:[#allocation15 + $0x5b8] sm:$0xff] }
 0x494   :  { %3040 = vmatpush1.bf16.msra.mxu0 %v4892_v63  ;;  %2959 = vmatprep.subr.bf16.mxu1 %v4899_v0  ;;  %v4743_v63 = vcombine.high %v1313_v12, %v1317_v13  ;;  %v1321_v0 = vld [vmem:[#allocation15 + $0x2d8] sm:$0xff]  ;;  %v4839_v60 = vcombine.high %v1409_v55, %v1413_v56 }
 0x495   :  { %3041 = vmatprep.subr.bf16.mxu0 %v4901_v5  ;;  %v1325_v5 = vld [vmem:[#allocation15 + $0x2f8] sm:$0xff] }
 0x496   :  { %v4751_v9 = vcombine.high %v1321_v0, %v1325_v5  ;;  %v1417_v12 = vld [vmem:[#allocation15 + $0x5d8] sm:$0xff] }
 0x497   :  { %2960 = vmatpush1.bf16.msra.mxu1 %v4898_v8  ;;  %v4750_v8 = vcombine.low %v1321_v0, %v1325_v5  ;;  %v1421_v13 = vld [vmem:[#allocation15 + $0x5f8] sm:$0xff] }
 0x498   :  { %3042 = vmatpush1.bf16.msra.mxu0 %v4900_v17  ;;  %2961 = vmatprep.subr.bf16.mxu1 %v4907_v18  ;;  %v4759_v17 = vcombine.high %v1329_v16, %v1333_v10  ;;  %v1337_v18 = vld [vmem:[#allocation15 + $0x358] sm:$0xff]  ;;  %v4838_v16 = vcombine.low %v1409_v55, %v1413_v56 }
 0x499   :  { %3043 = vmatprep.subr.bf16.mxu0 %v4909_v19  ;;  %v1341_v19 = vld [vmem:[#allocation15 + $0x378] sm:$0xff] }
 0x49a   :  { %v4767_v21 = vcombine.high %v1337_v18, %v1341_v19 }
 0x49b   :  { %2962 = vmatpush1.bf16.msra.mxu1 %v4906_v22  ;;  %v1345_v22 = vld [vmem:[#allocation15 + $0x398] sm:$0xff] }
 0x49c   :  { %3044 = vmatpush1.bf16.msra.mxu0 %v4908_v23  ;;  %3054 = vmatprep.subr.bf16.mxu1 %v4663_v26  ;;  %v1349_v23 = vld [vmem:[#allocation15 + $0x3b8] sm:$0xff]  ;;  %v4766_v26 = vcombine.low %v1337_v18, %v1341_v19  ;;  %v4847_v18 = vcombine.high %v1417_v12, %v1421_v13 }
 0x49d   :  { %v4775_v27 = vcombine.high %v1345_v22, %v1349_v23 }
 0x49e   :  { %2964 = vmatmul.mubr.bf16.vlgmr.msra.gmra.mrb[16].mxu1 %v6072_v49 }
 0x49f   :  { %3046 = vmatmul.mubr.bf16.vlgmr.msra.gmra.mrb[8].mxu0 %v6072_v49  ;;  %3055 = vmatpush1.bf16.msra.mxu1 %v4662_v41  ;;  %v1357_v41 = vld [vmem:[#allocation15 + $0x3f8] sm:$0xff] }
 0x4a0   :  { %3086 = vmatprep.mubr.bf16.mxu1 %v6066_v44  ;;  %3056 = vmatprep.subr.bf16.mxu1 %v4671_v38  ;;  %v4703_v44 = vcombine.high %v1273_v37, %v1277_v39  ;;  %v4774_v38 = vcombine.low %v1345_v22, %v1349_v23  ;;  %v4783_v11 = vcombine.high %v1353_v6, %v1357_v41  ;;  %v1385_v39 = vld [vmem:[#allocation15 + $0x4d8] sm:$0xff] }
 0x4a1   :  { %v4846_v22 = vcombine.low %v1417_v12, %v1421_v13  ;;  %v5255_v12 = vld [vmem:[#allocation17] ss:$8 sps:$4 sm:$0xff]   ;;  %v5260_v13 = vld [vmem:[#allocation17 + $0x14] ss:$8 sps:$4 sm:$0xff]  }
 0x4a3   :  { %3057 = vmatpush1.bf16.msra.mxu1 %v4670_v25  ;;  %v1365_v25 = vld [vmem:[#allocation15 + $0x438] sm:$0xff] }
 0x4a4   :  { %3058 = vmatprep.subr.bf16.mxu1 %v4679_v28  ;;  %v4782_v28 = vcombine.low %v1353_v6, %v1357_v41  ;;  %v4791_v30 = vcombine.high %v1361_v24, %v1365_v25 }
 0x4a7   :  { %3059 = vmatpush1.bf16.msra.mxu1 %v4678_v33  ;;  %v1373_v33 = vld [vmem:[#allocation15 + $0x478] sm:$0xff] }
 0x4a8   :  { %3060 = vmatprep.subr.bf16.mxu1 %v4687_v34  ;;  %v4790_v34 = vcombine.low %v1361_v24, %v1365_v25  ;;  %v4799_v35 = vcombine.high %v1369_v32, %v1373_v33 }
 0x4ab   :  { %3061 = vmatpush1.bf16.msra.mxu1 %v4686_v15  ;;  %v1381_v15 = vld [vmem:[#allocation15 + $0x4b8] sm:$0xff] }
 0x4ac   :  { %3062 = vmatprep.subr.bf16.mxu1 %v4695_v14  ;;  %v4798_v14 = vcombine.low %v1369_v32, %v1373_v33  ;;  %v4807_v37 = vcombine.high %v1377_v36, %v1381_v15 }
 0x4af   :  { %3063 = vmatpush1.bf16.msra.mxu1 %v4694_v40  ;;  %v1389_v40 = vld [vmem:[#allocation15 + $0x4f8] sm:$0xff] }
 0x4b0   :  { %3064 = vmatprep.subr.bf16.mxu1 %v4703_v44  ;;  %v4806_v44 = vcombine.low %v1377_v36, %v1381_v15  ;;  %v4815_v42 = vcombine.high %v1385_v39, %v1389_v40 }
 0x4b3   :  { %3065 = vmatpush1.bf16.msra.mxu1 %v4702_v46  ;;  %v1397_v46 = vld [vmem:[#allocation15 + $0x538] sm:$0xff] }
 0x4b4   :  { %3066 = vmatprep.subr.bf16.mxu1 %v4711_v47  ;;  %v4814_v47 = vcombine.low %v1385_v39, %v1389_v40  ;;  %v4823_v50 = vcombine.high %v1393_v43, %v1397_v46 }
 0x4b7   :  { %3067 = vmatpush1.bf16.msra.mxu1 %v4710_v53  ;;  %v4822_v53 = vcombine.low %v1393_v43, %v1397_v46 }
 0x4b8   :  { %3068 = vmatprep.subr.bf16.mxu1 %v4719_v54 }
 0x4bb   :  { %3069 = vmatpush1.bf16.msra.mxu1 %v4718_v57 }
 0x4bc   :  { %3070 = vmatprep.subr.bf16.mxu1 %v4727_v58 }
 0x4bf   :  { %3071 = vmatpush1.bf16.msra.mxu1 %v4726_v61 }
 0x4c0   :  { %3072 = vmatprep.subr.bf16.mxu1 %v4735_v3 }
 0x4c3   :  { %3073 = vmatpush1.bf16.msra.mxu1 %v4734_v62 }
 0x4c4   :  { %3074 = vmatprep.subr.bf16.mxu1 %v4743_v63 }
 0x4c7   :  { %3075 = vmatpush1.bf16.msra.mxu1 %v4742_v7 }
 0x4c8   :  { %3076 = vmatprep.subr.bf16.mxu1 %v4751_v9 }
 0x4cb   :  { %3077 = vmatpush1.bf16.msra.mxu1 %v4750_v8 }
 0x4cc   :  { %3078 = vmatprep.subr.bf16.mxu1 %v4759_v17 }
 0x4cf   :  { %3079 = vmatpush1.bf16.msra.mxu1 %v4758_v20  ;;  %v1425_v20 = vld [vmem:[#allocation15 + $0x618] sm:$0xff] }
 0x4d0   :  { %3080 = vmatprep.subr.bf16.mxu1 %v4767_v21  ;;  %v1429_v21 = vld [vmem:[#allocation15 + $0x638] sm:$0xff] }
 0x4d1   :  { %v4855_v23 = vcombine.high %v1425_v20, %v1429_v21  ;;  %v4854_v6 = vcombine.low %v1425_v20, %v1429_v21  ;;  %v5278_v20 = vld [vmem:[#allocation17 + $0x74] ss:$8 sps:$4 sm:$0xff]   ;;  %v5276_v21 = vld [vmem:[#allocation17 + $0x70] ss:$8 sps:$4 sm:$0xff]  }
 0x4d3   :  { %3081 = vmatpush1.bf16.msra.mxu1 %v4766_v26  ;;  %v1433_v26 = vld [vmem:[#allocation15 + $0x658] sm:$0xff] }
 0x4d4   :  { %3082 = vmatprep.subr.bf16.mxu1 %v4775_v27  ;;  %v1437_v27 = vld [vmem:[#allocation15 + $0x678] sm:$0xff] }
 0x4d5   :  { %v4863_v41 = vcombine.high %v1433_v26, %v1437_v27  ;;  %v4862_v24 = vcombine.low %v1433_v26, %v1437_v27  ;;  %v5284_v26 = vld [vmem:[#allocation17 + $0x94] ss:$8 sps:$4 sm:$0xff]   ;;  %v5282_v27 = vld [vmem:[#allocation17 + $0x90] ss:$8 sps:$4 sm:$0xff]  }
 0x4d7   :  { %3083 = vmatpush1.bf16.msra.mxu1 %v4774_v38  ;;  %v1441_v38 = vld [vmem:[#allocation15 + $0x698] sm:$0xff] }
 0x4d8   :  { %3084 = vmatprep.subr.bf16.mxu1 %v4783_v11  ;;  %v1445_v11 = vld [vmem:[#allocation15 + $0x6b8] sm:$0xff] }
 0x4d9   :  { %v4871_v25 = vcombine.high %v1441_v38, %v1445_v11  ;;  %v4870_v32 = vcombine.low %v1441_v38, %v1445_v11  ;;  %v5290_v38 = vld [vmem:[#allocation17 + $0xb4] ss:$8 sps:$4 sm:$0xff]   ;;  %v5288_v11 = vld [vmem:[#allocation17 + $0xb0] ss:$8 sps:$4 sm:$0xff]  }
 0x4db   :  { %3085 = vmatpush1.bf16.msra.mxu1 %v4782_v28  ;;  %v1449_v28 = vld [vmem:[#allocation15 + $0x6d8] sm:$0xff] }
 0x4dc   :  { %3095 = vmatprep.subr.bf16.mxu1 %v4791_v30  ;;  %v1453_v30 = vld [vmem:[#allocation15 + $0x6f8] sm:$0xff] }
 0x4dd   :  { %v4879_v33 = vcombine.high %v1449_v28, %v1453_v30  ;;  %v4878_v36 = vcombine.low %v1449_v28, %v1453_v30  ;;  %v5296_v28 = vld [vmem:[#allocation17 + $0xd4] ss:$8 sps:$4 sm:$0xff]   ;;  %v5294_v30 = vld [vmem:[#allocation17 + $0xd0] ss:$8 sps:$4 sm:$0xff]  }
 0x4de   :  { %3087 = vmatmul.mubr.bf16.vlgmr.msra.gmra.mrb[20].mxu1 %v6070_v48  ;;  %v1405_v48 = vld [vmem:[#allocation15 + $0x578] sm:$0xff] }
 0x4df   :  { %3096 = vmatpush1.bf16.msra.mxu1 %v4790_v34  ;;  %3127 = vmatprep.mubr.bf16.mxu1 %v6068_v45  ;;  %v6098_v45 = vld [vmem:[%s6309_s12] sm:$0xff]  ;;  %v4831_v54 = vcombine.high %v1401_v52, %v1405_v48  ;;  %v4830_v58 = vcombine.low %v1401_v52, %v1405_v48  ;;  %v1457_v34 = vld [vmem:[#allocation15 + $0x718] sm:$0xff] }
 0x4e0   :  { %3097 = vmatprep.subr.bf16.mxu1 %v4799_v35  ;;  %v1491_v57 = vrot.slane %v6098_v45, %v5957_v2  ;;  %v1495_v59 = vrot.slane %v6098_v45, %v5960_v4  ;;  %v1461_v35 = vld [vmem:[#allocation15 + $0x738] sm:$0xff] }
 0x4e1   :  { %v4887_v15 = vcombine.high %v1457_v34, %v1461_v35  ;;  %v4886_v39 = vcombine.low %v1457_v34, %v1461_v35  ;;  %v5302_v34 = vld [vmem:[#allocation17 + $0xf4] ss:$8 sps:$4 sm:$0xff]   ;;  %v1499_v35 = vrot.slane %v6098_v45, %v6021_v29 }
 0x4e3   :  { %3098 = vmatpush1.bf16.msra.mxu1 %v4798_v14  ;;  %v1465_v14 = vld [vmem:[#allocation15 + $0x758] sm:$0xff] }
 0x4e4   :  { %3099 = vmatprep.subr.bf16.mxu1 %v4807_v37  ;;  %v1469_v37 = vld [vmem:[#allocation15 + $0x778] sm:$0xff] }
 0x4e5   :  { %v4895_v40 = vcombine.high %v1465_v14, %v1469_v37  ;;  %v4894_v43 = vcombine.low %v1465_v14, %v1469_v37  ;;  %v1503_v14 = vrot.slane %v6098_v45, %v6026_v31  ;;  %v6125_v37 = vsub.s32 5, %v5954_v1 }
 0x4e7   :  { %3100 = vmatpush1.bf16.msra.mxu1 %v4806_v44  ;;  %v1473_v44 = vld [vmem:[#allocation15 + $0x798] sm:$0xff] }
 0x4e8   :  { %3101 = vmatprep.subr.bf16.mxu1 %v4815_v42  ;;  %v1477_v42 = vld [vmem:[#allocation15 + $0x7b8] sm:$0xff] }
 0x4e9   :  { %v4903_v46 = vcombine.high %v1473_v44, %v1477_v42  ;;  %v4902_v52 = vcombine.low %v1473_v44, %v1477_v42  ;;  %v1511_v42 = vrot.slane %v6098_v45, %v6125_v37 }
 0x4eb   :  { %3102 = vmatpush1.bf16.msra.mxu1 %v4814_v47  ;;  %v1481_v47 = vld [vmem:[#allocation15 + $0x7d8] sm:$0xff] }
 0x4ec   :  { %3103 = vmatprep.subr.bf16.mxu1 %v4823_v50  ;;  %v1485_v50 = vld [vmem:[#allocation15 + $0x7f8] sm:$0xff] }
 0x4ed   :  { %v4911_v48 = vcombine.high %v1481_v47, %v1485_v50 }
 0x4ef   :  { %3104 = vmatpush1.bf16.msra.mxu1 %v4822_v53  ;;  %v4910_v53 = vcombine.low %v1481_v47, %v1485_v50 }
 0x4f0   :  { %3105 = vmatprep.subr.bf16.mxu1 %v4831_v54 }
 0x4f1   :  { %v2842_v61 = vpop.f32.mrb[12].mxu1  ;;  %v2883_v3 = vpop.f32.mrb[4].mxu0 }
 0x4f2   :  { %v2843_v62 = vadd.f32 %v2842_v61, %v1491_v57  ;;  %v2844_v63 = vpop.f32.mrb[13].mxu1  ;;  %v2885_v0 = vpop.f32.mrb[5].mxu0 }
 0x4f3   :  { %v2845_v5 = vadd.f32 %v2844_v63, %v1495_v59  ;;  %3106 = vmatpush1.bf16.msra.mxu1 %v4830_v58  ;;  %v2846_v7 = vpop.f32.mrb[14].mxu1  ;;  %v2887_v9 = vpop.f32.mrb[6].mxu0  ;;  %v5261_v63 = vld [vmem:[#allocation17 + $0x20] ss:$8 sps:$4 sm:$0xff]  }
 0x4f4   :  { %v6104_v10 = vadd.f32 %v2883_v3, %v2843_v62  ;;  %v2847_v8 = vpop.f32.mrb[15].mxu1  ;;  %v2888_v17 = vpop.f32.mrb[7].mxu0  ;;  %3107 = vmatprep.subr.bf16.mxu1 %v4839_v60  ;;  %v5257_v3 = vld [vmem:[#allocation17 + $0x4] ss:$8 sps:$4 sm:$0xff]   ;;  %v5258_v62 = vld [vmem:[#allocation17 + $0x10] ss:$8 sps:$4 sm:$0xff]  }
 0x4f5   :  { %v6106_v19 = vadd.f32 %v2885_v0, %v2845_v5  ;;  %4378 = vmatprep.subr.bf16.mxu0 %v5257_v3  ;;  %v5266_v0 = vld [vmem:[#allocation17 + $0x34] ss:$8 sps:$4 sm:$0xff]   ;;  %v5264_v5 = vld [vmem:[#allocation17 + $0x30] ss:$8 sps:$4 sm:$0xff]   ;;  %v5269_v7 = vld [vmem:[#allocation17 + $0x44] ss:$8 sps:$4 sm:$0xff]  }
 0x4f6   :  { %4379 = vmatpush1.bf16.msra.mxu0 %v5255_v12  ;;  %v5267_v9 = vld [vmem:[#allocation17 + $0x40] ss:$8 sps:$4 sm:$0xff]   ;;  %v5270_v8 = vld [vmem:[#allocation17 + $0x50] ss:$8 sps:$4 sm:$0xff]   ;;  %v5275_v17 = vld [vmem:[#allocation17 + $0x64] ss:$8 sps:$4 sm:$0xff]  }
 0x4f7   :  { %3108 = vmatpush1.bf16.msra.mxu1 %v4838_v16  ;;  %4380 = vmatprep.subr.bf16.mxu0 %v5260_v13  ;;  %v5272_v16 = vld [vmem:[#allocation17 + $0x54] ss:$8 sps:$4 sm:$0xff]  }
 0x4f8   :  { %3109 = vmatprep.subr.bf16.mxu1 %v4847_v18  ;;  %v5273_v18 = vld [vmem:[#allocation17 + $0x60] ss:$8 sps:$4 sm:$0xff]  }
 0x4fa   :  { %4381 = vmatpush1.bf16.msra.mxu0 %v5258_v62 }
 0x4fb   :  { %3110 = vmatpush1.bf16.msra.mxu1 %v4846_v22  ;;  %v5281_v22 = vld [vmem:[#allocation17 + $0x84] ss:$8 sps:$4 sm:$0xff]  }
 0x4fc   :  { %3111 = vmatprep.subr.bf16.mxu1 %v4855_v23  ;;  %v5279_v23 = vld [vmem:[#allocation17 + $0x80] ss:$8 sps:$4 sm:$0xff]  }
 0x4ff   :  { %3112 = vmatpush1.bf16.msra.mxu1 %v4854_v6  ;;  %v5287_v6 = vld [vmem:[#allocation17 + $0xa4] ss:$8 sps:$4 sm:$0xff]  }
 0x500   :  { %3113 = vmatprep.subr.bf16.mxu1 %v4863_v41  ;;  %v5285_v41 = vld [vmem:[#allocation17 + $0xa0] ss:$8 sps:$4 sm:$0xff]  }
 0x503   :  { %3114 = vmatpush1.bf16.msra.mxu1 %v4862_v24  ;;  %v5293_v24 = vld [vmem:[#allocation17 + $0xc4] ss:$8 sps:$4 sm:$0xff]  }
 0x504   :  { %3115 = vmatprep.subr.bf16.mxu1 %v4871_v25  ;;  %v5291_v25 = vld [vmem:[#allocation17 + $0xc0] ss:$8 sps:$4 sm:$0xff]  }
 0x507   :  { %3116 = vmatpush1.bf16.msra.mxu1 %v4870_v32  ;;  %v5299_v32 = vld [vmem:[#allocation17 + $0xe4] ss:$8 sps:$4 sm:$0xff]  }
 0x508   :  { %3117 = vmatprep.subr.bf16.mxu1 %v4879_v33  ;;  %v5297_v33 = vld [vmem:[#allocation17 + $0xe0] ss:$8 sps:$4 sm:$0xff]  }
 0x50b   :  { %3118 = vmatpush1.bf16.msra.mxu1 %v4878_v36  ;;  %v6120_v36 = vsub.s32 4, %v5954_v1 }
 0x50c   :  { %3119 = vmatprep.subr.bf16.mxu1 %v4887_v15  ;;  %v5300_v15 = vld [vmem:[#allocation17 + $0xf0] ss:$8 sps:$4 sm:$0xff]  }
 0x50f   :  { %3120 = vmatpush1.bf16.msra.mxu1 %v4886_v39 }
 0x510   :  { %3121 = vmatprep.subr.bf16.mxu1 %v4895_v40  ;;  %v1507_v40 = vrot.slane %v6098_v45, %v6120_v36 }
 0x513   :  { %3122 = vmatpush1.bf16.msra.mxu1 %v4894_v43  ;;  %v5305_v43 = vld [vmem:[#allocation17 + $0x104] ss:$8 sps:$4 sm:$0xff]  }
 0x514   :  { %3123 = vmatprep.subr.bf16.mxu1 %v4903_v46 }
 0x517   :  { %3124 = vmatpush1.bf16.msra.mxu1 %v4902_v52 }
 0x518   :  { %3125 = vmatprep.subr.bf16.mxu1 %v4911_v48  ;;  %v3136_v48 = vrot.slane %v6104_v10, 4 }
 0x51b   :  { %3126 = vmatpush1.bf16.msra.mxu1 %v4910_v53  ;;  %v3142_v53 = vrot.slane %v6106_v19, 4 }
 0x51e   :  { %3128 = vmatmul.mubr.bf16.vlgmr.msra.gmra.mrb[20].mxu1 %v6072_v49  ;;  %v5263_v49 = vld [vmem:[#allocation17 + $0x24] ss:$8 sps:$4 sm:$0xff]  }
 0x51f   :  { %4382 = vmatprep.subr.bf16.mxu0 %v5263_v49 }
 0x520   :  { %4383 = vmatpush1.bf16.msra.mxu0 %v5261_v63 }
 0x521   :  { %4384 = vmatprep.subr.bf16.mxu0 %v5266_v0 }
 0x524   :  { %4385 = vmatpush1.bf16.msra.mxu0 %v5264_v5 }
 0x525   :  { %4386 = vmatprep.subr.bf16.mxu0 %v5269_v7 }
 0x528   :  { %4387 = vmatpush1.bf16.msra.mxu0 %v5267_v9 }
 0x529   :  { %4388 = vmatprep.subr.bf16.mxu0 %v5272_v16 }
 0x52c   :  { %4389 = vmatpush1.bf16.msra.mxu0 %v5270_v8 }
 0x52d   :  { %4390 = vmatprep.subr.bf16.mxu0 %v5275_v17 }
 0x530   :  { %4391 = vmatpush1.bf16.msra.mxu0 %v5273_v18 }
 0x531   :  { %4392 = vmatprep.subr.bf16.mxu0 %v5278_v20 }
 0x534   :  { %4393 = vmatpush1.bf16.msra.mxu0 %v5276_v21 }
 0x535   :  { %4394 = vmatprep.subr.bf16.mxu0 %v5281_v22 }
 0x538   :  { %4395 = vmatpush1.bf16.msra.mxu0 %v5279_v23 }
 0x539   :  { %4396 = vmatprep.subr.bf16.mxu0 %v5284_v26 }
 0x53c   :  { %4397 = vmatpush1.bf16.msra.mxu0 %v5282_v27 }
 0x53d   :  { %4398 = vmatprep.subr.bf16.mxu0 %v5287_v6 }
 0x540   :  { %4399 = vmatpush1.bf16.msra.mxu0 %v5285_v41 }
 0x541   :  { %4400 = vmatprep.subr.bf16.mxu0 %v5290_v38 }
 0x544   :  { %4401 = vmatpush1.bf16.msra.mxu0 %v5288_v11 }
 0x545   :  { %4402 = vmatprep.subr.bf16.mxu0 %v5293_v24 }
 0x548   :  { %4403 = vmatpush1.bf16.msra.mxu0 %v5291_v25 }
 0x549   :  { %4404 = vmatprep.subr.bf16.mxu0 %v5296_v28 }
 0x54c   :  { %4405 = vmatpush1.bf16.msra.mxu0 %v5294_v30 }
 0x54d   :  { %4406 = vmatprep.subr.bf16.mxu0 %v5299_v32 }
 0x550   :  { %4407 = vmatpush1.bf16.msra.mxu0 %v5297_v33 }
 0x551   :  { %4408 = vmatprep.subr.bf16.mxu0 %v5302_v34 }
 0x554   :  { %4409 = vmatpush1.bf16.msra.mxu0 %v5300_v15 }
 0x555   :  { %4419 = vmatprep.subr.bf16.mxu0 %v5305_v43  ;;  %v6178_v43 = vsub.s32 6, %v5954_v1 }
 0x571   :  { %v6109_v54 = vpop.f32.mrb[16].mxu1 }
 0x572   :  { %v6111_v55 = vpop.f32.mrb[8].mxu0  ;;  %v6113_v56 = vpop.f32.mrb[17].mxu1  ;;  %v6128_v39 = vadd.f32 %v6109_v54, %v1499_v35 }
 0x573   :  { %v6115_v57 = vpop.f32.mrb[9].mxu0  ;;  %v2969_v58 = vpop.f32.mrb[18].mxu1  ;;  %v6133_v44 = vadd.f32 %v6113_v56, %v1503_v14  ;;  %v6139_v47 = vadd.f32 %v6111_v55, %v1507_v40  ;;  %v3137_v55 = vadd.f32 %v3136_v48, %v6104_v10  ;;  %v6183_v48 = vsub.s32 7, %v5954_v1 }
 0x574   :  { %v3051_v59 = vpop.f32.mrb[10].mxu0  ;;  %v2970_v60 = vpop.f32.mrb[19].mxu1  ;;  %v3148_v46 = vrot.slane %v6128_v39, 4  ;;  %v6143_v52 = vadd.f32 %v6115_v57, %v1511_v42 }
 0x575   :  { %v3052_v61 = vpop.f32.mrb[11].mxu0  ;;  %v3154_v50 = vrot.slane %v6133_v44, 4  ;;  %v3160_v56 = vrot.slane %v6139_v47, 4  ;;  %v3143_v60 = vadd.f32 %v3142_v53, %v6106_v19  ;;  %v3138_v13 = vrot.slane %v3137_v55, 2 }
 0x576   :  { %v3149_v54 = vadd.f32 %v6128_v39, %v3148_v46  ;;  %v3166_v59 = vrot.slane %v6143_v52, 4 }
 0x577   :  { %v3155_v58 = vadd.f32 %v6133_v44, %v3154_v50  ;;  %v3161_v57 = vadd.f32 %v6139_v47, %v3160_v56  ;;  %v3144_v62 = vrot.slane %v3143_v60, 2  ;;  %v3139_v7 = vadd.f32 %v3138_v13, %v3137_v55 }
 0x578   :  { %v3150_v61 = vrot.slane %v3149_v54, 2  ;;  %v3167_v12 = vadd.f32 %v6143_v52, %v3166_v59  ;;  %v1515_v59 = vrot.slane %v6098_v45, %v6178_v43 }
 0x579   :  { %v3156_v3 = vrot.slane %v3155_v58, 2  ;;  %v3162_v63 = vrot.slane %v3161_v57, 2  ;;  %v3145_v9 = vadd.f32 %v3144_v62, %v3143_v60  ;;  %v3140_v20 = vrot.slane %v3139_v7, 1 }
 0x57a   :  { %v3151_v49 = vadd.f32 %v3150_v61, %v3149_v54  ;;  %v3168_v5 = vrot.slane %v3167_v12, 2  ;;  %v1519_v61 = vrot.slane %v6098_v45, %v6183_v48 }
 0x57b   :  { %v3157_v0 = vadd.f32 %v3156_v3, %v3155_v58  ;;  %v3163_v8 = vadd.f32 %v3162_v63, %v3161_v57  ;;  %v3146_v21 = vrot.slane %v3145_v9, 1  ;;  %v3141_v6 = vadd.f32 %v3140_v20, %v3139_v7 }
 0x57c   :  { %v3152_v16 = vrot.slane %v3151_v49, 1  ;;  %v3169_v18 = vadd.f32 %v3168_v5, %v3167_v12 }
 0x57d   :  { %v3158_v17 = vrot.slane %v3157_v0, 1  ;;  %v3164_v23 = vrot.slane %v3163_v8, 1  ;;  %v3147_v41 = vadd.f32 %v3146_v21, %v3145_v9  ;;  %v6159_v28 = vmul.f32 0.125, %v3141_v6 }
 0x57e   :  { %v3153_v22 = vadd.f32 %v3152_v16, %v3151_v49  ;;  %v3170_v27 = vrot.slane %v3169_v18, 1 }
 0x57f   :  { %v3159_v26 = vadd.f32 %v3158_v17, %v3157_v0  ;;  %v3165_v11 = vadd.f32 %v3164_v23, %v3163_v8  ;;  %v6161_v30 = vmul.f32 0.125, %v3147_v41  ;;  %v3192_v15 = vsub.f32 %v6104_v10, %v6159_v28 }
 0x580   :  { %v6155_v38 = vmul.f32 0.125, %v3153_v22  ;;  %v3171_v25 = vadd.f32 %v3170_v27, %v3169_v18 }
 0x581   :  { %v6157_v24 = vmul.f32 0.125, %v3159_v26  ;;  %v6165_v33 = vmul.f32 0.125, %v3165_v11  ;;  %v3193_v14 = vsub.f32 %v6106_v19, %v6161_v30  ;;  %v3200_v53 = vmul.f32 %v3192_v15, %v3192_v15 }
 0x582   :  { %v3194_v32 = vsub.f32 %v6128_v39, %v6155_v38  ;;  %v6169_v35 = vmul.f32 0.125, %v3171_v25 }
 0x583   :  { %v3195_v34 = vsub.f32 %v6133_v44, %v6157_v24  ;;  %v3196_v42 = vsub.f32 %v6139_v47, %v6165_v33  ;;  %v3201_v54 = vmul.f32 %v3193_v14, %v3193_v14  ;;  %v3208_v57 = vrot.slane %v3200_v53, 4 }
 0x584   :  { %v3202_v40 = vmul.f32 %v3194_v32, %v3194_v32  ;;  %v3197_v50 = vsub.f32 %v6143_v52, %v6169_v35 }
 0x585   :  { %v3203_v46 = vmul.f32 %v3195_v34, %v3195_v34  ;;  %v3204_v58 = vmul.f32 %v3196_v42, %v3196_v42  ;;  %v3214_v3 = vrot.slane %v3201_v54, 4  ;;  %v3209_v9 = vadd.f32 %v3208_v57, %v3200_v53 }
 0x586   :  { %v3220_v56 = vrot.slane %v3202_v40, 4  ;;  %v3205_v60 = vmul.f32 %v3197_v50, %v3197_v50 }
 0x587   :  { %v3226_v55 = vrot.slane %v3203_v46, 4  ;;  %v3232_v62 = vrot.slane %v3204_v58, 4  ;;  %v3215_v17 = vadd.f32 %v3214_v3, %v3201_v54  ;;  %v3210_v27 = vrot.slane %v3209_v9, 2 }
 0x588   :  { %v3221_v13 = vadd.f32 %v3220_v56, %v3202_v40  ;;  %v3238_v0 = vrot.slane %v3205_v60, 4 }
 0x589   :  { %v3227_v63 = vadd.f32 %v3226_v55, %v3203_v46  ;;  %v3233_v20 = vadd.f32 %v3232_v62, %v3204_v58  ;;  %v3216_v41 = vrot.slane %v3215_v17, 2  ;;  %v3211_v42 = vadd.f32 %v3210_v27, %v3209_v9 }
 0x58a   :  { %v3222_v18 = vrot.slane %v3221_v13, 2  ;;  %v3239_v23 = vadd.f32 %v3238_v0, %v3205_v60 }
 0x58b   :  { %v3228_v22 = vrot.slane %v3227_v63, 2  ;;  %v3234_v32 = vrot.slane %v3233_v20, 2  ;;  %v3217_v50 = vadd.f32 %v3216_v41, %v3215_v17 }
 0x58c   :  { %v3223_v25 = vadd.f32 %v3222_v18, %v3221_v13  ;;  %v3240_v14 = vrot.slane %v3239_v23, 2 }
 0x58d   :  { %v3229_v15 = vadd.f32 %v3228_v22, %v3227_v63  ;;  %v3235_v56 = vadd.f32 %v3234_v32, %v3233_v20  ;;  %v3218_v3 = vrot.slane %v3217_v50, 1 }
 0x58e   :  { %v3224_v54 = vrot.slane %v3223_v25, 1  ;;  %v3241_v55 = vadd.f32 %v3240_v14, %v3239_v23 }
 0x58f   :  { %v3236_v62 = vrot.slane %v3235_v56, 1 }
 0x590   :  { %v3225_v13 = vadd.f32 %v3224_v54, %v3223_v25  ;;  %v3242_v0 = vrot.slane %v3241_v55, 1 }
 0x591   :  { %v3237_v18 = vadd.f32 %v3236_v62, %v3235_v56 }
 0x592   :  { %v3243_v22 = vadd.f32 %v3242_v0, %v3241_v55 }
 0x593   :  { %v3260_v25 = vmul.f32 0.125, %v3237_v18 }
 0x5f1   :  { %v3129_v12 = vpop.f32.mrb[20].mxu1 }
 0x5f2   :  { %v6189_v49 = vadd.f32 %v3129_v12, %v1515_v59  ;;  %v3131_v1 = vpop.f32.mrb[21].mxu1  ;;  %v3230_v59 = vrot.slane %v3229_v15, 1 }
 0x5f3   :  { %v6191_v5 = vadd.f32 %v3131_v1, %v1519_v61  ;;  %v3133_v7 = vpop.f32.mrb[22].mxu1  ;;  %v3212_v61 = vrot.slane %v3211_v42, 1 }
 0x5f4   :  { %v3172_v16 = vrot.slane %v6189_v49, 4  ;;  %v3134_v8 = vpop.f32.mrb[23].mxu1  ;;  %v3231_v63 = vadd.f32 %v3230_v59, %v3229_v15  ;;  %v3261_v15 = vmul.f32 0.125, %v3243_v22 }
 0x5f5   :  { %v3178_v45 = vrot.slane %v6191_v5, 4  ;;  %v3213_v9 = vadd.f32 %v3212_v61, %v3211_v42  ;;  %v3219_v8 = vadd.f32 %v3218_v3, %v3217_v50 }
 0x5f6   :  { %v3173_v21 = vadd.f32 %v6189_v49, %v3172_v16  ;;  %v3270_v56 = vadd.f32 0.8, %v3261_v15 }
 0x5f7   :  { %v3179_v26 = vadd.f32 %v6191_v5, %v3178_v45  ;;  %v3258_v45 = vmul.f32 0.125, %v3225_v13 }
 0x5f8   :  { %v3174_v6 = vrot.slane %v3173_v21, 2 }
 0x5f9   :  { %v3180_v11 = vrot.slane %v3179_v26, 2 }
 0x5fa   :  { %v3175_v34 = vadd.f32 %v3174_v6, %v3173_v21  ;;  %v3259_v21 = vmul.f32 0.125, %v3231_v63  ;;  %v3257_v6 = vmul.f32 0.125, %v3219_v8 }
 0x5fb   :  { %v3181_v40 = vadd.f32 %v3180_v11, %v3179_v26  ;;  %v3256_v26 = vmul.f32 0.125, %v3213_v9  ;;  %v3267_v11 = vadd.f32 0.8, %v3258_v45 }
 0x5fc   :  { %v3176_v46 = vrot.slane %v3175_v34, 1 }
 0x5fd   :  { %v3182_v53 = vrot.slane %v3181_v40, 1  ;;  %5459 = vrsqrt.f32 %v3267_v11 }
 0x5fe   :  { %v3177_v58 = vadd.f32 %v3176_v46, %v3175_v34  ;;  %v3268_v34 = vadd.f32 0.8, %v3259_v21  ;;  %v3266_v46 = vadd.f32 0.8, %v3257_v6 }
 0x5ff   :  { %v3183_v60 = vadd.f32 %v3182_v53, %v3181_v40  ;;  %v3265_v40 = vadd.f32 0.8, %v3256_v26  ;;  %v3269_v53 = vadd.f32 0.8, %v3260_v25  ;;  %v3264_v25 = vld [vmem:[%s6310_s13] sm:$0xff] }
 0x600   :  { %v6197_v57 = vmul.f32 0.125, %v3177_v58  ;;  %5461 = vrsqrt.f32 %v3268_v34 }
 0x601   :  { %v6199_v12 = vmul.f32 0.125, %v3183_v60  ;;  %5463 = vrsqrt.f32 %v3265_v40 }
 0x602   :  { %v3198_v1 = vsub.f32 %v6189_v49, %v6197_v57  ;;  %5465 = vrsqrt.f32 %v3266_v46 }
 0x603   :  { %v3199_v7 = vsub.f32 %v6191_v5, %v6199_v12  ;;  %5467 = vrsqrt.f32 %v3269_v53 }
 0x604   :  { %v3206_v16 = vmul.f32 %v3198_v1, %v3198_v1  ;;  %5469 = vrsqrt.f32 %v3270_v56 }
 0x605   :  { %v3207_v17 = vmul.f32 %v3199_v7, %v3199_v7 }
 0x606   :  { %v3244_v20 = vrot.slane %v3206_v16, 4 }
 0x607   :  { %v3250_v23 = vrot.slane %v3207_v17, 4  ;;  %v5460_v62 = vpop.eup %5459 }
 0x608   :  { %v3245_v27 = vadd.f32 %v3244_v20, %v3206_v16 }
 0x609   :  { %v3251_v41 = vadd.f32 %v3250_v23, %v3207_v17 }
 0x60a   :  { %v3246_v32 = vrot.slane %v3245_v27, 2  ;;  %v5462_v1 = vpop.eup %5461 }
 0x60b   :  { %v3252_v14 = vrot.slane %v3251_v41, 2  ;;  %v5464_v63 = vpop.eup %5463  ;;  %v3290_v9 = vcombine.low %v5460_v62, %v5462_v1 }
 0x60c   :  { %v3247_v42 = vadd.f32 %v3246_v32, %v3245_v27  ;;  %v5466_v0 = vpop.eup %5465 }
 0x60d   :  { %v3253_v50 = vadd.f32 %v3252_v14, %v3251_v41  ;;  %v5468_v7 = vpop.eup %5467  ;;  %v3289_v8 = vcombine.low %v5464_v63, %v5466_v0  ;;  %v3306_v45 = vrot.slane %v3290_v9, %v5965_v51 }
 0x60e   :  { %v3248_v54 = vrot.slane %v3247_v42, 1  ;;  %v5470_v16 = vpop.eup %5469 }
 0x60f   :  { %v3254_v58 = vrot.slane %v3253_v50, 1  ;;  %v3291_v18 = vcombine.low %v5468_v7, %v5470_v16  ;;  %v3299_v21 = vrot.slane %v3289_v8, %v5965_v51 }
 0x610   :  { %v3249_v59 = vadd.f32 %v3248_v54, %v3247_v42 }
 0x611   :  { %v3255_v55 = vadd.f32 %v3254_v58, %v3253_v50  ;;  %v3321_v23 = vcombine.low %v3299_v21, %v3306_v45  ;;  %v3313_v26 = vrot.slane %v3291_v18, %v5965_v51 }
 0x612   :  { %v3262_v60 = vmul.f32 0.125, %v3249_v59 }
 0x613   :  { %v3263_v61 = vmul.f32 0.125, %v3255_v55  ;;  %v3329_v41 = vrot.slane %v3321_v23, %v5965_v51 }
 0x614   :  { %v3271_v3 = vadd.f32 0.8, %v3262_v60 }
 0x615   :  { %v3272_v13 = vadd.f32 0.8, %v3263_v61 }
 0x616   :  { %5471 = vrsqrt.f32 %v3271_v3 }
 0x617   :  { %5473 = vrsqrt.f32 %v3272_v13 }
 0x620   :  { %v5472_v17 = vpop.eup %5471 }
 0x621   :  { %v5474_v20 = vpop.eup %5473 }
 0x622   :  { %v3292_v22 = vcombine.low %v5472_v17, %v5474_v20 }
 0x624   :  { %v3320_v27 = vrot.slane %v3292_v22, %v5965_v51 }
 0x626   :  { %v3322_v6 = vcombine.low %v3313_v26, %v3320_v27 }
 0x628   :  { %v3336_v11 = vrot.slane %v3322_v6, %v5965_v51 }
 0x62a   :  { %v3337_v32 = vcombine.low %v3329_v41, %v3336_v11 }
 0x62c   :  { %v3339_v34 = vmul.f32 %v3337_v32, %v3264_v25 }
 0x62e   :  { %v3361_v15 = vrot.slane %v3339_v34, %v6120_v36  ;;  %v3365_v14 = vrot.slane %v3339_v34, %v6125_v37  ;;  %v3369_v40 = vrot.slane %v3339_v34, %v6178_v43  ;;  %v3373_v42 = vrot.slane %v3339_v34, %v6183_v48 }
 0x62f   :  { %v3345_v46 = vrot.slane %v3339_v34, %v5957_v2  ;;  %v3349_v50 = vrot.slane %v3339_v34, %v5960_v4  ;;  %v3353_v53 = vrot.slane %v3339_v34, %v6021_v29  ;;  %v3357_v54 = vrot.slane %v3339_v34, %v6026_v31  ;;  %v5303_v34 = vld [vmem:[#allocation17 + $0x100] ss:$8 sps:$4 sm:$0xff]  }
 0x630   :  { %v3386_v56 = vmul.f32 %v3361_v15, %v6165_v33  ;;  %v3387_v58 = vmul.f32 %v3365_v14, %v6169_v35  ;;  %v3388_v59 = vmul.f32 %v3369_v40, %v6197_v57  ;;  %v3389_v55 = vmul.f32 %v3373_v42, %v6199_v12 }
 0x631   :  { %v3456_v60 = vmul.f32 %v6191_v5, %v3373_v42  ;;  %v3382_v61 = vmul.f32 %v3345_v46, %v6159_v28  ;;  %v3383_v3 = vmul.f32 %v3349_v50, %v6161_v30  ;;  %v3384_v13 = vmul.f32 %v3353_v53, %v6155_v38 }
 0x632   :  { %v3400_v62 = vcombine.low %v3386_v56, %v3387_v58  ;;  %v3401_v1 = vcombine.low %v3388_v59, %v3389_v55  ;;  %v3385_v63 = vmul.f32 %v3357_v54, %v6157_v24  ;;  %v3340_v24 = vld [vmem:[%s6311_s14] sm:$0xff]  ;;  %v3450_v8 = vmul.f32 %v3349_v50, %v6106_v19  ;;  %v5312_v56 = vld [vmem:[#allocation17 + $0x130] ss:$8 sps:$4 sm:$0xff]   ;;  %v5320_v55 = vld [vmem:[#allocation17 + $0x154] ss:$8 sps:$4 sm:$0xff]  }
 0x633   :  { %v3398_v0 = vcombine.low %v3382_v61, %v3383_v3  ;;  %v3449_v17 = vmul.f32 %v3345_v46, %v6104_v10  ;;  %v3452_v45 = vmul.f32 %v6133_v44, %v3357_v54  ;;  %v3451_v18 = vmul.f32 %v6128_v39, %v3353_v53  ;;  %v5306_v46 = vld [vmem:[#allocation17 + $0x110] ss:$8 sps:$4 sm:$0xff]   ;;  %v5311_v50 = vld [vmem:[#allocation17 + $0x124] ss:$8 sps:$4 sm:$0xff]   ;;  %v5309_v53 = vld [vmem:[#allocation17 + $0x120] ss:$8 sps:$4 sm:$0xff]  }
 0x634   :  { %v3422_v33 = vrot.slane %v3400_v62, %v5965_v51  ;;  %v3429_v35 = vrot.slane %v3401_v1, %v5965_v51  ;;  %v3399_v57 = vcombine.low %v3384_v13, %v3385_v63  ;;  %v3454_v20 = vmul.f32 %v6143_v52, %v3365_v14  ;;  %v5314_v54 = vld [vmem:[#allocation17 + $0x134] ss:$8 sps:$4 sm:$0xff]   ;;  %v5317_v58 = vld [vmem:[#allocation17 + $0x144] ss:$8 sps:$4 sm:$0xff]   ;;  %v5315_v59 = vld [vmem:[#allocation17 + $0x140] ss:$8 sps:$4 sm:$0xff]  }
 0x635   :  { %v3408_v12 = vrot.slane %v3398_v0, %v5965_v51  ;;  %v3453_v21 = vmul.f32 %v6139_v47, %v3361_v15  ;;  %v5323_v61 = vld [vmem:[#allocation17 + $0x164] ss:$8 sps:$4 sm:$0xff]   ;;  %v5321_v3 = vld [vmem:[#allocation17 + $0x160] ss:$8 sps:$4 sm:$0xff]   ;;  %v5326_v13 = vld [vmem:[#allocation17 + $0x174] ss:$8 sps:$4 sm:$0xff]  }
 0x636   :  { %v3431_v7 = vcombine.low %v3422_v33, %v3429_v35  ;;  %v3415_v5 = vrot.slane %v3399_v57, %v5965_v51  ;;  %v5324_v62 = vld [vmem:[#allocation17 + $0x170] ss:$8 sps:$4 sm:$0xff]   ;;  %v5329_v1 = vld [vmem:[#allocation17 + $0x184] ss:$8 sps:$4 sm:$0xff]   ;;  %v5327_v63 = vld [vmem:[#allocation17 + $0x180] ss:$8 sps:$4 sm:$0xff]  }
 0x637   :  { %v5332_v0 = vld [vmem:[#allocation17 + $0x194] ss:$8 sps:$4 sm:$0xff]   ;;  %v5330_v33 = vld [vmem:[#allocation17 + $0x190] ss:$8 sps:$4 sm:$0xff]   ;;  %v5335_v35 = vld [vmem:[#allocation17 + $0x1a4] ss:$8 sps:$4 sm:$0xff]  }
 0x638   :  { %v3445_v28 = vrot.slane %v3431_v7, %v5965_v51  ;;  %v3430_v30 = vcombine.low %v3408_v12, %v3415_v5  ;;  %v5333_v57 = vld [vmem:[#allocation17 + $0x1a0] ss:$8 sps:$4 sm:$0xff]   ;;  %v5338_v12 = vld [vmem:[#allocation17 + $0x1b4] ss:$8 sps:$4 sm:$0xff]   ;;  %v5336_v7 = vld [vmem:[#allocation17 + $0x1b0] ss:$8 sps:$4 sm:$0xff]  }
 0x639   :  { %v5341_v5 = vld [vmem:[#allocation17 + $0x1c4] ss:$8 sps:$4 sm:$0xff]  }
 0x63a   :  { %v3438_v38 = vrot.slane %v3430_v30, %v5965_v51  ;;  %v3455_v51 = vmul.f32 %v6189_v49, %v3369_v40  ;;  %v5308_v40 = vld [vmem:[#allocation17 + $0x114] ss:$8 sps:$4 sm:$0xff]  }
 0x63b   :  { %v5344_v30 = vld [vmem:[#allocation17 + $0x1d4] ss:$8 sps:$4 sm:$0xff]  }
 0x63c   :  { %v3446_v9 = vcombine.low %v3438_v38, %v3445_v28  ;;  %v5339_v28 = vld [vmem:[#allocation17 + $0x1c0] ss:$8 sps:$4 sm:$0xff]   ;;  %v5342_v38 = vld [vmem:[#allocation17 + $0x1d0] ss:$8 sps:$4 sm:$0xff]  }
 0x63e   :  { %v3448_v16 = vsub.f32 %v3340_v24, %v3446_v9  ;;  %v5347_v24 = vld [vmem:[#allocation17 + $0x1e4] ss:$8 sps:$4 sm:$0xff]   ;;  %v5345_v9 = vld [vmem:[#allocation17 + $0x1e0] ss:$8 sps:$4 sm:$0xff]  }
 0x640   :  { %v3465_v22 = vrot.slane %v3448_v16, %v5960_v4  ;;  %v3461_v23 = vrot.slane %v3448_v16, %v5957_v2  ;;  %v3473_v26 = vrot.slane %v3448_v16, %v6026_v31  ;;  %v3469_v19 = vrot.slane %v3448_v16, %v6021_v29 }
 0x641   :  { %v3481_v10 = vrot.slane %v3448_v16, %v6125_v37  ;;  %v3477_v44 = vrot.slane %v3448_v16, %v6120_v36  ;;  %v3489_v39 = vrot.slane %v3448_v16, %v6183_v48  ;;  %v3485_v52 = vrot.slane %v3448_v16, %v6178_v43  ;;  %v5350_v16 = vld [vmem:[#allocation17 + $0x1f4] ss:$8 sps:$4 sm:$0xff]  }
 0x642   :  { %v3499_v27 = vadd.f32 %v3465_v22, %v3450_v8  ;;  %v3498_v47 = vadd.f32 %v3461_v23, %v3449_v17  ;;  %v3501_v6 = vadd.f32 %v3473_v26, %v3452_v45  ;;  %v6255_v49 = vadd.f32 %v3469_v19, %v3451_v18  ;;  %v5348_v45 = vld [vmem:[#allocation17 + $0x1f0] ss:$8 sps:$4 sm:$0xff]   ;;  %v5353_v18 = vld [vmem:[#allocation17 + $0x204] ss:$8 sps:$4 sm:$0xff]   ;;  %v5356_v23 = vld [vmem:[#allocation17 + $0x214] ss:$8 sps:$4 sm:$0xff]  }
 0x643   :  { %v6257_v41 = vadd.f32 %v3481_v10, %v3454_v20  ;;  %v6259_v11 = vadd.f32 %v3477_v44, %v3453_v21  ;;  %v6261_v31 = vadd.f32 %v3489_v39, %v3456_v60  ;;  %v6263_v29 = vadd.f32 %v3485_v52, %v3455_v51  ;;  %v5318_v60 = vld [vmem:[#allocation17 + $0x150] ss:$8 sps:$4 sm:$0xff]   ;;  %v5351_v51 = vld [vmem:[#allocation17 + $0x200] ss:$8 sps:$4 sm:$0xff]   ;;  %v5359_v10 = vld [vmem:[#allocation17 + $0x224] ss:$8 sps:$4 sm:$0xff]  }
 0x644   :  { %vm3507_vm9 = vcmp.gt.f32.partialorder %v3499_v27, 0.0  ;;  %v3515_v37 = vmul.f32 0.2, %v3499_v27  ;;  %vm3506_vm10 = vcmp.gt.f32.partialorder %v3498_v47, 0.0  ;;  %v3514_v36 = vmul.f32 0.2, %v3498_v47 }
 0x645   :  { %vm3509_vm11 = vcmp.gt.f32.partialorder %v3501_v6, 0.0  ;;  %v3517_v48 = vmul.f32 0.2, %v3501_v6  ;;  %v3516_v8 = vmul.f32 0.2, %v6255_v49  ;;  %vm3508_vm12 = vcmp.gt.f32.partialorder %v6255_v49, 0.0 }
 0x646   :  { %v3523_v43 = vsel %vm3507_vm9, %v3499_v27, %v3515_v37  ;;  %v3522_v25 = vsel %vm3506_vm10, %v3498_v47, %v3514_v36  ;;  %v3519_v17 = vmul.f32 0.2, %v6257_v41  ;;  %vm3511_vm13 = vcmp.gt.f32.partialorder %v6257_v41, 0.0  ;;  %v5354_v19 = vld [vmem:[#allocation17 + $0x210] ss:$8 sps:$4 sm:$0xff]  }
 0x647   :  { %v5057_v32 = vpack.c.bf16 %v3523_v43, %v3523_v43  ;;  %v5056_v15 = vpack.c.bf16 %v3522_v25, %v3522_v25  ;;  %v3525_v14 = vsel %vm3509_vm11, %v3501_v6, %v3517_v48  ;;  %v3524_v20 = vsel %vm3508_vm12, %v6255_v49, %v3516_v8  ;;  %v5357_v44 = vld [vmem:[#allocation17 + $0x220] ss:$8 sps:$4 sm:$0xff]   ;;  %v5362_v39 = vld [vmem:[#allocation17 + $0x234] ss:$8 sps:$4 sm:$0xff]   ;;  %v5360_v52 = vld [vmem:[#allocation17 + $0x230] ss:$8 sps:$4 sm:$0xff]  }
 0x648   :  { %v5059_v42 = vpack.c.bf16 %v3525_v14, %v3525_v14  ;;  %v3527_v21 = vsel %vm3511_vm13, %v6257_v41, %v3519_v17  ;;  %v5058_v22 = vpack.c.bf16 %v3524_v20, %v3524_v20  ;;  %v5365_v27 = vld [vmem:[#allocation17 + $0x244] ss:$8 sps:$4 sm:$0xff]   ;;  %v5363_v47 = vld [vmem:[#allocation17 + $0x240] ss:$8 sps:$4 sm:$0xff]   ;;  %v5368_v6 = vld [vmem:[#allocation17 + $0x254] ss:$8 sps:$4 sm:$0xff]  }
 0x649   :  { %4410 = vmatprep.mubr.bf16.mxu0 %v5057_v32  ;;  %v5061_v26 = vpack.c.bf16 %v3527_v21, %v3527_v21  ;;  %v5366_v49 = vld [vmem:[#allocation17 + $0x250] ss:$8 sps:$4 sm:$0xff]   ;;  %v5371_v41 = vld [vmem:[#allocation17 + $0x264] ss:$8 sps:$4 sm:$0xff]   ;;  %v5369_v37 = vld [vmem:[#allocation17 + $0x260] ss:$8 sps:$4 sm:$0xff]  }
 0x64a   :  { %4411 = vmatmul.mubr.bf16.vlgmr.msra.gmra.mrb[12].mxu0 %v5056_v15  ;;  %v5374_v36 = vld [vmem:[#allocation17 + $0x274] ss:$8 sps:$4 sm:$0xff]   ;;  %v5372_v48 = vld [vmem:[#allocation17 + $0x270] ss:$8 sps:$4 sm:$0xff]   ;;  %v5377_v43 = vld [vmem:[#allocation17 + $0x284] ss:$8 sps:$4 sm:$0xff]  }
 0x64b   :  { %4420 = vmatpush1.bf16.msra.mxu0 %v5303_v34  ;;  %4451 = vmatprep.mubr.bf16.mxu0 %v5059_v42  ;;  %v5375_v25 = vld [vmem:[#allocation17 + $0x280] ss:$8 sps:$4 sm:$0xff]   ;;  %v5380_v32 = vld [vmem:[#allocation17 + $0x294] ss:$8 sps:$4 sm:$0xff]   ;;  %v5378_v34 = vld [vmem:[#allocation17 + $0x290] ss:$8 sps:$4 sm:$0xff]  }
 0x64c   :  { %4421 = vmatprep.subr.bf16.mxu0 %v5308_v40  ;;  %v5383_v15 = vld [vmem:[#allocation17 + $0x2a4] ss:$8 sps:$4 sm:$0xff]   ;;  %v5381_v14 = vld [vmem:[#allocation17 + $0x2a0] ss:$8 sps:$4 sm:$0xff]   ;;  %v5386_v40 = vld [vmem:[#allocation17 + $0x2b4] ss:$8 sps:$4 sm:$0xff]  }
 0x64d   :  { %v5384_v42 = vld [vmem:[#allocation17 + $0x2b0] ss:$8 sps:$4 sm:$0xff]   ;;  %vm3510_vm14 = vcmp.gt.f32.partialorder %v6259_v11, 0.0  ;;  %vm3513_vm15 = vcmp.gt.f32.partialorder %v6261_v31, 0.0  ;;  %v5425_v8 = vld [vmem:[#allocation17 + $0x384] ss:$8 sps:$4 sm:$0xff]  }
 0x64e   :  { %v5423_v17 = vld [vmem:[#allocation17 + $0x380] ss:$8 sps:$4 sm:$0xff]   ;;  %v5431_v20 = vld [vmem:[#allocation17 + $0x3a4] ss:$8 sps:$4 sm:$0xff]   ;;  %vm3512_vm0 = vcmp.gt.f32.partialorder %v6263_v29, 0.0 }
 0x64f   :  { %4422 = vmatpush1.bf16.msra.mxu0 %v5306_v46  ;;  %v5389_v46 = vld [vmem:[#allocation17 + $0x2c4] ss:$8 sps:$4 sm:$0xff]   ;;  %v5429_v21 = vld [vmem:[#allocation17 + $0x3a0] ss:$8 sps:$4 sm:$0xff]  }
 0x650   :  { %4423 = vmatprep.subr.bf16.mxu0 %v5311_v50  ;;  %v5387_v50 = vld [vmem:[#allocation17 + $0x2c0] ss:$8 sps:$4 sm:$0xff]  }
 0x653   :  { %4424 = vmatpush1.bf16.msra.mxu0 %v5309_v53  ;;  %v5392_v53 = vld [vmem:[#allocation17 + $0x2d4] ss:$8 sps:$4 sm:$0xff]  }
 0x654   :  { %4425 = vmatprep.subr.bf16.mxu0 %v5314_v54  ;;  %v5390_v54 = vld [vmem:[#allocation17 + $0x2d0] ss:$8 sps:$4 sm:$0xff]  }
 0x657   :  { %4426 = vmatpush1.bf16.msra.mxu0 %v5312_v56  ;;  %v5395_v56 = vld [vmem:[#allocation17 + $0x2e4] ss:$8 sps:$4 sm:$0xff]  }
 0x658   :  { %4427 = vmatprep.subr.bf16.mxu0 %v5317_v58  ;;  %v5393_v58 = vld [vmem:[#allocation17 + $0x2e0] ss:$8 sps:$4 sm:$0xff]  }
 0x65b   :  { %4428 = vmatpush1.bf16.msra.mxu0 %v5315_v59  ;;  %v5398_v59 = vld [vmem:[#allocation17 + $0x2f4] ss:$8 sps:$4 sm:$0xff]  }
 0x65c   :  { %4429 = vmatprep.subr.bf16.mxu0 %v5320_v55  ;;  %v3518_v55 = vmul.f32 0.2, %v6259_v11 }
 0x65f   :  { %4430 = vmatpush1.bf16.msra.mxu0 %v5318_v60  ;;  %v3521_v60 = vmul.f32 0.2, %v6261_v31 }
 0x660   :  { %4431 = vmatprep.subr.bf16.mxu0 %v5323_v61  ;;  %v5396_v61 = vld [vmem:[#allocation17 + $0x2f0] ss:$8 sps:$4 sm:$0xff]  }
 0x663   :  { %4432 = vmatpush1.bf16.msra.mxu0 %v5321_v3  ;;  %v5401_v3 = vld [vmem:[#allocation17 + $0x304] ss:$8 sps:$4 sm:$0xff]  }
 0x664   :  { %4433 = vmatprep.subr.bf16.mxu0 %v5326_v13  ;;  %v3526_v13 = vsel %vm3510_vm14, %v6259_v11, %v3518_v55  ;;  %v5408_v11 = vld [vmem:[#allocation17 + $0x330] ss:$8 sps:$4 sm:$0xff]  }
 0x667   :  { %4434 = vmatpush1.bf16.msra.mxu0 %v5324_v62  ;;  %v3529_v62 = vsel %vm3513_vm15, %v6261_v31, %v3521_v60  ;;  %v5413_v31 = vld [vmem:[#allocation17 + $0x344] ss:$8 sps:$4 sm:$0xff]  }
 0x668   :  { %4435 = vmatprep.subr.bf16.mxu0 %v5329_v1  ;;  %v5399_v1 = vld [vmem:[#allocation17 + $0x300] ss:$8 sps:$4 sm:$0xff]  }
 0x66b   :  { %4436 = vmatpush1.bf16.msra.mxu0 %v5327_v63  ;;  %v5060_v63 = vpack.c.bf16 %v3526_v13, %v3526_v13 }
 0x66c   :  { %4437 = vmatprep.subr.bf16.mxu0 %v5332_v0  ;;  %v5404_v0 = vld [vmem:[#allocation17 + $0x314] ss:$8 sps:$4 sm:$0xff]  }
 0x66f   :  { %4438 = vmatpush1.bf16.msra.mxu0 %v5330_v33  ;;  %v5063_v33 = vpack.c.bf16 %v3529_v62, %v3529_v62 }
 0x670   :  { %4439 = vmatprep.subr.bf16.mxu0 %v5335_v35  ;;  %v5402_v35 = vld [vmem:[#allocation17 + $0x310] ss:$8 sps:$4 sm:$0xff]  }
 0x673   :  { %4440 = vmatpush1.bf16.msra.mxu0 %v5333_v57  ;;  %v5407_v57 = vld [vmem:[#allocation17 + $0x324] ss:$8 sps:$4 sm:$0xff]  }
 0x674   :  { %4441 = vmatprep.subr.bf16.mxu0 %v5338_v12  ;;  %v5405_v12 = vld [vmem:[#allocation17 + $0x320] ss:$8 sps:$4 sm:$0xff]  }
 0x677   :  { %4442 = vmatpush1.bf16.msra.mxu0 %v5336_v7  ;;  %v5410_v7 = vld [vmem:[#allocation17 + $0x334] ss:$8 sps:$4 sm:$0xff]  }
 0x678   :  { %4443 = vmatprep.subr.bf16.mxu0 %v5341_v5  ;;  %v5411_v5 = vld [vmem:[#allocation17 + $0x340] ss:$8 sps:$4 sm:$0xff]  }
 0x67b   :  { %4444 = vmatpush1.bf16.msra.mxu0 %v5339_v28  ;;  %v5416_v28 = vld [vmem:[#allocation17 + $0x354] ss:$8 sps:$4 sm:$0xff]  }
 0x67c   :  { %4445 = vmatprep.subr.bf16.mxu0 %v5344_v30  ;;  %v5414_v30 = vld [vmem:[#allocation17 + $0x350] ss:$8 sps:$4 sm:$0xff]  }
 0x67f   :  { %4446 = vmatpush1.bf16.msra.mxu0 %v5342_v38  ;;  %v5419_v38 = vld [vmem:[#allocation17 + $0x364] ss:$8 sps:$4 sm:$0xff]  }
 0x680   :  { %4447 = vmatprep.subr.bf16.mxu0 %v5347_v24  ;;  %v5417_v24 = vld [vmem:[#allocation17 + $0x360] ss:$8 sps:$4 sm:$0xff]  }
 0x683   :  { %4448 = vmatpush1.bf16.msra.mxu0 %v5345_v9  ;;  %v5422_v9 = vld [vmem:[#allocation17 + $0x374] ss:$8 sps:$4 sm:$0xff]  }
 0x684   :  { %4449 = vmatprep.subr.bf16.mxu0 %v5350_v16  ;;  %v5420_v16 = vld [vmem:[#allocation17 + $0x370] ss:$8 sps:$4 sm:$0xff]  }
 0x687   :  { %4450 = vmatpush1.bf16.msra.mxu0 %v5348_v45  ;;  %v5428_v45 = vld [vmem:[#allocation17 + $0x394] ss:$8 sps:$4 sm:$0xff]  }
 0x688   :  { %4460 = vmatprep.subr.bf16.mxu0 %v5353_v18  ;;  %v5426_v18 = vld [vmem:[#allocation17 + $0x390] ss:$8 sps:$4 sm:$0xff]  }
 0x68a   :  { %4452 = vmatmul.mubr.bf16.vlgmr.msra.gmra.mrb[12].mxu0 %v5058_v22  ;;  %v5432_v22 = vld [vmem:[#allocation17 + $0x3b0] ss:$8 sps:$4 sm:$0xff]  }
 0x68b   :  { %4461 = vmatpush1.bf16.msra.mxu0 %v5351_v51  ;;  %4492 = vmatprep.mubr.bf16.mxu0 %v5061_v26  ;;  %v5434_v51 = vld [vmem:[#allocation17 + $0x3b4] ss:$8 sps:$4 sm:$0xff]   ;;  %v5435_v26 = vld [vmem:[#allocation17 + $0x3c0] ss:$8 sps:$4 sm:$0xff]  }
 0x68c   :  { %4462 = vmatprep.subr.bf16.mxu0 %v5356_v23  ;;  %v5437_v23 = vld [vmem:[#allocation17 + $0x3c4] ss:$8 sps:$4 sm:$0xff]  }
 0x68f   :  { %4463 = vmatpush1.bf16.msra.mxu0 %v5354_v19  ;;  %v5440_v19 = vld [vmem:[#allocation17 + $0x3d4] ss:$8 sps:$4 sm:$0xff]  }
 0x690   :  { %4464 = vmatprep.subr.bf16.mxu0 %v5359_v10  ;;  %v5438_v10 = vld [vmem:[#allocation17 + $0x3d0] ss:$8 sps:$4 sm:$0xff]  }
 0x693   :  { %4465 = vmatpush1.bf16.msra.mxu0 %v5357_v44  ;;  %v5443_v44 = vld [vmem:[#allocation17 + $0x3e4] ss:$8 sps:$4 sm:$0xff]  }
 0x694   :  { %4466 = vmatprep.subr.bf16.mxu0 %v5362_v39  ;;  %v5441_v39 = vld [vmem:[#allocation17 + $0x3e0] ss:$8 sps:$4 sm:$0xff]  }
 0x697   :  { %4467 = vmatpush1.bf16.msra.mxu0 %v5360_v52  ;;  %v5446_v52 = vld [vmem:[#allocation17 + $0x3f4] ss:$8 sps:$4 sm:$0xff]  }
 0x698   :  { %4468 = vmatprep.subr.bf16.mxu0 %v5365_v27  ;;  %v3520_v27 = vmul.f32 0.2, %v6263_v29 }
 0x69b   :  { %4469 = vmatpush1.bf16.msra.mxu0 %v5363_v47  ;;  %v5444_v47 = vld [vmem:[#allocation17 + $0x3f0] ss:$8 sps:$4 sm:$0xff]  }
 0x69c   :  { %4470 = vmatprep.subr.bf16.mxu0 %v5368_v6  ;;  %v3528_v6 = vsel %vm3512_vm0, %v6263_v29, %v3520_v27 }
 0x69f   :  { %4471 = vmatpush1.bf16.msra.mxu0 %v5366_v49  ;;  %v5062_v49 = vpack.c.bf16 %v3528_v6, %v3528_v6 }
 0x6a0   :  { %4472 = vmatprep.subr.bf16.mxu0 %v5371_v41  ;;  %v3698_v41 = vld [vmem:[%s6324_s28] sm:$0x3] }
 0x6a3   :  { %4473 = vmatpush1.bf16.msra.mxu0 %v5369_v37  ;;  %v3703_v37 = vrot.slane %v3698_v41, %v5957_v2 }
 0x6a4   :  { %4474 = vmatprep.subr.bf16.mxu0 %v5374_v36  ;;  %v3707_v36 = vrot.slane %v3698_v41, %v5960_v4 }
 0x6a7   :  { %4475 = vmatpush1.bf16.msra.mxu0 %v5372_v48 }
 0x6a8   :  { %4476 = vmatprep.subr.bf16.mxu0 %v5377_v43 }
 0x6ab   :  { %4477 = vmatpush1.bf16.msra.mxu0 %v5375_v25 }
 0x6ac   :  { %4478 = vmatprep.subr.bf16.mxu0 %v5380_v32 }
 0x6af   :  { %4479 = vmatpush1.bf16.msra.mxu0 %v5378_v34 }
 0x6b0   :  { %4480 = vmatprep.subr.bf16.mxu0 %v5383_v15 }
 0x6b3   :  { %4481 = vmatpush1.bf16.msra.mxu0 %v5381_v14 }
 0x6b4   :  { %4482 = vmatprep.subr.bf16.mxu0 %v5386_v40 }
 0x6b7   :  { %4483 = vmatpush1.bf16.msra.mxu0 %v5384_v42 }
 0x6b8   :  { %4484 = vmatprep.subr.bf16.mxu0 %v5389_v46 }
 0x6bb   :  { %4485 = vmatpush1.bf16.msra.mxu0 %v5387_v50 }
 0x6bc   :  { %4486 = vmatprep.subr.bf16.mxu0 %v5392_v53 }
 0x6bf   :  { %4487 = vmatpush1.bf16.msra.mxu0 %v5390_v54 }
 0x6c0   :  { %4488 = vmatprep.subr.bf16.mxu0 %v5395_v56 }
 0x6c3   :  { %4489 = vmatpush1.bf16.msra.mxu0 %v5393_v58 }
 0x6c4   :  { %4490 = vmatprep.subr.bf16.mxu0 %v5398_v59 }
 0x6c7   :  { %4491 = vmatpush1.bf16.msra.mxu0 %v5396_v61 }
 0x6c8   :  { %4501 = vmatprep.subr.bf16.mxu0 %v5401_v3 }
 0x6ca   :  { %4493 = vmatmul.mubr.bf16.vlgmr.msra.gmra.mrb[12].mxu0 %v5060_v63 }
 0x6cb   :  { %4502 = vmatpush1.bf16.msra.mxu0 %v5399_v1  ;;  %4533 = vmatprep.mubr.bf16.mxu0 %v5063_v33 }
 0x6cc   :  { %4503 = vmatprep.subr.bf16.mxu0 %v5404_v0 }
 0x6cf   :  { %4504 = vmatpush1.bf16.msra.mxu0 %v5402_v35 }
 0x6d0   :  { %4505 = vmatprep.subr.bf16.mxu0 %v5407_v57 }
 0x6d3   :  { %4506 = vmatpush1.bf16.msra.mxu0 %v5405_v12 }
 0x6d4   :  { %4507 = vmatprep.subr.bf16.mxu0 %v5410_v7 }
 0x6d7   :  { %4508 = vmatpush1.bf16.msra.mxu0 %v5408_v11 }
 0x6d8   :  { %4509 = vmatprep.subr.bf16.mxu0 %v5413_v31 }
 0x6db   :  { %4510 = vmatpush1.bf16.msra.mxu0 %v5411_v5 }
 0x6dc   :  { %4511 = vmatprep.subr.bf16.mxu0 %v5416_v28 }
 0x6df   :  { %4512 = vmatpush1.bf16.msra.mxu0 %v5414_v30 }
 0x6e0   :  { %4513 = vmatprep.subr.bf16.mxu0 %v5419_v38 }
 0x6e3   :  { %4514 = vmatpush1.bf16.msra.mxu0 %v5417_v24 }
 0x6e4   :  { %4515 = vmatprep.subr.bf16.mxu0 %v5422_v9 }
 0x6e7   :  { %4516 = vmatpush1.bf16.msra.mxu0 %v5420_v16 }
 0x6e8   :  { %4517 = vmatprep.subr.bf16.mxu0 %v5425_v8 }
 0x6eb   :  { %4518 = vmatpush1.bf16.msra.mxu0 %v5423_v17 }
 0x6ec   :  { %4519 = vmatprep.subr.bf16.mxu0 %v5428_v45 }
 0x6ef   :  { %4520 = vmatpush1.bf16.msra.mxu0 %v5426_v18 }
 0x6f0   :  { %4521 = vmatprep.subr.bf16.mxu0 %v5431_v20 }
 0x6f3   :  { %4522 = vmatpush1.bf16.msra.mxu0 %v5429_v21 }
 0x6f4   :  { %4523 = vmatprep.subr.bf16.mxu0 %v5434_v51 }
 0x6f7   :  { %4524 = vmatpush1.bf16.msra.mxu0 %v5432_v22 }
 0x6f8   :  { %4525 = vmatprep.subr.bf16.mxu0 %v5437_v23 }
 0x6fb   :  { %4526 = vmatpush1.bf16.msra.mxu0 %v5435_v26 }
 0x6fc   :  { %4527 = vmatprep.subr.bf16.mxu0 %v5440_v19 }
 0x6ff   :  { %4528 = vmatpush1.bf16.msra.mxu0 %v5438_v10 }
 0x700   :  { %4529 = vmatprep.subr.bf16.mxu0 %v5443_v44 }
 0x703   :  { %4530 = vmatpush1.bf16.msra.mxu0 %v5441_v39 }
 0x704   :  { %4531 = vmatprep.subr.bf16.mxu0 %v5446_v52 }
 0x707   :  { %4532 = vmatpush1.bf16.msra.mxu0 %v5444_v47 }
 0x70a   :  { %4534 = vmatmul.mubr.bf16.vlgmr.msra.gmra.mrb[12].mxu0 %v5062_v49 }
 0x7dd   :  { %v4535_v48 = vpop.f32.mrb[12].mxu0 }
 0x7de   :  { %v5085_v43 = vadd.f32 %v4535_v48, %v3703_v37  ;;  %v4537_v25 = vpop.f32.mrb[13].mxu0 }
 0x7df   :  { %v5086_v32 = vadd.f32 %v4537_v25, %v3707_v36  ;;  %v4539_v34 = vpop.f32.mrb[14].mxu0 }
 0x7e0   :  { %5475 = vtanh.f32 %v5085_v43  ;;  %v4540_v15 = vpop.f32.mrb[15].mxu0 }
 0x7e1   :  { %5477 = vtanh.f32 %v5086_v32 }
 0x7ea   :  { %v5476_v29 = vpop.eup %5475 }
 0x7eb   :  { %v5478_v14 = vpop.eup %5477  ;;  %4544 = vst [vmem:[#allocation18] sm:$0xff] %v5476_v29 }
 0x7ec   :  { %4545 = vst [vmem:[#allocation18 + $0x8] sm:$0xff] %v5478_v14 }
 0x7ed   :  { %5688 = shalt.err (!%p5685_p6)
}
 0x7ee   :  { %s6325_s16 = sld [smem:[#allocation28_spill]] }
 0x7f4   :  { %s5689_s3 = scalar_lea.hbm %s6325_s16, 256 }
 0x7f5   :  { %p5690_p7 = scmp.ne.s32.totalorder %s6325_s16, %s5689_s3  ;;  %p5693_p8 = scmp.lt.u32.totalorder %s5689_s3, %s6325_s16 }
 0x7f7   :  { %p5695_p9 = pnand %p5693_p8, %p5690_p7 }
 0x7f9   :  { %5698 = shalt.err (!%p5695_p9)
}
 0x7fa   :  { %4559 = dma.vmem_to_hbm [thread:$0]  %s4557_s22, 256, %s6325_s16, [#allocation5]  }
 0x7fb   :  { %5709 = dma.done.wait [#allocation5], 256  }
 0x7fc   :  { %5710 = vsyncadd [#allocation5], 4294967040 }
 0x7fd   :  { %4563 = vsyncpa [#allocation4], 1 }
 0x7fe   :  { %4564 = vsyncpa [#allocation7], 1 }
 0x7ff   :  { %4565 = vsyncpa [#allocation10], 1 }
 0x800   :  { %4566 = vsyncpa [#allocation13], 1 }
 0x801   :  { %4567 = vsyncpa [#allocation16], 1 }
 0x802   :  { %4568 = vsyncpa [#allocation5], 1 }

</bundles_post_ra>
